<compile_context>
chip_gen: v7x
topology: tpu7x:2x2x1
jax: 0.10.0
libtpu: 0.0.40
codegen_flags: <defaults>
</compile_context>

<pallas_src>
import functools

import jax
import jax.numpy as jnp
from jax import lax
from jax.experimental import pallas as pl
from jax.experimental.pallas import tpu as pltpu

KSIZE = 4
BN_EPS = 1e-5
LEAKY_SLOPE = 0.2


# ----------------------------------------------------------------------------
# Pallas kernels
# ----------------------------------------------------------------------------
def _matmul_bn_kernel(w_ref, x_ref, y_ref, s_ref):
    # Y(C, tm) = W(C, K) @ X^T(K, tm), bf16 inputs, f32 accumulate.
    y = jnp.dot(w_ref[0], x_ref[0], preferred_element_type=jnp.float32)
    y_ref[0] = y
    # Fused per-channel partial BN statistics for this grid block:
    # column 0 = sum, column 1 = sum of squares (reduced along lanes -> XLU).
    s_ref[0, 0] = jnp.concatenate(
        [jnp.sum(y, axis=1, keepdims=True),
         jnp.sum(y * y, axis=1, keepdims=True)], axis=1)


def _matmul_tanh_kernel(w_ref, x_ref, y_ref):
    # Final layer: tanh fused into the matmul epilogue (no BN statistics).
    y = jnp.dot(w_ref[0], x_ref[0], preferred_element_type=jnp.float32)
    y_ref[0] = jnp.tanh(y)


def _bn_leaky_kernel(y_ref, scale_ref, shift_ref, o_ref):
    # Per-channel affine (folded BN) + LeakyReLU(0.2), f32 math, bf16 store.
    y = y_ref[0] * scale_ref[...] + shift_ref[...]
    o_ref[0] = jnp.where(y >= 0.0, y, LEAKY_SLOPE * y).astype(o_ref.dtype)


def pallas_matmul_bn(w3, x3, tm):
    """Batched (over phases) W @ X^T with fused partial BN stats.

    w3: (P, C, K) f32/bf16, x3: (P, K, M) bf16.  Returns Y (P, C, M) f32 and
    per-block partial stats (P, M//tm, C, 2) f32."""
    P, C, K = w3.shape
    M = x3.shape[2]
    nt = M // tm
    return pl.pallas_call(
        _matmul_bn_kernel,
        out_shape=(jax.ShapeDtypeStruct((P, C, M), jnp.float32),
                   jax.ShapeDtypeStruct((P, nt, C, 2), jnp.float32)),
        grid=(P, nt),
        in_specs=[pl.BlockSpec((1, C, K), lambda p, i: (p, 0, 0)),
                  pl.BlockSpec((1, K, tm), lambda p, i: (p, 0, i))],
        out_specs=(pl.BlockSpec((1, C, tm), lambda p, i: (p, 0, i)),
                   pl.BlockSpec((1, 1, C, 2), lambda p, i: (p, i, 0, 0))),
        compiler_params=pltpu.CompilerParams(
            dimension_semantics=("parallel", "parallel")),
    )(w3.astype(jnp.bfloat16), x3.astype(jnp.bfloat16))


def pallas_matmul_tanh(w3, x3, tm):
    """Batched W @ X^T with tanh fused into the epilogue (final layer)."""
    P, C, K = w3.shape
    M = x3.shape[2]
    return pl.pallas_call(
        _matmul_tanh_kernel,
        out_shape=jax.ShapeDtypeStruct((P, C, M), jnp.float32),
        grid=(P, M // tm),
        in_specs=[pl.BlockSpec((1, C, K), lambda p, i: (p, 0, 0)),
                  pl.BlockSpec((1, K, tm), lambda p, i: (p, 0, i))],
        out_specs=pl.BlockSpec((1, C, tm), lambda p, i: (p, 0, i)),
        compiler_params=pltpu.CompilerParams(
            dimension_semantics=("parallel", "parallel")),
    )(w3.astype(jnp.bfloat16), x3.astype(jnp.bfloat16))


def pallas_bn_leaky(y3, scale, shift, tm, out_dtype=jnp.bfloat16):
    """Fused BN affine + LeakyReLU over Y in (P, C, M) layout."""
    P, C, M = y3.shape
    return pl.pallas_call(
        _bn_leaky_kernel,
        out_shape=jax.ShapeDtypeStruct((P, C, M), out_dtype),
        grid=(P, M // tm),
        in_specs=[pl.BlockSpec((1, C, tm), lambda p, i: (p, 0, i)),
                  pl.BlockSpec((C, 1), lambda p, i: (0, 0)),
                  pl.BlockSpec((C, 1), lambda p, i: (0, 0))],
        out_specs=pl.BlockSpec((1, C, tm), lambda p, i: (p, 0, i)),
        compiler_params=pltpu.CompilerParams(
            dimension_semantics=("parallel", "parallel")),
    )(y3, scale.reshape(C, 1), shift.reshape(C, 1))


# ----------------------------------------------------------------------------
# Plain-JAX glue: layout plumbing only (padding, tap gathering, phase packing)
# ----------------------------------------------------------------------------
def _pick_tile(M, K, C, cap=8192, vmem_budget=4 << 20):
    """Largest lane tile tm that divides M, is a multiple of 128 (or == M),
    and keeps the double-buffered block footprint under a small VMEM budget."""
    per_col = 2 * (K * 2 + C * 4)               # bf16 X column + f32 Y column, x2 buffers
    cap = min(cap, max(128, vmem_budget // max(per_col, 1)))
    if M <= cap:
        return M                                 # full-M block (allowed: equals array dim)
    t = (cap // 128) * 128
    while t >= 128:
        if M % t == 0:
            return t
        t -= 128
    return M                                     # fallback: single full-M block (still correct)


def full_im2col_T(h_c, w_conv, pad):
    """Stride-1 ConvTranspose2d -> pad + transposed im2col.

    h_c: (Cin, N, H, W), w_conv: (Cout, Cin, 4, 4) equivalent regular-conv weight.
    Returns X^T (1, Cin*16, N*Ho*Wo), W (1, Cout, Cin*16), (N, Ho, Wo)."""
    Cin, N, H, W = h_c.shape
    Cout = w_conv.shape[0]
    p = KSIZE - 1 - pad
    hp = jnp.pad(h_c, ((0, 0), (0, 0), (p, p), (p, p)))
    Ho, Wo = H + 2 * p - KSIZE + 1, W + 2 * p - KSIZE + 1
    taps = [hp[:, :, i:i + Ho, j:j + Wo]
            for i in range(KSIZE) for j in range(KSIZE)]
    xT = jnp.stack(taps, axis=1).reshape(Cin * KSIZE * KSIZE, N * Ho * Wo)
    wm = w_conv.reshape(Cout, Cin * KSIZE * KSIZE)
    return xT[None], wm[None], (N, Ho, Wo)


def phase_decompose(h_c, w_conv):
    """Stride-2, k=4, pad=1 ConvTranspose2d -> 4 output-phase 2x2 convolutions.

    out[:, :, 2a+ph, 2b+pw] uses taps w_conv[..., 2*dh+ph, 2*dw+pw] at input
    positions (a+ph+dh, b+pw+dw) of the 1-padded input (no zero insertion).
    Returns X^T (4, Cin*4, N*H*W), W (4, Cout, Cin*4), (N, H, W)."""
    Cin, N, H, W = h_c.shape
    Cout = w_conv.shape[0]
    hp = jnp.pad(h_c, ((0, 0), (0, 0), (1, 1), (1, 1)))
    x_list, w_list = [], []
    for ph in range(2):
        for pw in range(2):
            taps = [hp[:, :, ph + dh:ph + dh + H, pw + dw:pw + dw + W]
                    for dh in range(2) for dw in range(2)]
            x_list.append(jnp.stack(taps, axis=1).reshape(Cin * 4, N * H * W))
            w_list.append(w_conv[:, :, ph::2, pw::2].reshape(Cout, Cin * 4))
    return jnp.stack(x_list, axis=0), jnp.stack(w_list, axis=0), (N, H, W)


# ----------------------------------------------------------------------------
# Generator: params + forward
# ----------------------------------------------------------------------------
def make_layer_cfg(nz, ngf, nc):
    return [
        # (cin, cout, stride, pad, has_bn)
        (nz,       ngf * 10, 1, 0, True),
        (ngf * 10, ngf * 8,  2, 1, True),
        (ngf * 8,  ngf * 4,  2, 1, True),
        (ngf * 4,  ngf * 2,  2, 1, True),
        (ngf * 2,  ngf,      2, 1, True),
        (ngf,      nc,       2, 1, False),
    ]


def init_generator_params(key, nz, ngf, nc):
    cfg = make_layer_cfg(nz, ngf, nc)
    layers = []
    for li, (cin, cout, s, p, has_bn) in enumerate(cfg):
        kw, kg, kb = jax.random.split(jax.random.fold_in(key, li), 3)
        w = 0.02 * jax.random.normal(kw, (cin, cout, KSIZE, KSIZE), jnp.float32)
        layer = {"w": w, "stride": s, "pad": p, "has_bn": has_bn}
        if has_bn:
            layer["gamma"] = 1.0 + 0.1 * jax.random.normal(kg, (cout,), jnp.float32)
            layer["beta"] = 0.1 * jax.random.normal(kb, (cout,), jnp.float32)
        layers.append(layer)
    return layers


def generator_forward(x_nchw, layers):
    # Channel-major activation layout (C, N, H, W); one transpose in, one out.
    h = jnp.transpose(x_nchw, (1, 0, 2, 3)).astype(jnp.bfloat16)
    for layer in layers:
        # Equivalent regular-conv weight: flip spatial, swap in/out channels.
        w_conv = jnp.transpose(layer["w"][:, :, ::-1, ::-1], (1, 0, 2, 3))
        if layer["stride"] == 1:
            x3, w3, (N, Ho, Wo) = full_im2col_T(h, w_conv, layer["pad"])
            Hi = Wi = None
        else:
            assert layer["stride"] == 2 and layer["pad"] == 1
            x3, w3, (N, Hi, Wi) = phase_decompose(h, w_conv)
            Ho, Wo = 2 * Hi, 2 * Wi
        P, C, K = w3.shape
        Mp = x3.shape[2]
        tm = _pick_tile(Mp, K, C)
        assert Mp % tm == 0, (Mp, tm)

        if layer["has_bn"]:
            y3, part = pallas_matmul_bn(w3, x3, tm)          # Y f32, partial stats
            tot = part.sum(axis=(0, 1))                      # (C, 2) race-free reduce
            m_total = P * Mp                                 # == N * Ho * Wo
            mean = tot[:, 0] / m_total
            var = tot[:, 1] / m_total - mean * mean          # biased variance (train BN)
            scale = layer["gamma"] * lax.rsqrt(var + BN_EPS)
            shift = layer["beta"] - mean * scale
            y3 = pallas_bn_leaky(y3, scale, shift, tm, out_dtype=jnp.bfloat16)
        else:
            y3 = pallas_matmul_tanh(w3, x3, tm)              # f32, tanh fused

        # Back to channel-major spatial layout (C, N, Ho, Wo).
        if layer["stride"] == 1:
            h = y3.reshape(C, N, Ho, Wo)
        else:
            h = (y3.reshape(2, 2, C, N, Hi, Wi)
                   .transpose(2, 3, 4, 0, 5, 1)              # (C, N, H, ph, W, pw)
                   .reshape(C, N, Ho, Wo))
    return jnp.transpose(h, (1, 0, 2, 3)).astype(jnp.float32)   # NCHW


# ----------------------------------------------------------------------------
# Pure-JAX reference (mirrors the bf16 rounding of the matmul inputs)
# ----------------------------------------------------------------------------
def ref_generator(x, layers):
    h = x
    for layer in layers:
        w_conv = jnp.transpose(layer["w"][:, :, ::-1, ::-1], (1, 0, 2, 3))
        pad = KSIZE - 1 - layer["pad"]
        h = lax.conv_general_dilated(
            h.astype(jnp.bfloat16), w_conv.astype(jnp.bfloat16),
            window_strides=(1, 1), padding=[(pad, pad), (pad, pad)],
            lhs_dilation=(layer["stride"], layer["stride"]),
            dimension_numbers=("NCHW", "OIHW", "NCHW"),
            preferred_element_type=jnp.float32)
        if layer["has_bn"]:
            mean = h.mean(axis=(0, 2, 3), keepdims=True)
            var = jnp.var(h, axis=(0, 2, 3), keepdims=True)
            hn = (h - mean) / jnp.sqrt(var + BN_EPS)
            hn = hn * layer["gamma"].reshape(1, -1, 1, 1) \
                 + layer["beta"].reshape(1, -1, 1, 1)
            h = jnp.where(hn >= 0, hn, LEAKY_SLOPE * hn)
        else:
            h = jnp.tanh(h)
    return h


# ----------------------------------------------------------------------------
if __name__ == "__main__":
    # Small but structurally faithful sizes: input (N, nz, 1, 1), output
    # (N, nc, 128, 128) after 6 ConvTranspose2d stages.
    N, nz, ngf, nc = 2, 8, 4, 3

    params = init_generator_params(jax.random.PRNGKey(0), nz, ngf, nc)
    x = jax.random.normal(jax.random.PRNGKey(1), (N, nz, 1, 1), jnp.float32)

    fwd = jax.jit(lambda inp: generator_forward(inp, params))
    out = jax.block_until_ready(fwd(x))

    assert out.shape == (N, nc, 128, 128), out.shape
    assert bool(jnp.all(jnp.isfinite(out)))

    ref = jax.block_until_ready(ref_generator(x, params))
    max_err = float(jnp.max(jnp.abs(out - ref)))
    assert max_err < 5e-2, f"max abs err vs reference: {max_err}"

    print("KERNEL_OK")
</pallas_src>

<mosaic_0001>
module attributes {stable_mosaic.version = 11 : i64} {
  func.func @_matmul_bn_kernel(%arg0: i32, %arg1: i32, %arg2: memref<1x40x128xbf16, #tpu.memory_space<vmem>>, %arg3: memref<1x128x32xbf16, #tpu.memory_space<vmem>>, %arg4: memref<1x40x32xf32, #tpu.memory_space<vmem>>, %arg5: memref<1x1x40x2xf32, #tpu.memory_space<vmem>>) attributes {dimension_semantics = [#tpu.dimension_semantics<parallel>, #tpu.dimension_semantics<parallel>], iteration_bounds = array<i64: 1, 1>, scalar_prefetch = 0 : i64, scratch_operands = 0 : i64, tpu.core_type = #tpu.core_type<tc>, window_params = [{transform_indices = @transform_0, window_bounds = array<i64: 1, 40, 128>}, {transform_indices = @transform_1, window_bounds = array<i64: 1, 128, 32>}, {transform_indices = @transform_2, window_bounds = array<i64: 1, 40, 32>}, {transform_indices = @transform_3, window_bounds = array<i64: 1, 1, 40, 2>}]} {
    %c0 = arith.constant 0 : index
    %c0_0 = arith.constant 0 : index
    %c0_1 = arith.constant 0 : index
    %0 = vector.load %arg2[%c0, %c0_0, %c0_1] : memref<1x40x128xbf16, #tpu.memory_space<vmem>>, vector<1x40x128xbf16>
    %1 = vector.shape_cast %0 : vector<1x40x128xbf16> to vector<40x128xbf16>
    %c0_2 = arith.constant 0 : index
    %c0_3 = arith.constant 0 : index
    %c0_4 = arith.constant 0 : index
    %2 = vector.load %arg3[%c0_2, %c0_3, %c0_4] : memref<1x128x32xbf16, #tpu.memory_space<vmem>>, vector<1x128x32xbf16>
    %3 = vector.shape_cast %2 : vector<1x128x32xbf16> to vector<128x32xbf16>
    %cst = arith.constant dense<0.000000e+00> : vector<40x32xf32>
    %4 = tpu.matmul %1, %3, %cst {dimension_numbers = #tpu.dot_dimension_numbers<[1], [0], [0], [1], [0, 0, 1, 1], [], []>} : vector<40x128xbf16>, vector<128x32xbf16>, vector<40x32xf32> -> vector<40x32xf32>
    %c0_5 = arith.constant 0 : index
    %c0_6 = arith.constant 0 : index
    %c0_7 = arith.constant 0 : index
    %5 = vector.load %arg4[%c0_5, %c0_6, %c0_7] : memref<1x40x32xf32, #tpu.memory_space<vmem>>, vector<1x40x32xf32>
    %6 = vector.shape_cast %5 : vector<1x40x32xf32> to vector<40x32xf32>
    %7 = vector.shape_cast %4 : vector<40x32xf32> to vector<1x40x32xf32>
    tpu.vector_store %arg4[%c0_5, %c0_6, %c0_7], %7 {strides = array<i32>} : memref<1x40x32xf32, #tpu.memory_space<vmem>>, vector<1x40x32xf32>,
    %cst_8 = arith.constant dense<0.000000e+00> : vector<40xf32>
    %8 = vector.multi_reduction <add>, %4, %cst_8 [1] : vector<40x32xf32> to vector<40xf32>
    %9 = vector.shape_cast %8 : vector<40xf32> to vector<40x1xf32>
    %10 = arith.mulf %4, %4 : vector<40x32xf32>
    %cst_9 = arith.constant dense<0.000000e+00> : vector<40xf32>
    %11 = vector.multi_reduction <add>, %10, %cst_9 [1] : vector<40x32xf32> to vector<40xf32>
    %12 = vector.shape_cast %11 : vector<40xf32> to vector<40x1xf32>
    %13 = tpu.concatenate %9, %12 in 1 : vector<40x1xf32>, vector<40x1xf32> -> vector<40x2xf32>
    %c0_10 = arith.constant 0 : index
    %c0_11 = arith.constant 0 : index
    %c0_12 = arith.constant 0 : index
    %c0_13 = arith.constant 0 : index
    %14 = vector.load %arg5[%c0_10, %c0_11, %c0_12, %c0_13] : memref<1x1x40x2xf32, #tpu.memory_space<vmem>>, vector<1x1x40x2xf32>
    %15 = vector.shape_cast %14 : vector<1x1x40x2xf32> to vector<40x2xf32>
    %16 = vector.shape_cast %13 : vector<40x2xf32> to vector<1x1x40x2xf32>
    tpu.vector_store %arg5[%c0_10, %c0_11, %c0_12, %c0_13], %16 {strides = array<i32>} : memref<1x1x40x2xf32, #tpu.memory_space<vmem>>, vector<1x1x40x2xf32>,
    return
  }
  func.func @transform_0(%arg0: i32, %arg1: i32) -> (i32, i32, i32) {
    %c0_i32 = arith.constant 0 : i32
    %c0_i32_0 = arith.constant 0 : i32
    %c0_i32_1 = arith.constant 0 : i32
    return %arg0, %c0_i32, %c0_i32_0 : i32, i32, i32
  }
  func.func @transform_1(%arg0: i32, %arg1: i32) -> (i32, i32, i32) {
    %c0_i32 = arith.constant 0 : i32
    %c0_i32_0 = arith.constant 0 : i32
    return %arg0, %c0_i32, %arg1 : i32, i32, i32
  }
  func.func @transform_2(%arg0: i32, %arg1: i32) -> (i32, i32, i32) {
    %c0_i32 = arith.constant 0 : i32
    %c0_i32_0 = arith.constant 0 : i32
    return %arg0, %c0_i32, %arg1 : i32, i32, i32
  }
  func.func @transform_3(%arg0: i32, %arg1: i32) -> (i32, i32, i32, i32) {
    %c0_i32 = arith.constant 0 : i32
    %c0_i32_0 = arith.constant 0 : i32
    %c0_i32_1 = arith.constant 0 : i32
    return %arg0, %arg1, %c0_i32, %c0_i32_0 : i32, i32, i32, i32
  }
}

module attributes {stable_mosaic.version = 11 : i64} {
  func.func @_bn_leaky_kernel(%arg0: i32, %arg1: i32, %arg2: memref<1x40x32xf32, #tpu.memory_space<vmem>>, %arg3: memref<40x1xf32, #tpu.memory_space<vmem>>, %arg4: memref<40x1xf32, #tpu.memory_space<vmem>>, %arg5: memref<1x40x32xbf16, #tpu.memory_space<vmem>>) attributes {dimension_semantics = [#tpu.dimension_semantics<parallel>, #tpu.dimension_semantics<parallel>], iteration_bounds = array<i64: 1, 1>, scalar_prefetch = 0 : i64, scratch_operands = 0 : i64, tpu.core_type = #tpu.core_type<tc>, window_params = [{transform_indices = @transform_0, window_bounds = array<i64: 1, 40, 32>}, {pipeline_mode = #tpu.pipeline_mode<synchronous>, transform_indices = @transform_1, window_bounds = array<i64: 40, 1>}, {pipeline_mode = #tpu.pipeline_mode<synchronous>, transform_indices = @transform_2, window_bounds = array<i64: 40, 1>}, {transform_indices = @transform_3, window_bounds = array<i64: 1, 40, 32>}]} {
    %c0 = arith.constant 0 : index
    %c0_0 = arith.constant 0 : index
    %c0_1 = arith.constant 0 : index
    %0 = vector.load %arg2[%c0, %c0_0, %c0_1] : memref<1x40x32xf32, #tpu.memory_space<vmem>>, vector<1x40x32xf32>
    %1 = vector.shape_cast %0 : vector<1x40x32xf32> to vector<40x32xf32>
    %c0_2 = arith.constant 0 : index
    %c0_3 = arith.constant 0 : index
    %2 = vector.load %arg3[%c0_2, %c0_3] : memref<40x1xf32, #tpu.memory_space<vmem>>, vector<40x1xf32>
    %3 = vector.broadcast %2 : vector<40x1xf32> to vector<40x32xf32>
    %4 = arith.mulf %1, %3 : vector<40x32xf32>
    %c0_4 = arith.constant 0 : index
    %c0_5 = arith.constant 0 : index
    %5 = vector.load %arg4[%c0_4, %c0_5] : memref<40x1xf32, #tpu.memory_space<vmem>>, vector<40x1xf32>
    %6 = vector.broadcast %5 : vector<40x1xf32> to vector<40x32xf32>
    %7 = arith.addf %4, %6 : vector<40x32xf32>
    %cst = arith.constant 0.000000e+00 : f32
    %8 = vector.broadcast %cst : f32 to vector<40x32xf32>
    %9 = arith.cmpf oge, %7, %8 : vector<40x32xf32>
    %cst_6 = arith.constant 2.000000e-01 : f32
    %10 = vector.broadcast %cst_6 : f32 to vector<40x32xf32>
    %11 = arith.mulf %10, %7 : vector<40x32xf32>
    %12 = arith.select %9, %7, %11 : vector<40x32xi1>, vector<40x32xf32>
    %13 = arith.truncf %12 : vector<40x32xf32> to vector<40x32xbf16>
    %c0_7 = arith.constant 0 : index
    %c0_8 = arith.constant 0 : index
    %c0_9 = arith.constant 0 : index
    %14 = vector.load %arg5[%c0_7, %c0_8, %c0_9] : memref<1x40x32xbf16, #tpu.memory_space<vmem>>, vector<1x40x32xbf16>
    %15 = vector.shape_cast %14 : vector<1x40x32xbf16> to vector<40x32xbf16>
    %16 = vector.shape_cast %13 : vector<40x32xbf16> to vector<1x40x32xbf16>
    tpu.vector_store %arg5[%c0_7, %c0_8, %c0_9], %16 {strides = array<i32>} : memref<1x40x32xbf16, #tpu.memory_space<vmem>>, vector<1x40x32xbf16>,
    return
  }
  func.func @transform_0(%arg0: i32, %arg1: i32) -> (i32, i32, i32) {
    %c0_i32 = arith.constant 0 : i32
    %c0_i32_0 = arith.constant 0 : i32
    return %arg0, %c0_i32, %arg1 : i32, i32, i32
  }
  func.func @transform_1(%arg0: i32, %arg1: i32) -> (i32, i32) {
    %c0_i32 = arith.constant 0 : i32
    %c0_i32_0 = arith.constant 0 : i32
    %c0_i32_1 = arith.constant 0 : i32
    return %c0_i32, %c0_i32_0 : i32, i32
  }
  func.func @transform_2(%arg0: i32, %arg1: i32) -> (i32, i32) {
    %c0_i32 = arith.constant 0 : i32
    %c0_i32_0 = arith.constant 0 : i32
    %c0_i32_1 = arith.constant 0 : i32
    return %c0_i32, %c0_i32_0 : i32, i32
  }
  func.func @transform_3(%arg0: i32, %arg1: i32) -> (i32, i32, i32) {
    %c0_i32 = arith.constant 0 : i32
    %c0_i32_0 = arith.constant 0 : i32
    return %arg0, %c0_i32, %arg1 : i32, i32, i32
  }
}

module attributes {stable_mosaic.version = 11 : i64} {
  func.func @_matmul_bn_kernel(%arg0: i32, %arg1: i32, %arg2: memref<1x32x160xbf16, #tpu.memory_space<vmem>>, %arg3: memref<1x160x32xbf16, #tpu.memory_space<vmem>>, %arg4: memref<1x32x32xf32, #tpu.memory_space<vmem>>, %arg5: memref<1x1x32x2xf32, #tpu.memory_space<vmem>>) attributes {dimension_semantics = [#tpu.dimension_semantics<parallel>, #tpu.dimension_semantics<parallel>], iteration_bounds = array<i64: 4, 1>, scalar_prefetch = 0 : i64, scratch_operands = 0 : i64, tpu.core_type = #tpu.core_type<tc>, window_params = [{transform_indices = @transform_0, window_bounds = array<i64: 1, 32, 160>}, {transform_indices = @transform_1, window_bounds = array<i64: 1, 160, 32>}, {transform_indices = @transform_2, window_bounds = array<i64: 1, 32, 32>}, {transform_indices = @transform_3, window_bounds = array<i64: 1, 1, 32, 2>}]} {
    %c0 = arith.constant 0 : index
    %c0_0 = arith.constant 0 : index
    %c0_1 = arith.constant 0 : index
    %0 = vector.load %arg2[%c0, %c0_0, %c0_1] : memref<1x32x160xbf16, #tpu.memory_space<vmem>>, vector<1x32x160xbf16>
    %1 = vector.shape_cast %0 : vector<1x32x160xbf16> to vector<32x160xbf16>
    %c0_2 = arith.constant 0 : index
    %c0_3 = arith.constant 0 : index
    %c0_4 = arith.constant 0 : index
    %2 = vector.load %arg3[%c0_2, %c0_3, %c0_4] : memref<1x160x32xbf16, #tpu.memory_space<vmem>>, vector<1x160x32xbf16>
    %3 = vector.shape_cast %2 : vector<1x160x32xbf16> to vector<160x32xbf16>
    %cst = arith.constant dense<0.000000e+00> : vector<32x32xf32>
    %4 = tpu.matmul %1, %3, %cst {dimension_numbers = #tpu.dot_dimension_numbers<[1], [0], [0], [1], [0, 0, 1, 1], [], []>} : vector<32x160xbf16>, vector<160x32xbf16>, vector<32x32xf32> -> vector<32x32xf32>
    %c0_5 = arith.constant 0 : index
    %c0_6 = arith.constant 0 : index
    %c0_7 = arith.constant 0 : index
    %5 = vector.load %arg4[%c0_5, %c0_6, %c0_7] : memref<1x32x32xf32, #tpu.memory_space<vmem>>, vector<1x32x32xf32>
    %6 = vector.shape_cast %5 : vector<1x32x32xf32> to vector<32x32xf32>
    %7 = vector.shape_cast %4 : vector<32x32xf32> to vector<1x32x32xf32>
    tpu.vector_store %arg4[%c0_5, %c0_6, %c0_7], %7 {strides = array<i32>} : memref<1x32x32xf32, #tpu.memory_space<vmem>>, vector<1x32x32xf32>,
    %cst_8 = arith.constant dense<0.000000e+00> : vector<32xf32>
    %8 = vector.multi_reduction <add>, %4, %cst_8 [1] : vector<32x32xf32> to vector<32xf32>
    %9 = vector.shape_cast %8 : vector<32xf32> to vector<32x1xf32>
    %10 = arith.mulf %4, %4 : vector<32x32xf32>
    %cst_9 = arith.constant dense<0.000000e+00> : vector<32xf32>
    %11 = vector.multi_reduction <add>, %10, %cst_9 [1] : vector<32x32xf32> to vector<32xf32>
    %12 = vector.shape_cast %11 : vector<32xf32> to vector<32x1xf32>
    %13 = tpu.concatenate %9, %12 in 1 : vector<32x1xf32>, vector<32x1xf32> -> vector<32x2xf32>
    %c0_10 = arith.constant 0 : index
    %c0_11 = arith.constant 0 : index
    %c0_12 = arith.constant 0 : index
    %c0_13 = arith.constant 0 : index
    %14 = vector.load %arg5[%c0_10, %c0_11, %c0_12, %c0_13] : memref<1x1x32x2xf32, #tpu.memory_space<vmem>>, vector<1x1x32x2xf32>
    %15 = vector.shape_cast %14 : vector<1x1x32x2xf32> to vector<32x2xf32>
    %16 = vector.shape_cast %13 : vector<32x2xf32> to vector<1x1x32x2xf32>
    tpu.vector_store %arg5[%c0_10, %c0_11, %c0_12, %c0_13], %16 {strides = array<i32>} : memref<1x1x32x2xf32, #tpu.memory_space<vmem>>, vector<1x1x32x2xf32>,
    return
  }
  func.func @transform_0(%arg0: i32, %arg1: i32) -> (i32, i32, i32) {
    %c0_i32 = arith.constant 0 : i32
    %c0_i32_0 = arith.constant 0 : i32
    %c0_i32_1 = arith.constant 0 : i32
    return %arg0, %c0_i32, %c0_i32_0 : i32, i32, i32
  }
  func.func @transform_1(%arg0: i32, %arg1: i32) -> (i32, i32, i32) {
    %c0_i32 = arith.constant 0 : i32
    %c0_i32_0 = arith.constant 0 : i32
    return %arg0, %c0_i32, %arg1 : i32, i32, i32
  }
  func.func @transform_2(%arg0: i32, %arg1: i32) -> (i32, i32, i32) {
    %c0_i32 = arith.constant 0 : i32
    %c0_i32_0 = arith.constant 0 : i32
    return %arg0, %c0_i32, %arg1 : i32, i32, i32
  }
  func.func @transform_3(%arg0: i32, %arg1: i32) -> (i32, i32, i32, i32) {
    %c0_i32 = arith.constant 0 : i32
    %c0_i32_0 = arith.constant 0 : i32
    %c0_i32_1 = arith.constant 0 : i32
    return %arg0, %arg1, %c0_i32, %c0_i32_0 : i32, i32, i32, i32
  }
}

module attributes {stable_mosaic.version = 11 : i64} {
  func.func @_bn_leaky_kernel(%arg0: i32, %arg1: i32, %arg2: memref<1x32x32xf32, #tpu.memory_space<vmem>>, %arg3: memref<32x1xf32, #tpu.memory_space<vmem>>, %arg4: memref<32x1xf32, #tpu.memory_space<vmem>>, %arg5: memref<1x32x32xbf16, #tpu.memory_space<vmem>>) attributes {dimension_semantics = [#tpu.dimension_semantics<parallel>, #tpu.dimension_semantics<parallel>], iteration_bounds = array<i64: 4, 1>, scalar_prefetch = 0 : i64, scratch_operands = 0 : i64, tpu.core_type = #tpu.core_type<tc>, window_params = [{transform_indices = @transform_0, window_bounds = array<i64: 1, 32, 32>}, {pipeline_mode = #tpu.pipeline_mode<synchronous>, transform_indices = @transform_1, window_bounds = array<i64: 32, 1>}, {pipeline_mode = #tpu.pipeline_mode<synchronous>, transform_indices = @transform_2, window_bounds = array<i64: 32, 1>}, {transform_indices = @transform_3, window_bounds = array<i64: 1, 32, 32>}]} {
    %c0 = arith.constant 0 : index
    %c0_0 = arith.constant 0 : index
    %c0_1 = arith.constant 0 : index
    %0 = vector.load %arg2[%c0, %c0_0, %c0_1] : memref<1x32x32xf32, #tpu.memory_space<vmem>>, vector<1x32x32xf32>
    %1 = vector.shape_cast %0 : vector<1x32x32xf32> to vector<32x32xf32>
    %c0_2 = arith.constant 0 : index
    %c0_3 = arith.constant 0 : index
    %2 = vector.load %arg3[%c0_2, %c0_3] : memref<32x1xf32, #tpu.memory_space<vmem>>, vector<32x1xf32>
    %3 = vector.broadcast %2 : vector<32x1xf32> to vector<32x32xf32>
    %4 = arith.mulf %1, %3 : vector<32x32xf32>
    %c0_4 = arith.constant 0 : index
    %c0_5 = arith.constant 0 : index
    %5 = vector.load %arg4[%c0_4, %c0_5] : memref<32x1xf32, #tpu.memory_space<vmem>>, vector<32x1xf32>
    %6 = vector.broadcast %5 : vector<32x1xf32> to vector<32x32xf32>
    %7 = arith.addf %4, %6 : vector<32x32xf32>
    %cst = arith.constant 0.000000e+00 : f32
    %8 = vector.broadcast %cst : f32 to vector<32x32xf32>
    %9 = arith.cmpf oge, %7, %8 : vector<32x32xf32>
    %cst_6 = arith.constant 2.000000e-01 : f32
    %10 = vector.broadcast %cst_6 : f32 to vector<32x32xf32>
    %11 = arith.mulf %10, %7 : vector<32x32xf32>
    %12 = arith.select %9, %7, %11 : vector<32x32xi1>, vector<32x32xf32>
    %13 = arith.truncf %12 : vector<32x32xf32> to vector<32x32xbf16>
    %c0_7 = arith.constant 0 : index
    %c0_8 = arith.constant 0 : index
    %c0_9 = arith.constant 0 : index
    %14 = vector.load %arg5[%c0_7, %c0_8, %c0_9] : memref<1x32x32xbf16, #tpu.memory_space<vmem>>, vector<1x32x32xbf16>
    %15 = vector.shape_cast %14 : vector<1x32x32xbf16> to vector<32x32xbf16>
    %16 = vector.shape_cast %13 : vector<32x32xbf16> to vector<1x32x32xbf16>
    tpu.vector_store %arg5[%c0_7, %c0_8, %c0_9], %16 {strides = array<i32>} : memref<1x32x32xbf16, #tpu.memory_space<vmem>>, vector<1x32x32xbf16>,
    return
  }
  func.func @transform_0(%arg0: i32, %arg1: i32) -> (i32, i32, i32) {
    %c0_i32 = arith.constant 0 : i32
    %c0_i32_0 = arith.constant 0 : i32
    return %arg0, %c0_i32, %arg1 : i32, i32, i32
  }
  func.func @transform_1(%arg0: i32, %arg1: i32) -> (i32, i32) {
    %c0_i32 = arith.constant 0 : i32
    %c0_i32_0 = arith.constant 0 : i32
    %c0_i32_1 = arith.constant 0 : i32
    return %c0_i32, %c0_i32_0 : i32, i32
  }
  func.func @transform_2(%arg0: i32, %arg1: i32) -> (i32, i32) {
    %c0_i32 = arith.constant 0 : i32
    %c0_i32_0 = arith.constant 0 : i32
    %c0_i32_1 = arith.constant 0 : i32
    return %c0_i32, %c0_i32_0 : i32, i32
  }
  func.func @transform_3(%arg0: i32, %arg1: i32) -> (i32, i32, i32) {
    %c0_i32 = arith.constant 0 : i32
    %c0_i32_0 = arith.constant 0 : i32
    return %arg0, %c0_i32, %arg1 : i32, i32, i32
  }
}

module attributes {stable_mosaic.version = 11 : i64} {
  func.func @_matmul_bn_kernel(%arg0: i32, %arg1: i32, %arg2: memref<1x16x128xbf16, #tpu.memory_space<vmem>>, %arg3: memref<1x128x128xbf16, #tpu.memory_space<vmem>>, %arg4: memref<1x16x128xf32, #tpu.memory_space<vmem>>, %arg5: memref<1x1x16x2xf32, #tpu.memory_space<vmem>>) attributes {dimension_semantics = [#tpu.dimension_semantics<parallel>, #tpu.dimension_semantics<parallel>], iteration_bounds = array<i64: 4, 1>, scalar_prefetch = 0 : i64, scratch_operands = 0 : i64, tpu.core_type = #tpu.core_type<tc>, window_params = [{transform_indices = @transform_0, window_bounds = array<i64: 1, 16, 128>}, {transform_indices = @transform_1, window_bounds = array<i64: 1, 128, 128>}, {transform_indices = @transform_2, window_bounds = array<i64: 1, 16, 128>}, {transform_indices = @transform_3, window_bounds = array<i64: 1, 1, 16, 2>}]} {
    %c0 = arith.constant 0 : index
    %c0_0 = arith.constant 0 : index
    %c0_1 = arith.constant 0 : index
    %0 = vector.load %arg2[%c0, %c0_0, %c0_1] : memref<1x16x128xbf16, #tpu.memory_space<vmem>>, vector<1x16x128xbf16>
    %1 = vector.shape_cast %0 : vector<1x16x128xbf16> to vector<16x128xbf16>
    %c0_2 = arith.constant 0 : index
    %c0_3 = arith.constant 0 : index
    %c0_4 = arith.constant 0 : index
    %2 = vector.load %arg3[%c0_2, %c0_3, %c0_4] : memref<1x128x128xbf16, #tpu.memory_space<vmem>>, vector<1x128x128xbf16>
    %3 = vector.shape_cast %2 : vector<1x128x128xbf16> to vector<128x128xbf16>
    %cst = arith.constant dense<0.000000e+00> : vector<16x128xf32>
    %4 = tpu.matmul %1, %3, %cst {dimension_numbers = #tpu.dot_dimension_numbers<[1], [0], [0], [1], [0, 0, 1, 1], [], []>} : vector<16x128xbf16>, vector<128x128xbf16>, vector<16x128xf32> -> vector<16x128xf32>
    %c0_5 = arith.constant 0 : index
    %c0_6 = arith.constant 0 : index
    %c0_7 = arith.constant 0 : index
    %5 = vector.load %arg4[%c0_5, %c0_6, %c0_7] : memref<1x16x128xf32, #tpu.memory_space<vmem>>, vector<1x16x128xf32>
    %6 = vector.shape_cast %5 : vector<1x16x128xf32> to vector<16x128xf32>
    %7 = vector.shape_cast %4 : vector<16x128xf32> to vector<1x16x128xf32>
    tpu.vector_store %arg4[%c0_5, %c0_6, %c0_7], %7 {strides = array<i32>} : memref<1x16x128xf32, #tpu.memory_space<vmem>>, vector<1x16x128xf32>,
    %cst_8 = arith.constant dense<0.000000e+00> : vector<16xf32>
    %8 = vector.multi_reduction <add>, %4, %cst_8 [1] : vector<16x128xf32> to vector<16xf32>
    %9 = vector.shape_cast %8 : vector<16xf32> to vector<16x1xf32>
    %10 = arith.mulf %4, %4 : vector<16x128xf32>
    %cst_9 = arith.constant dense<0.000000e+00> : vector<16xf32>
    %11 = vector.multi_reduction <add>, %10, %cst_9 [1] : vector<16x128xf32> to vector<16xf32>
    %12 = vector.shape_cast %11 : vector<16xf32> to vector<16x1xf32>
    %13 = tpu.concatenate %9, %12 in 1 : vector<16x1xf32>, vector<16x1xf32> -> vector<16x2xf32>
    %c0_10 = arith.constant 0 : index
    %c0_11 = arith.constant 0 : index
    %c0_12 = arith.constant 0 : index
    %c0_13 = arith.constant 0 : index
    %14 = vector.load %arg5[%c0_10, %c0_11, %c0_12, %c0_13] : memref<1x1x16x2xf32, #tpu.memory_space<vmem>>, vector<1x1x16x2xf32>
    %15 = vector.shape_cast %14 : vector<1x1x16x2xf32> to vector<16x2xf32>
    %16 = vector.shape_cast %13 : vector<16x2xf32> to vector<1x1x16x2xf32>
    tpu.vector_store %arg5[%c0_10, %c0_11, %c0_12, %c0_13], %16 {strides = array<i32>} : memref<1x1x16x2xf32, #tpu.memory_space<vmem>>, vector<1x1x16x2xf32>,
    return
  }
  func.func @transform_0(%arg0: i32, %arg1: i32) -> (i32, i32, i32) {
    %c0_i32 = arith.constant 0 : i32
    %c0_i32_0 = arith.constant 0 : i32
    %c0_i32_1 = arith.constant 0 : i32
    return %arg0, %c0_i32, %c0_i32_0 : i32, i32, i32
  }
  func.func @transform_1(%arg0: i32, %arg1: i32) -> (i32, i32, i32) {
    %c0_i32 = arith.constant 0 : i32
    %c0_i32_0 = arith.constant 0 : i32
    return %arg0, %c0_i32, %arg1 : i32, i32, i32
  }
  func.func @transform_2(%arg0: i32, %arg1: i32) -> (i32, i32, i32) {
    %c0_i32 = arith.constant 0 : i32
    %c0_i32_0 = arith.constant 0 : i32
    return %arg0, %c0_i32, %arg1 : i32, i32, i32
  }
  func.func @transform_3(%arg0: i32, %arg1: i32) -> (i32, i32, i32, i32) {
    %c0_i32 = arith.constant 0 : i32
    %c0_i32_0 = arith.constant 0 : i32
    %c0_i32_1 = arith.constant 0 : i32
    return %arg0, %arg1, %c0_i32, %c0_i32_0 : i32, i32, i32, i32
  }
}

module attributes {stable_mosaic.version = 11 : i64} {
  func.func @_bn_leaky_kernel(%arg0: i32, %arg1: i32, %arg2: memref<1x16x128xf32, #tpu.memory_space<vmem>>, %arg3: memref<16x1xf32, #tpu.memory_space<vmem>>, %arg4: memref<16x1xf32, #tpu.memory_space<vmem>>, %arg5: memref<1x16x128xbf16, #tpu.memory_space<vmem>>) attributes {dimension_semantics = [#tpu.dimension_semantics<parallel>, #tpu.dimension_semantics<parallel>], iteration_bounds = array<i64: 4, 1>, scalar_prefetch = 0 : i64, scratch_operands = 0 : i64, tpu.core_type = #tpu.core_type<tc>, window_params = [{transform_indices = @transform_0, window_bounds = array<i64: 1, 16, 128>}, {pipeline_mode = #tpu.pipeline_mode<synchronous>, transform_indices = @transform_1, window_bounds = array<i64: 16, 1>}, {pipeline_mode = #tpu.pipeline_mode<synchronous>, transform_indices = @transform_2, window_bounds = array<i64: 16, 1>}, {transform_indices = @transform_3, window_bounds = array<i64: 1, 16, 128>}]} {
    %c0 = arith.constant 0 : index
    %c0_0 = arith.constant 0 : index
    %c0_1 = arith.constant 0 : index
    %0 = vector.load %arg2[%c0, %c0_0, %c0_1] : memref<1x16x128xf32, #tpu.memory_space<vmem>>, vector<1x16x128xf32>
    %1 = vector.shape_cast %0 : vector<1x16x128xf32> to vector<16x128xf32>
    %c0_2 = arith.constant 0 : index
    %c0_3 = arith.constant 0 : index
    %2 = vector.load %arg3[%c0_2, %c0_3] : memref<16x1xf32, #tpu.memory_space<vmem>>, vector<16x1xf32>
    %3 = vector.broadcast %2 : vector<16x1xf32> to vector<16x128xf32>
    %4 = arith.mulf %1, %3 : vector<16x128xf32>
    %c0_4 = arith.constant 0 : index
    %c0_5 = arith.constant 0 : index
    %5 = vector.load %arg4[%c0_4, %c0_5] : memref<16x1xf32, #tpu.memory_space<vmem>>, vector<16x1xf32>
    %6 = vector.broadcast %5 : vector<16x1xf32> to vector<16x128xf32>
    %7 = arith.addf %4, %6 : vector<16x128xf32>
    %cst = arith.constant 0.000000e+00 : f32
    %8 = vector.broadcast %cst : f32 to vector<16x128xf32>
    %9 = arith.cmpf oge, %7, %8 : vector<16x128xf32>
    %cst_6 = arith.constant 2.000000e-01 : f32
    %10 = vector.broadcast %cst_6 : f32 to vector<16x128xf32>
    %11 = arith.mulf %10, %7 : vector<16x128xf32>
    %12 = arith.select %9, %7, %11 : vector<16x128xi1>, vector<16x128xf32>
    %13 = arith.truncf %12 : vector<16x128xf32> to vector<16x128xbf16>
    %c0_7 = arith.constant 0 : index
    %c0_8 = arith.constant 0 : index
    %c0_9 = arith.constant 0 : index
    %14 = vector.load %arg5[%c0_7, %c0_8, %c0_9] : memref<1x16x128xbf16, #tpu.memory_space<vmem>>, vector<1x16x128xbf16>
    %15 = vector.shape_cast %14 : vector<1x16x128xbf16> to vector<16x128xbf16>
    %16 = vector.shape_cast %13 : vector<16x128xbf16> to vector<1x16x128xbf16>
    tpu.vector_store %arg5[%c0_7, %c0_8, %c0_9], %16 {strides = array<i32>} : memref<1x16x128xbf16, #tpu.memory_space<vmem>>, vector<1x16x128xbf16>,
    return
  }
  func.func @transform_0(%arg0: i32, %arg1: i32) -> (i32, i32, i32) {
    %c0_i32 = arith.constant 0 : i32
    %c0_i32_0 = arith.constant 0 : i32
    return %arg0, %c0_i32, %arg1 : i32, i32, i32
  }
  func.func @transform_1(%arg0: i32, %arg1: i32) -> (i32, i32) {
    %c0_i32 = arith.constant 0 : i32
    %c0_i32_0 = arith.constant 0 : i32
    %c0_i32_1 = arith.constant 0 : i32
    return %c0_i32, %c0_i32_0 : i32, i32
  }
  func.func @transform_2(%arg0: i32, %arg1: i32) -> (i32, i32) {
    %c0_i32 = arith.constant 0 : i32
    %c0_i32_0 = arith.constant 0 : i32
    %c0_i32_1 = arith.constant 0 : i32
    return %c0_i32, %c0_i32_0 : i32, i32
  }
  func.func @transform_3(%arg0: i32, %arg1: i32) -> (i32, i32, i32) {
    %c0_i32 = arith.constant 0 : i32
    %c0_i32_0 = arith.constant 0 : i32
    return %arg0, %c0_i32, %arg1 : i32, i32, i32
  }
}

module attributes {stable_mosaic.version = 11 : i64} {
  func.func @_matmul_bn_kernel(%arg0: i32, %arg1: i32, %arg2: memref<1x8x64xbf16, #tpu.memory_space<vmem>>, %arg3: memref<1x64x512xbf16, #tpu.memory_space<vmem>>, %arg4: memref<1x8x512xf32, #tpu.memory_space<vmem>>, %arg5: memref<1x1x8x2xf32, #tpu.memory_space<vmem>>) attributes {dimension_semantics = [#tpu.dimension_semantics<parallel>, #tpu.dimension_semantics<parallel>], iteration_bounds = array<i64: 4, 1>, scalar_prefetch = 0 : i64, scratch_operands = 0 : i64, tpu.core_type = #tpu.core_type<tc>, window_params = [{transform_indices = @transform_0, window_bounds = array<i64: 1, 8, 64>}, {transform_indices = @transform_1, window_bounds = array<i64: 1, 64, 512>}, {transform_indices = @transform_2, window_bounds = array<i64: 1, 8, 512>}, {transform_indices = @transform_3, window_bounds = array<i64: 1, 1, 8, 2>}]} {
    %c0 = arith.constant 0 : index
    %c0_0 = arith.constant 0 : index
    %c0_1 = arith.constant 0 : index
    %0 = vector.load %arg2[%c0, %c0_0, %c0_1] : memref<1x8x64xbf16, #tpu.memory_space<vmem>>, vector<1x8x64xbf16>
    %1 = vector.shape_cast %0 : vector<1x8x64xbf16> to vector<8x64xbf16>
    %c0_2 = arith.constant 0 : index
    %c0_3 = arith.constant 0 : index
    %c0_4 = arith.constant 0 : index
    %2 = vector.load %arg3[%c0_2, %c0_3, %c0_4] : memref<1x64x512xbf16, #tpu.memory_space<vmem>>, vector<1x64x512xbf16>
    %3 = vector.shape_cast %2 : vector<1x64x512xbf16> to vector<64x512xbf16>
    %cst = arith.constant dense<0.000000e+00> : vector<8x512xf32>
    %4 = tpu.matmul %1, %3, %cst {dimension_numbers = #tpu.dot_dimension_numbers<[1], [0], [0], [1], [0, 0, 1, 1], [], []>} : vector<8x64xbf16>, vector<64x512xbf16>, vector<8x512xf32> -> vector<8x512xf32>
    %c0_5 = arith.constant 0 : index
    %c0_6 = arith.constant 0 : index
    %c0_7 = arith.constant 0 : index
    %5 = vector.load %arg4[%c0_5, %c0_6, %c0_7] : memref<1x8x512xf32, #tpu.memory_space<vmem>>, vector<1x8x512xf32>
    %6 = vector.shape_cast %5 : vector<1x8x512xf32> to vector<8x512xf32>
    %7 = vector.shape_cast %4 : vector<8x512xf32> to vector<1x8x512xf32>
    tpu.vector_store %arg4[%c0_5, %c0_6, %c0_7], %7 {strides = array<i32>} : memref<1x8x512xf32, #tpu.memory_space<vmem>>, vector<1x8x512xf32>,
    %cst_8 = arith.constant dense<0.000000e+00> : vector<8xf32>
    %8 = vector.multi_reduction <add>, %4, %cst_8 [1] : vector<8x512xf32> to vector<8xf32>
    %9 = vector.shape_cast %8 : vector<8xf32> to vector<8x1xf32>
    %10 = arith.mulf %4, %4 : vector<8x512xf32>
    %cst_9 = arith.constant dense<0.000000e+00> : vector<8xf32>
    %11 = vector.multi_reduction <add>, %10, %cst_9 [1] : vector<8x512xf32> to vector<8xf32>
    %12 = vector.shape_cast %11 : vector<8xf32> to vector<8x1xf32>
    %13 = tpu.concatenate %9, %12 in 1 : vector<8x1xf32>, vector<8x1xf32> -> vector<8x2xf32>
    %c0_10 = arith.constant 0 : index
    %c0_11 = arith.constant 0 : index
    %c0_12 = arith.constant 0 : index
    %c0_13 = arith.constant 0 : index
    %14 = vector.load %arg5[%c0_10, %c0_11, %c0_12, %c0_13] : memref<1x1x8x2xf32, #tpu.memory_space<vmem>>, vector<1x1x8x2xf32>
    %15 = vector.shape_cast %14 : vector<1x1x8x2xf32> to vector<8x2xf32>
    %16 = vector.shape_cast %13 : vector<8x2xf32> to vector<1x1x8x2xf32>
    tpu.vector_store %arg5[%c0_10, %c0_11, %c0_12, %c0_13], %16 {strides = array<i32>} : memref<1x1x8x2xf32, #tpu.memory_space<vmem>>, vector<1x1x8x2xf32>,
    return
  }
  func.func @transform_0(%arg0: i32, %arg1: i32) -> (i32, i32, i32) {
    %c0_i32 = arith.constant 0 : i32
    %c0_i32_0 = arith.constant 0 : i32
    %c0_i32_1 = arith.constant 0 : i32
    return %arg0, %c0_i32, %c0_i32_0 : i32, i32, i32
  }
  func.func @transform_1(%arg0: i32, %arg1: i32) -> (i32, i32, i32) {
    %c0_i32 = arith.constant 0 : i32
    %c0_i32_0 = arith.constant 0 : i32
    return %arg0, %c0_i32, %arg1 : i32, i32, i32
  }
  func.func @transform_2(%arg0: i32, %arg1: i32) -> (i32, i32, i32) {
    %c0_i32 = arith.constant 0 : i32
    %c0_i32_0 = arith.constant 0 : i32
    return %arg0, %c0_i32, %arg1 : i32, i32, i32
  }
  func.func @transform_3(%arg0: i32, %arg1: i32) -> (i32, i32, i32, i32) {
    %c0_i32 = arith.constant 0 : i32
    %c0_i32_0 = arith.constant 0 : i32
    %c0_i32_1 = arith.constant 0 : i32
    return %arg0, %arg1, %c0_i32, %c0_i32_0 : i32, i32, i32, i32
  }
}

module attributes {stable_mosaic.version = 11 : i64} {
  func.func @_bn_leaky_kernel(%arg0: i32, %arg1: i32, %arg2: memref<1x8x512xf32, #tpu.memory_space<vmem>>, %arg3: memref<8x1xf32, #tpu.memory_space<vmem>>, %arg4: memref<8x1xf32, #tpu.memory_space<vmem>>, %arg5: memref<1x8x512xbf16, #tpu.memory_space<vmem>>) attributes {dimension_semantics = [#tpu.dimension_semantics<parallel>, #tpu.dimension_semantics<parallel>], iteration_bounds = array<i64: 4, 1>, scalar_prefetch = 0 : i64, scratch_operands = 0 : i64, tpu.core_type = #tpu.core_type<tc>, window_params = [{transform_indices = @transform_0, window_bounds = array<i64: 1, 8, 512>}, {pipeline_mode = #tpu.pipeline_mode<synchronous>, transform_indices = @transform_1, window_bounds = array<i64: 8, 1>}, {pipeline_mode = #tpu.pipeline_mode<synchronous>, transform_indices = @transform_2, window_bounds = array<i64: 8, 1>}, {transform_indices = @transform_3, window_bounds = array<i64: 1, 8, 512>}]} {
    %c0 = arith.constant 0 : index
    %c0_0 = arith.constant 0 : index
    %c0_1 = arith.constant 0 : index
    %0 = vector.load %arg2[%c0, %c0_0, %c0_1] : memref<1x8x512xf32, #tpu.memory_space<vmem>>, vector<1x8x512xf32>
    %1 = vector.shape_cast %0 : vector<1x8x512xf32> to vector<8x512xf32>
    %c0_2 = arith.constant 0 : index
    %c0_3 = arith.constant 0 : index
    %2 = vector.load %arg3[%c0_2, %c0_3] : memref<8x1xf32, #tpu.memory_space<vmem>>, vector<8x1xf32>
    %3 = vector.broadcast %2 : vector<8x1xf32> to vector<8x512xf32>
    %4 = arith.mulf %1, %3 : vector<8x512xf32>
    %c0_4 = arith.constant 0 : index
    %c0_5 = arith.constant 0 : index
    %5 = vector.load %arg4[%c0_4, %c0_5] : memref<8x1xf32, #tpu.memory_space<vmem>>, vector<8x1xf32>
    %6 = vector.broadcast %5 : vector<8x1xf32> to vector<8x512xf32>
    %7 = arith.addf %4, %6 : vector<8x512xf32>
    %cst = arith.constant 0.000000e+00 : f32
    %8 = vector.broadcast %cst : f32 to vector<8x512xf32>
    %9 = arith.cmpf oge, %7, %8 : vector<8x512xf32>
    %cst_6 = arith.constant 2.000000e-01 : f32
    %10 = vector.broadcast %cst_6 : f32 to vector<8x512xf32>
    %11 = arith.mulf %10, %7 : vector<8x512xf32>
    %12 = arith.select %9, %7, %11 : vector<8x512xi1>, vector<8x512xf32>
    %13 = arith.truncf %12 : vector<8x512xf32> to vector<8x512xbf16>
    %c0_7 = arith.constant 0 : index
    %c0_8 = arith.constant 0 : index
    %c0_9 = arith.constant 0 : index
    %14 = vector.load %arg5[%c0_7, %c0_8, %c0_9] : memref<1x8x512xbf16, #tpu.memory_space<vmem>>, vector<1x8x512xbf16>
    %15 = vector.shape_cast %14 : vector<1x8x512xbf16> to vector<8x512xbf16>
    %16 = vector.shape_cast %13 : vector<8x512xbf16> to vector<1x8x512xbf16>
    tpu.vector_store %arg5[%c0_7, %c0_8, %c0_9], %16 {strides = array<i32>} : memref<1x8x512xbf16, #tpu.memory_space<vmem>>, vector<1x8x512xbf16>,
    return
  }
  func.func @transform_0(%arg0: i32, %arg1: i32) -> (i32, i32, i32) {
    %c0_i32 = arith.constant 0 : i32
    %c0_i32_0 = arith.constant 0 : i32
    return %arg0, %c0_i32, %arg1 : i32, i32, i32
  }
  func.func @transform_1(%arg0: i32, %arg1: i32) -> (i32, i32) {
    %c0_i32 = arith.constant 0 : i32
    %c0_i32_0 = arith.constant 0 : i32
    %c0_i32_1 = arith.constant 0 : i32
    return %c0_i32, %c0_i32_0 : i32, i32
  }
  func.func @transform_2(%arg0: i32, %arg1: i32) -> (i32, i32) {
    %c0_i32 = arith.constant 0 : i32
    %c0_i32_0 = arith.constant 0 : i32
    %c0_i32_1 = arith.constant 0 : i32
    return %c0_i32, %c0_i32_0 : i32, i32
  }
  func.func @transform_3(%arg0: i32, %arg1: i32) -> (i32, i32, i32) {
    %c0_i32 = arith.constant 0 : i32
    %c0_i32_0 = arith.constant 0 : i32
    return %arg0, %c0_i32, %arg1 : i32, i32, i32
  }
}

module attributes {stable_mosaic.version = 11 : i64} {
  func.func @_matmul_bn_kernel(%arg0: i32, %arg1: i32, %arg2: memref<1x4x32xbf16, #tpu.memory_space<vmem>>, %arg3: memref<1x32x2048xbf16, #tpu.memory_space<vmem>>, %arg4: memref<1x4x2048xf32, #tpu.memory_space<vmem>>, %arg5: memref<1x1x4x2xf32, #tpu.memory_space<vmem>>) attributes {dimension_semantics = [#tpu.dimension_semantics<parallel>, #tpu.dimension_semantics<parallel>], iteration_bounds = array<i64: 4, 1>, scalar_prefetch = 0 : i64, scratch_operands = 0 : i64, tpu.core_type = #tpu.core_type<tc>, window_params = [{transform_indices = @transform_0, window_bounds = array<i64: 1, 4, 32>}, {transform_indices = @transform_1, window_bounds = array<i64: 1, 32, 2048>}, {transform_indices = @transform_2, window_bounds = array<i64: 1, 4, 2048>}, {transform_indices = @transform_3, window_bounds = array<i64: 1, 1, 4, 2>}]} {
    %c0 = arith.constant 0 : index
    %c0_0 = arith.constant 0 : index
    %c0_1 = arith.constant 0 : index
    %0 = vector.load %arg2[%c0, %c0_0, %c0_1] : memref<1x4x32xbf16, #tpu.memory_space<vmem>>, vector<1x4x32xbf16>
    %1 = vector.shape_cast %0 : vector<1x4x32xbf16> to vector<4x32xbf16>
    %c0_2 = arith.constant 0 : index
    %c0_3 = arith.constant 0 : index
    %c0_4 = arith.constant 0 : index
    %2 = vector.load %arg3[%c0_2, %c0_3, %c0_4] : memref<1x32x2048xbf16, #tpu.memory_space<vmem>>, vector<1x32x2048xbf16>
    %3 = vector.shape_cast %2 : vector<1x32x2048xbf16> to vector<32x2048xbf16>
    %cst = arith.constant dense<0.000000e+00> : vector<4x2048xf32>
    %4 = tpu.matmul %1, %3, %cst {dimension_numbers = #tpu.dot_dimension_numbers<[1], [0], [0], [1], [0, 0, 1, 1], [], []>} : vector<4x32xbf16>, vector<32x2048xbf16>, vector<4x2048xf32> -> vector<4x2048xf32>
    %c0_5 = arith.constant 0 : index
    %c0_6 = arith.constant 0 : index
    %c0_7 = arith.constant 0 : index
    %5 = vector.load %arg4[%c0_5, %c0_6, %c0_7] : memref<1x4x2048xf32, #tpu.memory_space<vmem>>, vector<1x4x2048xf32>
    %6 = vector.shape_cast %5 : vector<1x4x2048xf32> to vector<4x2048xf32>
    %7 = vector.shape_cast %4 : vector<4x2048xf32> to vector<1x4x2048xf32>
    tpu.vector_store %arg4[%c0_5, %c0_6, %c0_7], %7 {strides = array<i32>} : memref<1x4x2048xf32, #tpu.memory_space<vmem>>, vector<1x4x2048xf32>,
    %cst_8 = arith.constant dense<0.000000e+00> : vector<4xf32>
    %8 = vector.multi_reduction <add>, %4, %cst_8 [1] : vector<4x2048xf32> to vector<4xf32>
    %9 = vector.shape_cast %8 : vector<4xf32> to vector<4x1xf32>
    %10 = arith.mulf %4, %4 : vector<4x2048xf32>
    %cst_9 = arith.constant dense<0.000000e+00> : vector<4xf32>
    %11 = vector.multi_reduction <add>, %10, %cst_9 [1] : vector<4x2048xf32> to vector<4xf32>
    %12 = vector.shape_cast %11 : vector<4xf32> to vector<4x1xf32>
    %13 = tpu.concatenate %9, %12 in 1 : vector<4x1xf32>, vector<4x1xf32> -> vector<4x2xf32>
    %c0_10 = arith.constant 0 : index
    %c0_11 = arith.constant 0 : index
    %c0_12 = arith.constant 0 : index
    %c0_13 = arith.constant 0 : index
    %14 = vector.load %arg5[%c0_10, %c0_11, %c0_12, %c0_13] : memref<1x1x4x2xf32, #tpu.memory_space<vmem>>, vector<1x1x4x2xf32>
    %15 = vector.shape_cast %14 : vector<1x1x4x2xf32> to vector<4x2xf32>
    %16 = vector.shape_cast %13 : vector<4x2xf32> to vector<1x1x4x2xf32>
    tpu.vector_store %arg5[%c0_10, %c0_11, %c0_12, %c0_13], %16 {strides = array<i32>} : memref<1x1x4x2xf32, #tpu.memory_space<vmem>>, vector<1x1x4x2xf32>,
    return
  }
  func.func @transform_0(%arg0: i32, %arg1: i32) -> (i32, i32, i32) {
    %c0_i32 = arith.constant 0 : i32
    %c0_i32_0 = arith.constant 0 : i32
    %c0_i32_1 = arith.constant 0 : i32
    return %arg0, %c0_i32, %c0_i32_0 : i32, i32, i32
  }
  func.func @transform_1(%arg0: i32, %arg1: i32) -> (i32, i32, i32) {
    %c0_i32 = arith.constant 0 : i32
    %c0_i32_0 = arith.constant 0 : i32
    return %arg0, %c0_i32, %arg1 : i32, i32, i32
  }
  func.func @transform_2(%arg0: i32, %arg1: i32) -> (i32, i32, i32) {
    %c0_i32 = arith.constant 0 : i32
    %c0_i32_0 = arith.constant 0 : i32
    return %arg0, %c0_i32, %arg1 : i32, i32, i32
  }
  func.func @transform_3(%arg0: i32, %arg1: i32) -> (i32, i32, i32, i32) {
    %c0_i32 = arith.constant 0 : i32
    %c0_i32_0 = arith.constant 0 : i32
    %c0_i32_1 = arith.constant 0 : i32
    return %arg0, %arg1, %c0_i32, %c0_i32_0 : i32, i32, i32, i32
  }
}

module attributes {stable_mosaic.version = 11 : i64} {
  func.func @_bn_leaky_kernel(%arg0: i32, %arg1: i32, %arg2: memref<1x4x2048xf32, #tpu.memory_space<vmem>>, %arg3: memref<4x1xf32, #tpu.memory_space<vmem>>, %arg4: memref<4x1xf32, #tpu.memory_space<vmem>>, %arg5: memref<1x4x2048xbf16, #tpu.memory_space<vmem>>) attributes {dimension_semantics = [#tpu.dimension_semantics<parallel>, #tpu.dimension_semantics<parallel>], iteration_bounds = array<i64: 4, 1>, scalar_prefetch = 0 : i64, scratch_operands = 0 : i64, tpu.core_type = #tpu.core_type<tc>, window_params = [{transform_indices = @transform_0, window_bounds = array<i64: 1, 4, 2048>}, {pipeline_mode = #tpu.pipeline_mode<synchronous>, transform_indices = @transform_1, window_bounds = array<i64: 4, 1>}, {pipeline_mode = #tpu.pipeline_mode<synchronous>, transform_indices = @transform_2, window_bounds = array<i64: 4, 1>}, {transform_indices = @transform_3, window_bounds = array<i64: 1, 4, 2048>}]} {
    %c0 = arith.constant 0 : index
    %c0_0 = arith.constant 0 : index
    %c0_1 = arith.constant 0 : index
    %0 = vector.load %arg2[%c0, %c0_0, %c0_1] : memref<1x4x2048xf32, #tpu.memory_space<vmem>>, vector<1x4x2048xf32>
    %1 = vector.shape_cast %0 : vector<1x4x2048xf32> to vector<4x2048xf32>
    %c0_2 = arith.constant 0 : index
    %c0_3 = arith.constant 0 : index
    %2 = vector.load %arg3[%c0_2, %c0_3] : memref<4x1xf32, #tpu.memory_space<vmem>>, vector<4x1xf32>
    %3 = vector.broadcast %2 : vector<4x1xf32> to vector<4x2048xf32>
    %4 = arith.mulf %1, %3 : vector<4x2048xf32>
    %c0_4 = arith.constant 0 : index
    %c0_5 = arith.constant 0 : index
    %5 = vector.load %arg4[%c0_4, %c0_5] : memref<4x1xf32, #tpu.memory_space<vmem>>, vector<4x1xf32>
    %6 = vector.broadcast %5 : vector<4x1xf32> to vector<4x2048xf32>
    %7 = arith.addf %4, %6 : vector<4x2048xf32>
    %cst = arith.constant 0.000000e+00 : f32
    %8 = vector.broadcast %cst : f32 to vector<4x2048xf32>
    %9 = arith.cmpf oge, %7, %8 : vector<4x2048xf32>
    %cst_6 = arith.constant 2.000000e-01 : f32
    %10 = vector.broadcast %cst_6 : f32 to vector<4x2048xf32>
    %11 = arith.mulf %10, %7 : vector<4x2048xf32>
    %12 = arith.select %9, %7, %11 : vector<4x2048xi1>, vector<4x2048xf32>
    %13 = arith.truncf %12 : vector<4x2048xf32> to vector<4x2048xbf16>
    %c0_7 = arith.constant 0 : index
    %c0_8 = arith.constant 0 : index
    %c0_9 = arith.constant 0 : index
    %14 = vector.load %arg5[%c0_7, %c0_8, %c0_9] : memref<1x4x2048xbf16, #tpu.memory_space<vmem>>, vector<1x4x2048xbf16>
    %15 = vector.shape_cast %14 : vector<1x4x2048xbf16> to vector<4x2048xbf16>
    %16 = vector.shape_cast %13 : vector<4x2048xbf16> to vector<1x4x2048xbf16>
    tpu.vector_store %arg5[%c0_7, %c0_8, %c0_9], %16 {strides = array<i32>} : memref<1x4x2048xbf16, #tpu.memory_space<vmem>>, vector<1x4x2048xbf16>,
    return
  }
  func.func @transform_0(%arg0: i32, %arg1: i32) -> (i32, i32, i32) {
    %c0_i32 = arith.constant 0 : i32
    %c0_i32_0 = arith.constant 0 : i32
    return %arg0, %c0_i32, %arg1 : i32, i32, i32
  }
  func.func @transform_1(%arg0: i32, %arg1: i32) -> (i32, i32) {
    %c0_i32 = arith.constant 0 : i32
    %c0_i32_0 = arith.constant 0 : i32
    %c0_i32_1 = arith.constant 0 : i32
    return %c0_i32, %c0_i32_0 : i32, i32
  }
  func.func @transform_2(%arg0: i32, %arg1: i32) -> (i32, i32) {
    %c0_i32 = arith.constant 0 : i32
    %c0_i32_0 = arith.constant 0 : i32
    %c0_i32_1 = arith.constant 0 : i32
    return %c0_i32, %c0_i32_0 : i32, i32
  }
  func.func @transform_3(%arg0: i32, %arg1: i32) -> (i32, i32, i32) {
    %c0_i32 = arith.constant 0 : i32
    %c0_i32_0 = arith.constant 0 : i32
    return %arg0, %c0_i32, %arg1 : i32, i32, i32
  }
}

module attributes {stable_mosaic.version = 11 : i64} {
  func.func @_matmul_tanh_kernel(%arg0: i32, %arg1: i32, %arg2: memref<1x3x16xbf16, #tpu.memory_space<vmem>>, %arg3: memref<1x16x8192xbf16, #tpu.memory_space<vmem>>, %arg4: memref<1x3x8192xf32, #tpu.memory_space<vmem>>) attributes {dimension_semantics = [#tpu.dimension_semantics<parallel>, #tpu.dimension_semantics<parallel>], iteration_bounds = array<i64: 4, 1>, scalar_prefetch = 0 : i64, scratch_operands = 0 : i64, tpu.core_type = #tpu.core_type<tc>, window_params = [{transform_indices = @transform_0, window_bounds = array<i64: 1, 3, 16>}, {transform_indices = @transform_1, window_bounds = array<i64: 1, 16, 8192>}, {transform_indices = @transform_2, window_bounds = array<i64: 1, 3, 8192>}]} {
    %c0 = arith.constant 0 : index
    %c0_0 = arith.constant 0 : index
    %c0_1 = arith.constant 0 : index
    %0 = vector.load %arg2[%c0, %c0_0, %c0_1] : memref<1x3x16xbf16, #tpu.memory_space<vmem>>, vector<1x3x16xbf16>
    %1 = vector.shape_cast %0 : vector<1x3x16xbf16> to vector<3x16xbf16>
    %c0_2 = arith.constant 0 : index
    %c0_3 = arith.constant 0 : index
    %c0_4 = arith.constant 0 : index
    %2 = vector.load %arg3[%c0_2, %c0_3, %c0_4] : memref<1x16x8192xbf16, #tpu.memory_space<vmem>>, vector<1x16x8192xbf16>
    %3 = vector.shape_cast %2 : vector<1x16x8192xbf16> to vector<16x8192xbf16>
    %cst = arith.constant dense<0.000000e+00> : vector<3x8192xf32>
    %4 = tpu.matmul %1, %3, %cst {dimension_numbers = #tpu.dot_dimension_numbers<[1], [0], [0], [1], [0, 0, 1, 1], [], []>} : vector<3x16xbf16>, vector<16x8192xbf16>, vector<3x8192xf32> -> vector<3x8192xf32>
    %5 = math.tanh %4 : vector<3x8192xf32>
    %c0_5 = arith.constant 0 : index
    %c0_6 = arith.constant 0 : index
    %c0_7 = arith.constant 0 : index
    %6 = vector.load %arg4[%c0_5, %c0_6, %c0_7] : memref<1x3x8192xf32, #tpu.memory_space<vmem>>, vector<1x3x8192xf32>
    %7 = vector.shape_cast %6 : vector<1x3x8192xf32> to vector<3x8192xf32>
    %8 = vector.shape_cast %5 : vector<3x8192xf32> to vector<1x3x8192xf32>
    tpu.vector_store %arg4[%c0_5, %c0_6, %c0_7], %8 {strides = array<i32>} : memref<1x3x8192xf32, #tpu.memory_space<vmem>>, vector<1x3x8192xf32>,
    return
  }
  func.func @transform_0(%arg0: i32, %arg1: i32) -> (i32, i32, i32) {
    %c0_i32 = arith.constant 0 : i32
    %c0_i32_0 = arith.constant 0 : i32
    %c0_i32_1 = arith.constant 0 : i32
    return %arg0, %c0_i32, %c0_i32_0 : i32, i32, i32
  }
  func.func @transform_1(%arg0: i32, %arg1: i32) -> (i32, i32, i32) {
    %c0_i32 = arith.constant 0 : i32
    %c0_i32_0 = arith.constant 0 : i32
    return %arg0, %c0_i32, %arg1 : i32, i32, i32
  }
  func.func @transform_2(%arg0: i32, %arg1: i32) -> (i32, i32, i32) {
    %c0_i32 = arith.constant 0 : i32
    %c0_i32_0 = arith.constant 0 : i32
    return %arg0, %c0_i32, %arg1 : i32, i32, i32
  }
}

</mosaic_0001>

<bundles_post_ra>
// kernel: _lambda_.12
= control target key start
LH: loop header
LB: loop body
LE: loop exit
PB: predicated region body
PF: predicated region fallthrough
CT: control target
= control target key end

     0   :  { %v148_v0 = vmov 0   ;;  %vm125_vm1 = vcmask 257024   ;;  %s234_s1 = inlined_call_operand.vmem [shape: f32[40,1], index: 1, kind: input, shape index: {}]   ;;  %s235_s2 = inlined_call_operand.vmem [shape: f32[40,1], index: 2, kind: input, shape index: {}]   ;;  %s236_s0 = inlined_call_operand.vmem [shape: f32[1,40,32], index: 0, kind: input, shape index: {}]   ;;  %s237_s3 = inlined_call_operand.vmem [shape: bf16[1,40,32], index: 3, kind: output, shape index: {}]  }
   0x1   :  { %147 = vset.pattern.permute.xlu1 %v148_v0  ;;  %146 = vset.pattern.permute.xlu0 %v148_v0  ;;  %v21_v1 = vld [vmem:[%s234_s1 + $0x10] sm:$0xff]  ;;  %v19_v2 = vld [vmem:[%s234_s1] sm:$0xff]  ;;  %v22_v3 = vld [vmem:[%s234_s1 + $0x18] sm:$0xff] }
   0x2   :  { %36 = vperm.xlu1 %147, %v21_v1   ;;  %26 = vperm.xlu0 %146, %v19_v2   ;;  %v20_v4 = vld [vmem:[%s234_s1 + $0x8] sm:$0xff]  ;;  %v54_v5 = vld [vmem:[%s235_s2] sm:$0xff]  ;;  %v56_v7 = vld [vmem:[%s235_s2 + $0x10] sm:$0xff] }
   0x3   :  { %v23_v6 = vld [vmem:[%s234_s1 + $0x20] sm:$0xff]  ;;  %v55_v8 = vld [vmem:[%s235_s2 + $0x8] sm:$0xff]  ;;  %v57_v10 = vld [vmem:[%s235_s2 + $0x18] sm:$0xff] }
   0x4   :  { %v58_v9 = vld [vmem:[%s235_s2 + $0x20] sm:$0xff]  ;;  %v16_v17 = vld [vmem:[%s236_s0 + $0x10] sm:$0xff]  ;;  %v15_v18 = vld [vmem:[%s236_s0 + $0x8] sm:$0xff] }
   0x5   :  { %v14_v13 = vld [vmem:[%s236_s0] sm:$0xff]  ;;  %v17_v23 = vld [vmem:[%s236_s0 + $0x18] sm:$0xff] }
   0x6   :  { %41 = vperm.xlu1 %147, %v22_v3   ;;  %31 = vperm.xlu0 %146, %v20_v4   ;;  %v18_v26 = vld [vmem:[%s236_s0 + $0x20] sm:$0xff] }
   0xa   :  { %61 = vperm.xlu1 %147, %v54_v5   ;;  %46 = vperm.xlu0 %146, %v23_v6  }
   0xe   :  { %71 = vperm.xlu1 %147, %v56_v7   ;;  %66 = vperm.xlu0 %146, %v55_v8  }
  0x12   :  { %81 = vperm.xlu1 %147, %v58_v9   ;;  %76 = vperm.xlu0 %146, %v57_v10  }
  0x81   :  { %v37_v11 = vpop.permute.xlu1 %36  ;;  %v27_v12 = vpop.permute.xlu0 %26 }
  0x82   :  { %v49_v16 = vmul.f32 %v27_v12, %v14_v13  ;;  %v51_v22 = vmul.f32 %v37_v11, %v16_v17 }
  0x85   :  { %v42_v14 = vpop.permute.xlu1 %41  ;;  %v32_v15 = vpop.permute.xlu0 %31 }
  0x86   :  { %v50_v24 = vmul.f32 %v32_v15, %v15_v18  ;;  %v52_v32 = vmul.f32 %v42_v14, %v17_v23 }
  0x89   :  { %v62_v19 = vpop.permute.xlu1 %61  ;;  %v47_v20 = vpop.permute.xlu0 %46 }
  0x8a   :  { %v84_v21 = vadd.f32 %v62_v19, %v49_v16  ;;  %v53_v34 = vmul.f32 %v47_v20, %v18_v26 }
  0x8c   :  { %vm89_vm0 = vcmp.ge.f32.partialorder %v84_v21, 0.0  ;;  %v94_v25 = vmul.f32 0.2, %v84_v21 }
  0x8d   :  { %v72_v27 = vpop.permute.xlu1 %71  ;;  %v67_v28 = vpop.permute.xlu0 %66 }
  0x8e   :  { %v99_v29 = vsel %vm89_vm0, %v84_v21, %v94_v25  ;;  %v86_v30 = vadd.f32 %v72_v27, %v51_v22  ;;  %v85_v31 = vadd.f32 %v67_v28, %v50_v24 }
  0x8f   :  { %v140_v33 = vpack.c.bf16 %v99_v29, %v99_v29 }
  0x90   :  { %vm91_vm2 = vcmp.ge.f32.partialorder %v86_v30, 0.0  ;;  %v96_v35 = vmul.f32 0.2, %v86_v30  ;;  %vm90_vm3 = vcmp.ge.f32.partialorder %v85_v31, 0.0  ;;  %v95_v36 = vmul.f32 0.2, %v85_v31 }
  0x91   :  { %126 = vst.msk [vmem:[%s237_s3] sm:$0xf] %vm125_vm1, %v140_v33  ;;  %v82_v37 = vpop.permute.xlu1 %81  ;;  %v77_v38 = vpop.permute.xlu0 %76 }
  0x92   :  { %v101_v39 = vsel %vm91_vm2, %v86_v30, %v96_v35  ;;  %v100_v40 = vsel %vm90_vm3, %v85_v31, %v95_v36  ;;  %v88_v41 = vadd.f32 %v82_v37, %v53_v34  ;;  %v87_v42 = vadd.f32 %v77_v38, %v52_v32 }
  0x93   :  { %v142_v43 = vpack.c.bf16 %v101_v39, %v101_v39  ;;  %v141_v44 = vpack.c.bf16 %v100_v40, %v100_v40 }
  0x94   :  { %vm93_vm4 = vcmp.ge.f32.partialorder %v88_v41, 0.0  ;;  %v98_v45 = vmul.f32 0.2, %v88_v41  ;;  %vm92_vm5 = vcmp.ge.f32.partialorder %v87_v42, 0.0  ;;  %v97_v46 = vmul.f32 0.2, %v87_v42 }
  0x95   :  { %128 = vst.msk [vmem:[%s237_s3 + $0x8] sm:$0xf] %vm125_vm1, %v142_v43  ;;  %127 = vst.msk [vmem:[%s237_s3 + $0x4] sm:$0xf] %vm125_vm1, %v141_v44 }
  0x96   :  { %v103_v47 = vsel %vm93_vm4, %v88_v41, %v98_v45  ;;  %v102_v48 = vsel %vm92_vm5, %v87_v42, %v97_v46 }
  0x97   :  { %v144_v49 = vpack.c.bf16 %v103_v47, %v103_v47  ;;  %v143_v50 = vpack.c.bf16 %v102_v48, %v102_v48 }
  0x99   :  { %130 = vst.msk [vmem:[%s237_s3 + $0x10] sm:$0xf] %vm125_vm1, %v144_v49  ;;  %129 = vst.msk [vmem:[%s237_s3 + $0xc] sm:$0xf] %vm125_vm1, %v143_v50 }

// kernel: _lambda_.11
= control target key start
LH: loop header
LB: loop body
LE: loop exit
PB: predicated region body
PF: predicated region fallthrough
CT: control target
= control target key end

     0   :  { %9 = vsyncpa [#allocation3], 0  ;;  %s337_s12 = smov [#allocation2]   ;;  %s451_s0 = inlined_call_operand.hbm [shape: bf16[1,40,128], index: 0, kind: input, shape index: {}]   ;;  %s452_s1 = inlined_call_operand.vmem [shape: bf16[1,128,32], index: 1, kind: input, shape index: {}]   ;;  %s453_s2 = inlined_call_operand.vmem [shape: f32[1,40,32], index: 2, kind: output, shape index: {0}]   ;;  %s454_s3 = inlined_call_operand.vmem [shape: f32[1,1,40,2], index: 3, kind: output, shape index: {1}]  }
   0x1   :  { %s15_s13 = sshll.u32 %s337_s12, 4  ;;  %s313_s16 = scalar_lea.hbm %s451_s0, 320  ;;  %s16_s13 = int_to_ptr.vmem [resolvable:$true] %s15_s13 }
   0x2   :  { %p314_p0 = scmp.ne.s32.totalorder %s451_s0, %s313_s16  ;;  %p317_p1 = scmp.lt.u32.totalorder %s313_s16, %s451_s0 }
   0x4   :  { %p319_p2 = pnand %p317_p1, %p314_p0 }
   0x6   :  { %322 = shalt.err (!%p319_p2)
}
   0x7   :  { %s323_s21 = scalar_lea.vmem %s16_s13, 320  ;;  %p328_p4 = scmp.lt.s32.totalorder %s16_s13, %s16_s13 }
   0x8   :  { %p324_p3 = scmp.ne.s32.totalorder %s16_s13, %s323_s21  ;;  %p329_p5 = scmp.lt.s32.totalorder %s323_s21, %s323_s21 }
   0xa   :  { %p330_p6 = por %p329_p5, %p328_p4 }
   0xc   :  { %p331_p7 = pnand %p330_p6, %p324_p3 }
   0xe   :  { %334 = shalt.err (!%p331_p7)
}
   0xf   :  { %s338_s22 = smov 64   ;;  %s339_s23 = smov 4  }
  0x10   :  { %21 = dma.hbm_to_vmem [thread:$0]  %s451_s0, 320, %s16_s13, [#allocation3], %s338_s22, %s338_s22, %s339_s23  }
  0x11   :  { %335 = dma.done.wait [#allocation3], 320  }
  0x12   :  { %336 = vsyncadd [#allocation3], 4294966976  ;;  %v340_v0 = vmov 0.0   ;;  %vm341_vm0 = vmmov 0   ;;  %v302_v1 = vld [vmem:[%s452_s1] sm:$0xff]   ;;  %v303_v2 = vld [vmem:[%s452_s1 + $0x8] sm:$0xff]  }
  0x13   :  { %253 = vmatprep.subr.bf16.mxu0 %v340_v0  ;;  %281 = vmatprep.subr.bf16.mxu1 %v340_v0  ;;  %v304_v3 = vld [vmem:[%s452_s1 + $0x10] sm:$0xff]   ;;  %v305_v4 = vld [vmem:[%s452_s1 + $0x18] sm:$0xff]   ;;  %v306_v5 = vld [vmem:[%s452_s1 + $0x20] sm:$0xff]   ;;  %vm169_vm1 = vcmask 261120   ;;  %vm210_vm2 = vcmask 7168   ;;  %vm216_vm3 = vcmask 15360  }
  0x14   :  { %269 = vmatprep.mubr.msk.bf16.mxu0 %vm341_vm0, %v340_v0  ;;  %273 = vmatprep.mubr.msk.bf16.mxu1 %vm341_vm0, %v340_v0  ;;  %v307_v6 = vld [vmem:[%s452_s1 + $0x28] sm:$0xff]   ;;  %v308_v7 = vld [vmem:[%s452_s1 + $0x30] sm:$0xff]   ;;  %v309_v8 = vld [vmem:[%s452_s1 + $0x38] sm:$0xff]  }
  0x15   :  { %254 = vmatpush3.bf16.msra.mxu0 %v302_v1  ;;  %289 = vmatpush3.bf16.msra.mxu1 %v302_v1  ;;  %v310_v9 = vld [vmem:[#allocation2] sm:$0xff]   ;;  %v311_v10 = vld [vmem:[#allocation2 + $0x8] sm:$0xff]   ;;  %v312_v11 = vld [vmem:[#allocation2 + $0x10] ss:$0 sps:$4 sm:$0xff]  }
  0x16   :  { %255 = vmatprep.subr.bf16.mxu0 %v340_v0  ;;  %282 = vmatprep.subr.bf16.mxu1 %v340_v0 }
  0x19   :  { %256 = vmatpush3.bf16.msra.mxu0 %v303_v2  ;;  %290 = vmatpush3.bf16.msra.mxu1 %v303_v2 }
  0x1a   :  { %257 = vmatprep.subr.bf16.mxu0 %v340_v0  ;;  %283 = vmatprep.subr.bf16.mxu1 %v340_v0 }
  0x1d   :  { %258 = vmatpush3.bf16.msra.mxu0 %v304_v3  ;;  %291 = vmatpush3.bf16.msra.mxu1 %v304_v3 }
  0x1e   :  { %259 = vmatprep.subr.bf16.mxu0 %v340_v0  ;;  %284 = vmatprep.subr.bf16.mxu1 %v340_v0 }
  0x21   :  { %260 = vmatpush3.bf16.msra.mxu0 %v305_v4  ;;  %292 = vmatpush3.bf16.msra.mxu1 %v305_v4 }
  0x22   :  { %261 = vmatprep.subr.bf16.mxu0 %v340_v0  ;;  %285 = vmatprep.subr.bf16.mxu1 %v340_v0 }
  0x25   :  { %262 = vmatpush3.bf16.msra.mxu0 %v306_v5  ;;  %293 = vmatpush3.bf16.msra.mxu1 %v306_v5 }
  0x26   :  { %263 = vmatprep.subr.bf16.mxu0 %v340_v0  ;;  %286 = vmatprep.subr.bf16.mxu1 %v340_v0 }
  0x29   :  { %264 = vmatpush3.bf16.msra.mxu0 %v307_v6  ;;  %294 = vmatpush3.bf16.msra.mxu1 %v307_v6 }
  0x2a   :  { %265 = vmatprep.subr.bf16.mxu0 %v340_v0  ;;  %287 = vmatprep.subr.bf16.mxu1 %v340_v0 }
  0x2d   :  { %266 = vmatpush3.bf16.msra.mxu0 %v308_v7  ;;  %295 = vmatpush3.bf16.msra.mxu1 %v308_v7 }
  0x2e   :  { %267 = vmatprep.subr.bf16.mxu0 %v340_v0  ;;  %288 = vmatprep.subr.bf16.mxu1 %v340_v0 }
  0x31   :  { %268 = vmatpush3.bf16.msra.mxu0 %v309_v8  ;;  %296 = vmatpush3.bf16.msra.mxu1 %v309_v8 }
  0x34   :  { %270 = vmatmul.mubr.bf16.vlgmr.msra.gmra.mrb[0].mxu0 %v310_v9  ;;  %274 = vmatmul.mubr.bf16.vlgmr.msra.gmra.mrb[0].mxu1 %v311_v10 }
  0x35   :  { %277 = vmatprep.mubr.msk.bf16.mxu1 %vm341_vm0, %v340_v0 }
  0x3c   :  { %278 = vmatmul.mubr.bf16.gmra.mrb[4].mxu1 %v312_v11 }
 0x107   :  { %v147_v12 = vpop.f32.mrb[0].mxu0  ;;  %v155_v13 = vpop.f32.mrb[0].mxu1 }
 0x108   :  { %170 = vst.msk [vmem:[%s453_s2] sm:$0xff] %vm169_vm1, %v147_v12  ;;  %172 = vst.msk [vmem:[%s453_s2 + $0x10] sm:$0xff] %vm169_vm1, %v155_v13  ;;  %v271_v14 = vpop.f32.mrb[1].mxu0  ;;  %v275_v15 = vpop.f32.mrb[1].mxu1  ;;  %v181_v16 = vsel %vm169_vm1, %v155_v13, 0.0  ;;  %v175_v17 = vsel %vm169_vm1, %v147_v12, 0.0  ;;  %v190_v24 = vmul.f32 %v147_v12, %v147_v12  ;;  %v192_v30 = vmul.f32 %v155_v13, %v155_v13 }
 0x109   :  { %182 = vadd.xlane.f32.xlu1 %v181_v16  ;;  %v158_v18 = vpop.f32.mrb[2].mxu1  ;;  %176 = vadd.xlane.f32.xlu0 %v175_v17  ;;  %v150_v19 = vpop.f32.mrb[2].mxu0 }
 0x10a   :  { %173 = vst.msk [vmem:[%s453_s2 + $0x18] sm:$0xff] %vm169_vm1, %v158_v18  ;;  %171 = vst.msk [vmem:[%s453_s2 + $0x8] sm:$0xff] %vm169_vm1, %v150_v19  ;;  %v272_v20 = vpop.f32.mrb[3].mxu0  ;;  %v276_v21 = vpop.f32.mrb[3].mxu1  ;;  %v184_v22 = vsel %vm169_vm1, %v158_v18, 0.0  ;;  %v178_v23 = vsel %vm169_vm1, %v150_v19, 0.0  ;;  %v191_v25 = vmul.f32 %v150_v19, %v150_v19  ;;  %v193_v36 = vmul.f32 %v158_v18, %v158_v18 }
 0x10b   :  { %v195_v28 = vsel %vm169_vm1, %v190_v24, 0.0  ;;  %v201_v34 = vsel %vm169_vm1, %v192_v30, 0.0 }
 0x10c   :  { %v198_v29 = vsel %vm169_vm1, %v191_v25, 0.0  ;;  %v204_v38 = vsel %vm169_vm1, %v193_v36, 0.0 }
 0x10d   :  { %185 = vadd.xlane.f32.xlu1 %v184_v22  ;;  %179 = vadd.xlane.f32.xlu0 %v178_v23 }
 0x10f   :  { %v163_v26 = vpop.f32.mrb[4].mxu1 }
 0x110   :  { %174 = vst.msk [vmem:[%s453_s2 + $0x20] sm:$0xff] %vm169_vm1, %v163_v26  ;;  %v279_v27 = vpop.f32.mrb[5].mxu1  ;;  %v187_v33 = vsel %vm169_vm1, %v163_v26, 0.0  ;;  %v194_v35 = vmul.f32 %v163_v26, %v163_v26 }
 0x111   :  { %196 = vadd.xlane.f32.xlu1 %v195_v28  ;;  %199 = vadd.xlane.f32.xlu0 %v198_v29  ;;  %v166_v31 = vpop.f32.mrb[6].mxu1 }
 0x112   :  { %v280_v32 = vpop.f32.mrb[7].mxu1  ;;  %v207_v37 = vsel %vm169_vm1, %v194_v35, 0.0 }
 0x115   :  { %202 = vadd.xlane.f32.xlu1 %v201_v34  ;;  %188 = vadd.xlane.f32.xlu0 %v187_v33 }
 0x119   :  { %208 = vadd.xlane.f32.xlu1 %v207_v37  ;;  %205 = vadd.xlane.f32.xlu0 %v204_v38 }
 0x196   :  { %v183_v39 = vpop.xlane.xlu1 %182  ;;  %v177_v40 = vpop.xlane.xlu0 %176 }
 0x19a   :  { %v186_v41 = vpop.xlane.xlu1 %185  ;;  %v180_v42 = vpop.xlane.xlu0 %179 }
 0x19e   :  { %v197_v43 = vpop.xlane.xlu1 %196  ;;  %v200_v44 = vpop.xlane.xlu0 %199 }
 0x19f   :  { %v211_v45 = vsel %vm210_vm2, %v177_v40, %v197_v43  ;;  %v212_v46 = vsel %vm210_vm2, %v180_v42, %v200_v44 }
 0x1a0   :  { %217 = vst.msk [vmem:[%s454_s3] sm:$0xff] %vm216_vm3, %v211_v45  ;;  %218 = vst.msk [vmem:[%s454_s3 + $0x8] sm:$0xff] %vm216_vm3, %v212_v46 }
 0x1a2   :  { %v203_v47 = vpop.xlane.xlu1 %202  ;;  %v189_v48 = vpop.xlane.xlu0 %188 }
 0x1a3   :  { %v213_v49 = vsel %vm210_vm2, %v183_v39, %v203_v47 }
 0x1a4   :  { %219 = vst.msk [vmem:[%s454_s3 + $0x10] sm:$0xff] %vm216_vm3, %v213_v49 }
 0x1a6   :  { %v209_v50 = vpop.xlane.xlu1 %208  ;;  %v206_v51 = vpop.xlane.xlu0 %205 }
 0x1a7   :  { %v215_v52 = vsel %vm210_vm2, %v189_v48, %v209_v50  ;;  %v214_v53 = vsel %vm210_vm2, %v186_v41, %v206_v51 }
 0x1a8   :  { %221 = vst.msk [vmem:[%s454_s3 + $0x20] sm:$0xff] %vm216_vm3, %v215_v52  ;;  %220 = vst.msk [vmem:[%s454_s3 + $0x18] sm:$0xff] %vm216_vm3, %v214_v53 }
 0x1a9   :  { %230 = vsyncpa [#allocation3], 1 }

// kernel: _lambda_.13
= control target key start
LH: loop header
LB: loop body
LE: loop exit
PB: predicated region body
PF: predicated region fallthrough
CT: control target
= control target key end

     0   :  { %s734_s12 = smov 0   ;;  %s736_s13 = smov 0   ;;  %s810_s0 = inlined_call_operand.vmem [shape: bf16[4,32,160], index: 0, kind: input, shape index: {}]   ;;  %s811_s1 = inlined_call_operand.vmem [shape: bf16[4,160,32], index: 1, kind: input, shape index: {}]   ;;  %s812_s2 = inlined_call_operand.vmem [shape: f32[4,32,32], index: 2, kind: output, shape index: {0}]   ;;  %s813_s3 = inlined_call_operand.vmem [shape: f32[4,1,32,2], index: 3, kind: output, shape index: {1}]  }
   0x1   :  { %s738_s14 = smov 0  }
   0x2 LB: > { %s26_s15 = sadd.s32 1, %s707_s13  ;;  %p598_p0 = scmp.ge.s32.totalorder %s711_s14, 1  ;;  %s711_s14 = sphi %s738_s14, %s14_s14   ;;  %s707_s13 = sphi %s736_s13, %s815_s13   ;;  %s703_s12 = sphi %s734_s12, %s814_s12  }
   0x3   : > { %p28_p1 = scmp.ge.s32.totalorder %s26_s15, 4  ;;  %p171_p2 = scmp.lt.s32.totalorder %s711_s14, 5 }
   0x5   : > { %s817_s15 = smov (%p28_p1, %s26_s15), 0  ;;  %p172_p3 = pnand %p598_p0, %p171_p2 }
   0x6   : > { %p215_p4 = scmp.lt.s32.totalorder (!%p172_p3), %s703_s12, 3  ;;  %v713_v0 = vmov (!%p172_p3), 0   ;;  %vm348_vm0 = vcmask (!%p172_p3), 261120   ;;  %vm436_vm1 = vcmask (!%p172_p3), 7168   ;;  %vm441_vm2 = vcmask (!%p172_p3), 15360  }
   0x7   : > { %175 = sbr.rel (%p172_p3) target bundleno = 427 (0x1ab), region = 28  ;;  %355 = vmatprep.subr.bf16.mxu0 (!%p172_p3), %v713_v0  ;;  %627 = vmatprep.subr.bf16.mxu1 (!%p172_p3), %v713_v0 }
   0xe   : > { %s819_s12 = smov (!%p215_p4, %s703_s12), 3 }
   0xf   : > { %s647_s16 = smul.u32 80, %s819_s12  ;;  %s752_s17 = sshll.u32 %s819_s12, 5 }
  0x10   : > { %s758_s20 = scalar_lea.vmem %s810_s0, %s752_s17  ;;  %s235_s26 = scalar_lea.vmem %s812_s2, %s752_s17 }
  0x11   : > { %s763_s23 = scalar_lea.vmem %s811_s1, %s647_s16  ;;  %v685_v5 = vld [vmem:[%s758_s20 + $0x4] ss:$8 sps:$4 sm:$0xff]   ;;  %v688_v6 = vld [vmem:[%s758_s20 + $0x14] ss:$8 sps:$4 sm:$0xff]   ;;  %v683_v13 = vld [vmem:[%s758_s20] ss:$8 sps:$4 sm:$0xff]   ;;  %s244_s29 = scalar_lea.vmem %s813_s3, %s752_s17 }
  0x12   : > { %v673_v1 = vld [vmem:[%s763_s23] sm:$0xff]   ;;  %v674_v2 = vld [vmem:[%s763_s23 + $0x8] sm:$0xff]   ;;  %v675_v3 = vld [vmem:[%s763_s23 + $0x10] sm:$0xff]   ;;  %620 = vmatprep.mubr.msk.bf16.mxu0 %vm348_vm0, %v685_v5  ;;  %621 = vmatprep.mubr.msk.bf16.mxu1 %vm348_vm0, %v688_v6 }
  0x13   : > { %356 = vmatpush1.bf16.msra.mxu0 %v673_v1  ;;  %637 = vmatpush1.bf16.msra.mxu1 %v673_v1  ;;  %v676_v4 = vld [vmem:[%s763_s23 + $0x18] sm:$0xff]   ;;  %v677_v7 = vld [vmem:[%s763_s23 + $0x20] sm:$0xff]   ;;  %v678_v8 = vld [vmem:[%s763_s23 + $0x28] sm:$0xff]  }
  0x14   : > { %357 = vmatprep.subr.bf16.mxu0 %v713_v0  ;;  %628 = vmatprep.subr.bf16.mxu1 %v713_v0  ;;  %v679_v9 = vld [vmem:[%s763_s23 + $0x30] sm:$0xff]   ;;  %v680_v10 = vld [vmem:[%s763_s23 + $0x38] sm:$0xff]   ;;  %v681_v11 = vld [vmem:[%s763_s23 + $0x40] sm:$0xff]  }
  0x15   : > { %v682_v12 = vld [vmem:[%s763_s23 + $0x48] sm:$0xff]   ;;  %v686_v14 = vld [vmem:[%s758_s20 + $0x10] ss:$8 sps:$4 sm:$0xff]  }
  0x17   : > { %358 = vmatpush1.bf16.msra.mxu0 %v674_v2  ;;  %638 = vmatpush1.bf16.msra.mxu1 %v674_v2 }
  0x18   : > { %359 = vmatprep.subr.bf16.mxu0 %v713_v0  ;;  %629 = vmatprep.subr.bf16.mxu1 %v713_v0 }
  0x1b   : > { %360 = vmatpush1.bf16.msra.mxu0 %v675_v3  ;;  %639 = vmatpush1.bf16.msra.mxu1 %v675_v3 }
  0x1c   : > { %361 = vmatprep.subr.bf16.mxu0 %v713_v0  ;;  %630 = vmatprep.subr.bf16.mxu1 %v713_v0 }
  0x1f   : > { %362 = vmatpush1.bf16.msra.mxu0 %v676_v4  ;;  %640 = vmatpush1.bf16.msra.mxu1 %v676_v4 }
  0x20   : > { %363 = vmatprep.subr.bf16.mxu0 %v713_v0  ;;  %631 = vmatprep.subr.bf16.mxu1 %v713_v0 }
  0x23   : > { %364 = vmatpush1.bf16.msra.mxu0 %v677_v7  ;;  %641 = vmatpush1.bf16.msra.mxu1 %v677_v7 }
  0x24   : > { %365 = vmatprep.subr.bf16.mxu0 %v713_v0  ;;  %632 = vmatprep.subr.bf16.mxu1 %v713_v0 }
  0x27   : > { %366 = vmatpush1.bf16.msra.mxu0 %v678_v8  ;;  %642 = vmatpush1.bf16.msra.mxu1 %v678_v8 }
  0x28   : > { %367 = vmatprep.subr.bf16.mxu0 %v713_v0  ;;  %633 = vmatprep.subr.bf16.mxu1 %v713_v0 }
  0x2b   : > { %368 = vmatpush1.bf16.msra.mxu0 %v679_v9  ;;  %643 = vmatpush1.bf16.msra.mxu1 %v679_v9 }
  0x2c   : > { %369 = vmatprep.subr.bf16.mxu0 %v713_v0  ;;  %634 = vmatprep.subr.bf16.mxu1 %v713_v0 }
  0x2f   : > { %370 = vmatpush1.bf16.msra.mxu0 %v680_v10  ;;  %644 = vmatpush1.bf16.msra.mxu1 %v680_v10 }
  0x30   : > { %371 = vmatprep.subr.bf16.mxu0 %v713_v0  ;;  %635 = vmatprep.subr.bf16.mxu1 %v713_v0 }
  0x33   : > { %372 = vmatpush1.bf16.msra.mxu0 %v681_v11  ;;  %645 = vmatpush1.bf16.msra.mxu1 %v681_v11 }
  0x34   : > { %373 = vmatprep.subr.bf16.mxu0 %v713_v0  ;;  %636 = vmatprep.subr.bf16.mxu1 %v713_v0 }
  0x37   : > { %374 = vmatpush1.bf16.msra.mxu0 %v682_v12  ;;  %646 = vmatpush1.bf16.msra.mxu1 %v682_v12 }
  0x3a   : > { %388 = vmatmul.mubr.bf16.vlgmr.msra.gmra.mrb[0].mxu0 %v683_v13  ;;  %396 = vmatmul.mubr.bf16.vlgmr.msra.gmra.mrb[0].mxu1 %v686_v14 }
 0x10d   : > { %v389_v15 = vpop.f32.mrb[0].mxu0  ;;  %v397_v16 = vpop.f32.mrb[0].mxu1 }
 0x10e   : > { %404 = vst.msk [vmem:[%s235_s26] sm:$0xff] %vm348_vm0, %v389_v15  ;;  %406 = vst.msk [vmem:[%s235_s26 + $0x10] sm:$0xff] %vm348_vm0, %v397_v16  ;;  %v391_v17 = vpop.f32.mrb[1].mxu0  ;;  %v399_v18 = vpop.f32.mrb[1].mxu1  ;;  %v414_v19 = vsel %vm348_vm0, %v397_v16, 0.0  ;;  %v408_v20 = vsel %vm348_vm0, %v389_v15, 0.0  ;;  %v420_v28 = vmul.f32 %v389_v15, %v389_v15  ;;  %v422_v32 = vmul.f32 %v397_v16, %v397_v16 }
 0x10f   : > { %415 = vadd.xlane.f32.xlu1 %v414_v19  ;;  %v400_v21 = vpop.f32.mrb[2].mxu1  ;;  %409 = vadd.xlane.f32.xlu0 %v408_v20  ;;  %v392_v22 = vpop.f32.mrb[2].mxu0 }
 0x110   : > { %407 = vst.msk [vmem:[%s235_s26 + $0x18] sm:$0xff] %vm348_vm0, %v400_v21  ;;  %405 = vst.msk [vmem:[%s235_s26 + $0x8] sm:$0xff] %vm348_vm0, %v392_v22  ;;  %v394_v23 = vpop.f32.mrb[3].mxu0  ;;  %v402_v24 = vpop.f32.mrb[3].mxu1  ;;  %v417_v25 = vsel %vm348_vm0, %v400_v21, 0.0  ;;  %v411_v26 = vsel %vm348_vm0, %v392_v22, 0.0  ;;  %v421_v27 = vmul.f32 %v392_v22, %v392_v22  ;;  %v423_v31 = vmul.f32 %v400_v21, %v400_v21 }
 0x111   : > { %v424_v30 = vsel %vm348_vm0, %v420_v28, 0.0  ;;  %v430_v34 = vsel %vm348_vm0, %v422_v32, 0.0 }
 0x112   : > { %v427_v29 = vsel %vm348_vm0, %v421_v27, 0.0  ;;  %v433_v33 = vsel %vm348_vm0, %v423_v31, 0.0 }
 0x113   : > { %418 = vadd.xlane.f32.xlu1 %v417_v25  ;;  %412 = vadd.xlane.f32.xlu0 %v411_v26 }
 0x117   : > { %428 = vadd.xlane.f32.xlu1 %v427_v29  ;;  %425 = vadd.xlane.f32.xlu0 %v424_v30 }
 0x11b   : > { %434 = vadd.xlane.f32.xlu1 %v433_v33  ;;  %431 = vadd.xlane.f32.xlu0 %v430_v34 }
 0x19c   : > { %v416_v35 = vpop.xlane.xlu1 %415  ;;  %v410_v36 = vpop.xlane.xlu0 %409 }
 0x1a0   : > { %v419_v37 = vpop.xlane.xlu1 %418  ;;  %v413_v38 = vpop.xlane.xlu0 %412 }
 0x1a4   : > { %v429_v39 = vpop.xlane.xlu1 %428  ;;  %v426_v40 = vpop.xlane.xlu0 %425 }
 0x1a5   : > { %v438_v41 = vsel %vm436_vm1, %v413_v38, %v429_v39  ;;  %v437_v42 = vsel %vm436_vm1, %v410_v36, %v426_v40 }
 0x1a6   : > { %443 = vst.msk [vmem:[%s244_s29 + $0x8] sm:$0xff] %vm441_vm2, %v438_v41  ;;  %442 = vst.msk [vmem:[%s244_s29] sm:$0xff] %vm441_vm2, %v437_v42 }
 0x1a8   : > { %v435_v43 = vpop.xlane.xlu1 %434  ;;  %v432_v44 = vpop.xlane.xlu0 %431 }
 0x1a9   : > { %v440_v45 = vsel %vm436_vm1, %v419_v37, %v435_v43  ;;  %v439_v46 = vsel %vm436_vm1, %v416_v35, %v432_v44 }
 0x1aa   : > { %445 = vst.msk [vmem:[%s244_s29 + $0x18] sm:$0xff] %vm441_vm2, %v440_v45  ;;  %444 = vst.msk [vmem:[%s244_s29 + $0x10] sm:$0xff] %vm441_vm2, %v439_v46 }
 0x1ab PF: > { %s14_s14 = sadd.s32 1, %s711_s14   ;;  %s814_s12 = smov %s707_s13 }
 0x1ac   : > { %p11_p5 = scmp.ge.s32.totalorder %s14_s14, 6   ;;  %s815_s13 = smov %s817_s15 }
 0x1ae   :  { %13 = sbr.rel (!%p11_p5) target bundleno = 2 (0x2), region = 73 }

// kernel: _lambda_.14
= control target key start
LH: loop header
LB: loop body
LE: loop exit
PB: predicated region body
PF: predicated region fallthrough
CT: control target
= control target key end

     0   :  { %s471_s12 = smov 0   ;;  %s473_s13 = smov 0   ;;  %s536_s0 = inlined_call_operand.vmem [shape: f32[4,32,32], index: 0, kind: input, shape index: {}]   ;;  %s537_s1 = inlined_call_operand.vmem [shape: f32[32,1], index: 1, kind: input, shape index: {}]   ;;  %s538_s2 = inlined_call_operand.vmem [shape: f32[32,1], index: 2, kind: input, shape index: {}]   ;;  %s539_s3 = inlined_call_operand.vmem [shape: bf16[4,32,32], index: 3, kind: output, shape index: {}]  }
   0x1   :  { %s475_s14 = smov 0  }
   0x2 LB: > { %s25_s15 = sadd.s32 1, %s444_s13  ;;  %p382_p0 = scmp.ge.s32.totalorder %s448_s14, 1  ;;  %s448_s14 = sphi %s475_s14, %s13_s14   ;;  %s444_s13 = sphi %s473_s13, %s541_s13   ;;  %s440_s12 = sphi %s471_s12, %s540_s12  }
   0x3   : > { %p27_p1 = scmp.ge.s32.totalorder %s25_s15, 4  ;;  %p156_p2 = scmp.lt.s32.totalorder %s448_s14, 5 }
   0x5   : > { %s543_s15 = smov (%p27_p1, %s25_s15), 0  ;;  %p157_p3 = pnand %p382_p0, %p156_p2 }
   0x6   : > { %v208_v0 = vld [vmem:[%s537_s1 + $0x10] sm:$0xff] (!%p157_p3)  ;;  %v206_v1 = vld [vmem:[%s537_s1] sm:$0xff] (!%p157_p3)  ;;  %v450_v2 = vmov (!%p157_p3), 0   ;;  %v209_v3 = vld [vmem:[%s537_s1 + $0x18] sm:$0xff] (!%p157_p3)  ;;  %p186_p4 = scmp.lt.s32.totalorder (!%p157_p3), %s440_s12, 3  ;;  %vm290_vm2 = vcmask (!%p157_p3), 257024  }
   0x7   : > { %160 = sbr.rel (%p157_p3) target bundleno = 156 (0x9c), region = 32  ;;  %425 = vset.pattern.permute.xlu1 (!%p157_p3), %v450_v2  ;;  %424 = vset.pattern.permute.xlu0 (!%p157_p3), %v450_v2  ;;  %v207_v4 = vld [vmem:[%s537_s1 + $0x8] sm:$0xff] (!%p157_p3)  ;;  %v234_v6 = vld [vmem:[%s538_s2] sm:$0xff] (!%p157_p3)  ;;  %v237_v7 = vld [vmem:[%s538_s2 + $0x18] sm:$0xff] (!%p157_p3) }
   0x8   : > { %222 = vperm.xlu1 (!%p157_p3), %425, %v208_v0   ;;  %212 = vperm.xlu0 (!%p157_p3), %424, %v206_v1   ;;  %v235_v5 = vld [vmem:[%s538_s2 + $0x8] sm:$0xff] (!%p157_p3)  ;;  %v236_v8 = vld [vmem:[%s538_s2 + $0x10] sm:$0xff] (!%p157_p3) }
   0xc   : > { %227 = vperm.xlu1 (!%p157_p3), %425, %v209_v3   ;;  %217 = vperm.xlu0 (!%p157_p3), %424, %v207_v4  }
   0xe   : > { %s545_s12 = smov (!%p186_p4, %s440_s12), 3 }
   0xf   : > { %s393_s5 = sshll.u32 %s545_s12, 5  ;;  %s394_s9 = sshll.u32 %s545_s12, 4 }
  0x10   : > { %245 = vperm.xlu1 %425, %v235_v5   ;;  %240 = vperm.xlu0 %424, %v234_v6   ;;  %s193_s8 = scalar_lea.vmem %s536_s0, %s393_s5  ;;  %s201_s16 = scalar_lea.vmem %s539_s3, %s394_s9 }
  0x11   : > { %v202_v11 = vld [vmem:[%s193_s8] sm:$0xff]  ;;  %v203_v14 = vld [vmem:[%s193_s8 + $0x8] sm:$0xff]  ;;  %v204_v15 = vld [vmem:[%s193_s8 + $0x10] sm:$0xff] }
  0x12   : > { %v205_v17 = vld [vmem:[%s193_s8 + $0x18] sm:$0xff] }
  0x14   : > { %255 = vperm.xlu1 %425, %v237_v7   ;;  %250 = vperm.xlu0 %424, %v236_v8  }
  0x87   : > { %v223_v9 = vpop.permute.xlu1 %222  ;;  %v213_v10 = vpop.permute.xlu0 %212 }
  0x88   : > { %v230_v16 = vmul.f32 %v213_v10, %v202_v11  ;;  %v232_v23 = vmul.f32 %v223_v9, %v204_v15 }
  0x8b   : > { %v228_v12 = vpop.permute.xlu1 %227  ;;  %v218_v13 = vpop.permute.xlu0 %217 }
  0x8c   : > { %v231_v18 = vmul.f32 %v218_v13, %v203_v14  ;;  %v233_v24 = vmul.f32 %v228_v12, %v205_v17 }
  0x8f   : > { %v246_v19 = vpop.permute.xlu1 %245  ;;  %v241_v20 = vpop.permute.xlu0 %240 }
  0x90   : > { %v259_v21 = vadd.f32 %v246_v19, %v231_v18  ;;  %v258_v22 = vadd.f32 %v241_v20, %v230_v16 }
  0x92   : > { %vm263_vm0 = vcmp.ge.f32.partialorder %v259_v21, 0.0  ;;  %v267_v25 = vmul.f32 0.2, %v259_v21  ;;  %vm262_vm1 = vcmp.ge.f32.partialorder %v258_v22, 0.0  ;;  %v266_v26 = vmul.f32 0.2, %v258_v22 }
  0x93   : > { %v256_v27 = vpop.permute.xlu1 %255  ;;  %v251_v28 = vpop.permute.xlu0 %250 }
  0x94   : > { %v271_v29 = vsel %vm263_vm0, %v259_v21, %v267_v25  ;;  %v270_v30 = vsel %vm262_vm1, %v258_v22, %v266_v26  ;;  %v261_v31 = vadd.f32 %v256_v27, %v233_v24  ;;  %v260_v32 = vadd.f32 %v251_v28, %v232_v23 }
  0x95   : > { %v396_v33 = vpack.c.bf16 %v271_v29, %v271_v29  ;;  %v395_v34 = vpack.c.bf16 %v270_v30, %v270_v30 }
  0x96   : > { %vm265_vm3 = vcmp.ge.f32.partialorder %v261_v31, 0.0  ;;  %v269_v35 = vmul.f32 0.2, %v261_v31  ;;  %vm264_vm4 = vcmp.ge.f32.partialorder %v260_v32, 0.0  ;;  %v268_v36 = vmul.f32 0.2, %v260_v32 }
  0x97   : > { %292 = vst.msk [vmem:[%s201_s16 + $0x4] sm:$0xf] %vm290_vm2, %v396_v33  ;;  %291 = vst.msk [vmem:[%s201_s16] sm:$0xf] %vm290_vm2, %v395_v34 }
  0x98   : > { %v273_v37 = vsel %vm265_vm3, %v261_v31, %v269_v35  ;;  %v272_v38 = vsel %vm264_vm4, %v260_v32, %v268_v36 }
  0x99   : > { %v398_v39 = vpack.c.bf16 %v273_v37, %v273_v37  ;;  %v397_v40 = vpack.c.bf16 %v272_v38, %v272_v38 }
  0x9b   : > { %294 = vst.msk [vmem:[%s201_s16 + $0xc] sm:$0xf] %vm290_vm2, %v398_v39  ;;  %293 = vst.msk [vmem:[%s201_s16 + $0x8] sm:$0xf] %vm290_vm2, %v397_v40 }
  0x9c PF: > { %s13_s14 = sadd.s32 1, %s448_s14   ;;  %s540_s12 = smov %s444_s13 }
  0x9d   : > { %p10_p5 = scmp.ge.s32.totalorder %s13_s14, 6   ;;  %s541_s13 = smov %s543_s15 }
  0x9f   :  { %12 = sbr.rel (!%p10_p5) target bundleno = 2 (0x2), region = 62 }

// kernel: _lambda_.15
= control target key start
LH: loop header
LB: loop body
LE: loop exit
PB: predicated region body
PF: predicated region fallthrough
CT: control target
= control target key end

     0   :  { %s663_s12 = smov 0   ;;  %s665_s13 = smov 0   ;;  %s707_s0 = inlined_call_operand.vmem [shape: bf16[4,16,128], index: 0, kind: input, shape index: {}]   ;;  %s708_s1 = inlined_call_operand.vmem [shape: bf16[4,128,128], index: 1, kind: input, shape index: {}]   ;;  %s709_s2 = inlined_call_operand.vmem [shape: f32[4,16,128], index: 2, kind: output, shape index: {0}]   ;;  %s710_s3 = inlined_call_operand.vmem [shape: f32[4,1,16,2], index: 3, kind: output, shape index: {1}]  }
   0x1   :  { %s667_s14 = smov 0  }
   0x2 LB: > { %s26_s15 = sadd.s32 1, %s635_s13  ;;  %p529_p0 = scmp.ge.s32.totalorder %s639_s14, 1  ;;  %s639_s14 = sphi %s667_s14, %s14_s14   ;;  %s635_s13 = sphi %s665_s13, %s712_s13   ;;  %s631_s12 = sphi %s663_s12, %s711_s12  }
   0x3   : > { %p28_p1 = scmp.ge.s32.totalorder %s26_s15, 4  ;;  %p171_p2 = scmp.lt.s32.totalorder %s639_s14, 5 }
   0x5   : > { %s714_s15 = smov (%p28_p1, %s26_s15), 0  ;;  %p172_p3 = pnand %p529_p0, %p171_p2 }
   0x6   : > { %p215_p4 = scmp.lt.s32.totalorder (!%p172_p3), %s631_s12, 3  ;;  %v641_v0 = vmov (!%p172_p3), 0.0   ;;  %vm642_vm0 = vmmov (!%p172_p3), 0   ;;  %vm371_vm1 = vcmask (!%p172_p3), 7168   ;;  %vm374_vm2 = vcmask (!%p172_p3), 15360  }
   0x7   : > { %175 = sbr.rel (%p172_p3) target bundleno = 411 (0x19b), region = 28  ;;  %562 = vmatprep.subr.bf16.mxu0 (!%p172_p3), %v641_v0  ;;  %578 = vmatprep.mubr.msk.bf16.mxu0 (!%p172_p3), %vm642_vm0, %v641_v0 }
   0xe   : > { %s716_s12 = smov (!%p215_p4, %s631_s12), 3 }
   0xf   : > { %s550_s16 = sshll.u32 %s716_s12, 6  ;;  %s549_s20 = sshll.u32 %s716_s12, 3 }
  0x10   : > { %s227_s19 = scalar_lea.vmem %s708_s1, %s550_s16  ;;  %s219_s23 = scalar_lea.vmem %s707_s0, %s549_s20 }
  0x11   : > { %v608_v1 = vld [vmem:[%s227_s19] sm:$0xff]   ;;  %v609_v2 = vld [vmem:[%s227_s19 + $0x8] sm:$0xff]   ;;  %v610_v3 = vld [vmem:[%s227_s19 + $0x10] sm:$0xff]   ;;  %s551_s24 = sshll.u32 %s716_s12, 4 }
  0x12   : > { %563 = vmatpush3.bf16.msra.mxu0 %v608_v1  ;;  %v611_v4 = vld [vmem:[%s227_s19 + $0x18] sm:$0xff]   ;;  %v612_v5 = vld [vmem:[%s227_s19 + $0x20] sm:$0xff]   ;;  %v613_v6 = vld [vmem:[%s227_s19 + $0x28] sm:$0xff]   ;;  %s235_s27 = scalar_lea.vmem %s709_s2, %s551_s24  ;;  %s244_s30 = scalar_lea.vmem %s710_s3, %s551_s24 }
  0x13   : > { %564 = vmatprep.subr.bf16.mxu0 %v641_v0  ;;  %v614_v7 = vld [vmem:[%s227_s19 + $0x30] sm:$0xff]   ;;  %v615_v8 = vld [vmem:[%s227_s19 + $0x38] sm:$0xff]   ;;  %v616_v9 = vld [vmem:[%s219_s23] sm:$0xff]  }
  0x16   : > { %565 = vmatpush3.bf16.msra.mxu0 %v609_v2 }
  0x17   : > { %566 = vmatprep.subr.bf16.mxu0 %v641_v0 }
  0x1a   : > { %567 = vmatpush3.bf16.msra.mxu0 %v610_v3 }
  0x1b   : > { %568 = vmatprep.subr.bf16.mxu0 %v641_v0 }
  0x1e   : > { %569 = vmatpush3.bf16.msra.mxu0 %v611_v4 }
  0x1f   : > { %570 = vmatprep.subr.bf16.mxu0 %v641_v0 }
  0x22   : > { %571 = vmatpush3.bf16.msra.mxu0 %v612_v5 }
  0x23   : > { %572 = vmatprep.subr.bf16.mxu0 %v641_v0 }
  0x26   : > { %573 = vmatpush3.bf16.msra.mxu0 %v613_v6 }
  0x27   : > { %574 = vmatprep.subr.bf16.mxu0 %v641_v0 }
  0x2a   : > { %575 = vmatpush3.bf16.msra.mxu0 %v614_v7 }
  0x2b   : > { %576 = vmatprep.subr.bf16.mxu0 %v641_v0 }
  0x2e   : > { %577 = vmatpush3.bf16.msra.mxu0 %v615_v8 }
  0x31   : > { %579 = vmatmul.mubr.bf16.vlgmr.msra.gmra.mrb[0].mxu0 %v616_v9 }
 0x104   : > { %v352_v10 = vpop.f32.mrb[0].mxu0 }
 0x105   : > { %359 = vst [vmem:[%s235_s27] sm:$0xff] %v352_v10  ;;  %361 = vadd.xlane.f32.xlu0 %v352_v10  ;;  %v580_v11 = vpop.f32.mrb[1].mxu0  ;;  %v365_v12 = vmul.f32 %v352_v10, %v352_v10 }
 0x106   : > { %v355_v13 = vpop.f32.mrb[2].mxu0 }
 0x107   : > { %360 = vst [vmem:[%s235_s27 + $0x8] sm:$0xff] %v355_v13  ;;  %367 = vadd.xlane.f32.xlu1 %v365_v12  ;;  %v581_v14 = vpop.f32.mrb[3].mxu0  ;;  %v366_v15 = vmul.f32 %v355_v13, %v355_v13 }
 0x109   : > { %363 = vadd.xlane.f32.xlu0 %v355_v13 }
 0x10b   : > { %369 = vadd.xlane.f32.xlu1 %v366_v15 }
 0x192   : > { %v362_v16 = vpop.xlane.xlu0 %361 }
 0x194   : > { %v368_v17 = vpop.xlane.xlu1 %367 }
 0x195   : > { %v372_v18 = vsel %vm371_vm1, %v362_v16, %v368_v17 }
 0x196   : > { %375 = vst.msk [vmem:[%s244_s30] sm:$0xff] %vm374_vm2, %v372_v18  ;;  %v364_v19 = vpop.xlane.xlu0 %363 }
 0x198   : > { %v370_v20 = vpop.xlane.xlu1 %369 }
 0x199   : > { %v373_v21 = vsel %vm371_vm1, %v364_v19, %v370_v20 }
 0x19a   : > { %376 = vst.msk [vmem:[%s244_s30 + $0x8] sm:$0xff] %vm374_vm2, %v373_v21 }
 0x19b PF: > { %s14_s14 = sadd.s32 1, %s639_s14   ;;  %s711_s12 = smov %s635_s13 }
 0x19c   : > { %p11_p5 = scmp.ge.s32.totalorder %s14_s14, 6   ;;  %s712_s13 = smov %s714_s15 }
 0x19e   :  { %13 = sbr.rel (!%p11_p5) target bundleno = 2 (0x2), region = 73 }

// kernel: _lambda_.16
= control target key start
LH: loop header
LB: loop body
LE: loop exit
PB: predicated region body
PF: predicated region fallthrough
CT: control target
= control target key end

     0   :  { %s425_s12 = smov 0   ;;  %s427_s13 = smov 0   ;;  %s470_s0 = inlined_call_operand.vmem [shape: f32[4,16,128], index: 0, kind: input, shape index: {}]   ;;  %s471_s1 = inlined_call_operand.vmem [shape: f32[16,1], index: 1, kind: input, shape index: {}]   ;;  %s472_s2 = inlined_call_operand.vmem [shape: f32[16,1], index: 2, kind: input, shape index: {}]   ;;  %s473_s3 = inlined_call_operand.vmem [shape: bf16[4,16,128], index: 3, kind: output, shape index: {}]  }
   0x1   :  { %s429_s14 = smov 0  }
   0x2 LB: > { %s25_s15 = sadd.s32 1, %s398_s13  ;;  %p335_p0 = scmp.ge.s32.totalorder %s402_s14, 1  ;;  %s402_s14 = sphi %s429_s14, %s13_s14   ;;  %s398_s13 = sphi %s427_s13, %s475_s13   ;;  %s394_s12 = sphi %s425_s12, %s474_s12  }
   0x3   : > { %p27_p1 = scmp.ge.s32.totalorder %s25_s15, 4  ;;  %p156_p2 = scmp.lt.s32.totalorder %s402_s14, 5 }
   0x5   : > { %s477_s15 = smov (%p27_p1, %s25_s15), 0  ;;  %p157_p3 = pnand %p335_p0, %p156_p2 }
   0x6   : > { %v218_v0 = vld [vmem:[%s472_s2] sm:$0xff] (!%p157_p3)  ;;  %v404_v2 = vmov (!%p157_p3), 0   ;;  %v219_v3 = vld [vmem:[%s472_s2 + $0x8] sm:$0xff] (!%p157_p3)  ;;  %p186_p4 = scmp.lt.s32.totalorder (!%p157_p3), %s394_s12, 3 }
   0x7   : > { %160 = sbr.rel (%p157_p3) target bundleno = 150 (0x96), region = 32  ;;  %v204_v1 = vld [vmem:[%s471_s1] sm:$0xff] (!%p157_p3)  ;;  %379 = vset.pattern.permute.xlu1 (!%p157_p3), %v404_v2  ;;  %378 = vset.pattern.permute.xlu0 (!%p157_p3), %v404_v2  ;;  %v205_v4 = vld [vmem:[%s471_s1 + $0x8] sm:$0xff] (!%p157_p3) }
   0x8   : > { %222 = vperm.xlu1 (!%p157_p3), %379, %v218_v0   ;;  %208 = vperm.xlu0 (!%p157_p3), %378, %v204_v1  }
   0xc   : > { %227 = vperm.xlu1 (!%p157_p3), %379, %v219_v3   ;;  %213 = vperm.xlu0 (!%p157_p3), %378, %v205_v4  }
   0xe   : > { %s479_s12 = smov (!%p186_p4, %s394_s12), 3 }
   0xf   : > { %s344_s24 = sshll.u32 %s479_s12, 4  ;;  %s345_s28 = sshll.u32 %s479_s12, 3 }
  0x10   : > { %s193_s27 = scalar_lea.vmem %s470_s0, %s344_s24  ;;  %s201_s4 = scalar_lea.vmem %s473_s3, %s345_s28 }
  0x11   : > { %v202_v5 = vld [vmem:[%s193_s27] sm:$0xff]  ;;  %v203_v9 = vld [vmem:[%s193_s27 + $0x8] sm:$0xff] }
  0x87   : > { %v223_v6 = vpop.permute.xlu1 %222  ;;  %v209_v7 = vpop.permute.xlu0 %208 }
  0x88   : > { %v216_v8 = vmul.f32 %v209_v7, %v202_v5 }
  0x8a   : > { %v230_v10 = vadd.f32 %v223_v6, %v216_v8 }
  0x8b   : > { %v214_v11 = vpop.permute.xlu0 %213  ;;  %v228_v13 = vpop.permute.xlu1 %227 }
  0x8c   : > { %v217_v12 = vmul.f32 %v214_v11, %v203_v9  ;;  %v234_v14 = vmul.f32 0.2, %v230_v10  ;;  %vm232_vm0 = vcmp.ge.f32.partialorder %v230_v10, 0.0 }
  0x8e   : > { %v231_v15 = vadd.f32 %v228_v13, %v217_v12  ;;  %v236_v17 = vsel %vm232_vm0, %v230_v10, %v234_v14 }
  0x90   : > { %vm233_vm1 = vcmp.ge.f32.partialorder %v231_v15, 0.0  ;;  %v235_v16 = vmul.f32 0.2, %v231_v15 }
  0x92   : > { %v237_v18 = vsel %vm233_vm1, %v231_v15, %v235_v16 }
  0x93   : > { %v351_v19 = vpack.c.bf16 %v237_v18, %v236_v17 }
  0x95   : > { %352 = vst [vmem:[%s201_s4] sm:$0xff] %v351_v19  }
  0x96 PF: > { %s13_s14 = sadd.s32 1, %s402_s14   ;;  %s474_s12 = smov %s398_s13 }
  0x97   : > { %p10_p5 = scmp.ge.s32.totalorder %s13_s14, 6   ;;  %s475_s13 = smov %s477_s15 }
  0x99   :  { %12 = sbr.rel (!%p10_p5) target bundleno = 2 (0x2), region = 62 }

// kernel: _lambda_.17
= control target key start
LH: loop header
LB: loop body
LE: loop exit
PB: predicated region body
PF: predicated region fallthrough
CT: control target
= control target key end

     0   :  { %s719_s12 = smov 0   ;;  %s721_s13 = smov 0   ;;  %s764_s0 = inlined_call_operand.vmem [shape: bf16[4,8,64], index: 0, kind: input, shape index: {}]   ;;  %s765_s1 = inlined_call_operand.vmem [shape: bf16[4,64,512], index: 1, kind: input, shape index: {}]   ;;  %s766_s2 = inlined_call_operand.vmem [shape: f32[4,8,512], index: 2, kind: output, shape index: {0}]   ;;  %s767_s3 = inlined_call_operand.vmem [shape: f32[4,1,8,2], index: 3, kind: output, shape index: {1}]  }
   0x1   :  { %s723_s14 = smov 0  }
   0x2 LB: > { %s26_s15 = sadd.s32 1, %s692_s13  ;;  %p596_p0 = scmp.ge.s32.totalorder %s696_s14, 1  ;;  %s696_s14 = sphi %s723_s14, %s14_s14   ;;  %s692_s13 = sphi %s721_s13, %s769_s13   ;;  %s688_s12 = sphi %s719_s12, %s768_s12  }
   0x3   : > { %p28_p1 = scmp.ge.s32.totalorder %s26_s15, 4  ;;  %p172_p2 = scmp.lt.s32.totalorder %s696_s14, 5 }
   0x5   : > { %s771_s15 = smov (%p28_p1, %s26_s15), 0  ;;  %p173_p3 = pnand %p596_p0, %p172_p2 }
   0x6   : > { %p215_p4 = scmp.lt.s32.totalorder (!%p173_p3), %s688_s12, 3  ;;  %v698_v0 = vmov (!%p173_p3), 0   ;;  %vm344_vm0 = vcmask (!%p173_p3), 523264   ;;  %vm448_vm1 = vcmask (!%p173_p3), 7168   ;;  %vm450_vm2 = vcmask (!%p173_p3), 15360  }
   0x7   : > { %176 = sbr.rel (%p173_p3) target bundleno = 401 (0x191), region = 28  ;;  %380 = vmatprep.mubr.bf16.mxu0 (!%p173_p3), %v698_v0  ;;  %421 = vmatprep.mubr.bf16.mxu1 (!%p173_p3), %v698_v0 }
   0xe   : > { %s773_s12 = smov (!%p215_p4, %s688_s12), 3 }
   0xf   : > { %s623_s16 = sshll.u32 %s773_s12, 7  ;;  %s597_s20 = sshll.u32 %s773_s12, 2 }
  0x10   : > { %s227_s19 = scalar_lea.vmem %s765_s1, %s623_s16  ;;  %s218_s23 = scalar_lea.vmem %s764_s0, %s597_s20 }
  0x11   : > { %v650_v1 = vld [vmem:[%s227_s19 + $0x4] ss:$16 sps:$4 sm:$0xff]   ;;  %v652_v2 = vld [vmem:[%s227_s19 + $0xc] ss:$16 sps:$4 sm:$0xff]   ;;  %v654_v3 = vld [vmem:[%s227_s19] ss:$16 sps:$4 sm:$0xff]  }
  0x12   : > { %348 = vmatprep.subr.bf16.mxu0 %v650_v1  ;;  %v655_v4 = vld [vmem:[%s227_s19 + $0x8] ss:$16 sps:$4 sm:$0xff]   ;;  %389 = vmatprep.subr.bf16.mxu1 %v652_v2  ;;  %v656_v5 = vld [vmem:[%s227_s19 + $0x24] ss:$16 sps:$4 sm:$0xff]   ;;  %v658_v6 = vld [vmem:[%s227_s19 + $0x2c] ss:$16 sps:$4 sm:$0xff]  }
  0x13   : > { %349 = vmatpush1.bf16.msra.mxu0 %v654_v3  ;;  %390 = vmatpush1.bf16.msra.mxu1 %v655_v4  ;;  %v660_v7 = vld [vmem:[%s227_s19 + $0x20] ss:$16 sps:$4 sm:$0xff]   ;;  %v661_v8 = vld [vmem:[%s227_s19 + $0x28] ss:$16 sps:$4 sm:$0xff]   ;;  %v662_v9 = vld [vmem:[%s227_s19 + $0x44] ss:$16 sps:$4 sm:$0xff]  }
  0x14   : > { %350 = vmatprep.subr.bf16.mxu0 %v656_v5  ;;  %391 = vmatprep.subr.bf16.mxu1 %v658_v6  ;;  %v664_v10 = vld [vmem:[%s227_s19 + $0x4c] ss:$16 sps:$4 sm:$0xff]   ;;  %v666_v11 = vld [vmem:[%s227_s19 + $0x40] ss:$16 sps:$4 sm:$0xff]   ;;  %v667_v12 = vld [vmem:[%s227_s19 + $0x48] ss:$16 sps:$4 sm:$0xff]  }
  0x15   : > { %v668_v13 = vld [vmem:[%s227_s19 + $0x64] ss:$16 sps:$4 sm:$0xff]   ;;  %v670_v14 = vld [vmem:[%s227_s19 + $0x6c] ss:$16 sps:$4 sm:$0xff]   ;;  %v672_v15 = vld [vmem:[%s227_s19 + $0x60] ss:$16 sps:$4 sm:$0xff]  }
  0x16   : > { %v673_v16 = vld [vmem:[%s227_s19 + $0x68] ss:$16 sps:$4 sm:$0xff]   ;;  %v247_v17 = vld [vmem:[%s218_s23] sm:$0xf]  ;;  %s624_s24 = sshll.u32 %s773_s12, 5  ;;  %s602_s28 = sshll.u32 %s773_s12, 3 }
  0x17   : > { %351 = vmatpush1.bf16.msra.mxu0 %v660_v7  ;;  %392 = vmatpush1.bf16.msra.mxu1 %v661_v8  ;;  %s237_s27 = scalar_lea.vmem %s766_s2, %s624_s24  ;;  %s245_s4 = scalar_lea.vmem %s767_s3, %s602_s28 }
  0x18   : > { %352 = vmatprep.subr.bf16.mxu0 %v662_v9  ;;  %393 = vmatprep.subr.bf16.mxu1 %v664_v10 }
  0x1b   : > { %353 = vmatpush1.bf16.msra.mxu0 %v666_v11  ;;  %394 = vmatpush1.bf16.msra.mxu1 %v667_v12 }
  0x1c   : > { %354 = vmatprep.subr.bf16.mxu0 %v668_v13  ;;  %395 = vmatprep.subr.bf16.mxu1 %v670_v14 }
  0x1f   : > { %355 = vmatpush1.bf16.msra.mxu0 %v672_v15  ;;  %396 = vmatpush1.bf16.msra.mxu1 %v673_v16 }
  0x22   : > { %619 = vmatmul.mubr.msk.bf16.vlgmr.msra.gmra.mrb[0].mxu0 %vm344_vm0, %v247_v17  ;;  %620 = vmatmul.mubr.msk.bf16.vlgmr.msra.gmra.mrb[0].mxu1 %vm344_vm0, %v247_v17 }
  0xf5   : > { %v382_v18 = vpop.f32.mrb[0].mxu0  ;;  %v423_v19 = vpop.f32.mrb[0].mxu1 }
  0xf6   : > { %430 = vst [vmem:[%s237_s27] sm:$0xff] %v382_v18  ;;  %v439_v20 = vmul.f32 %v382_v18, %v382_v18  ;;  %432 = vst [vmem:[%s237_s27 + $0x10] sm:$0xff] %v423_v19  ;;  %v384_v21 = vpop.f32.mrb[1].mxu0  ;;  %v425_v22 = vpop.f32.mrb[1].mxu1  ;;  %v441_v23 = vmul.f32 %v423_v19, %v423_v19 }
  0xf7   : > { %431 = vst [vmem:[%s237_s27 + $0x8] sm:$0xff] %v384_v21  ;;  %v434_v24 = vadd.f32 %v384_v21, %v382_v18  ;;  %v440_v25 = vmul.f32 %v384_v21, %v384_v21  ;;  %433 = vst [vmem:[%s237_s27 + $0x18] sm:$0xff] %v425_v22  ;;  %v386_v26 = vpop.f32.mrb[2].mxu0  ;;  %v427_v27 = vpop.f32.mrb[2].mxu1  ;;  %v442_v33 = vmul.f32 %v425_v22, %v425_v22 }
  0xf8   : > { %v387_v28 = vpop.f32.mrb[3].mxu0  ;;  %v428_v29 = vpop.f32.mrb[3].mxu1 }
  0xf9   : > { %v435_v30 = vadd.f32 %v434_v24, %v423_v19  ;;  %v443_v31 = vadd.f32 %v440_v25, %v439_v20 }
  0xfb   : > { %v436_v32 = vadd.f32 %v435_v30, %v425_v22  ;;  %v444_v34 = vadd.f32 %v443_v31, %v441_v23 }
  0xfd   : > { %437 = vadd.xlane.f32.xlu0 %v436_v32  ;;  %v445_v35 = vadd.f32 %v444_v34, %v442_v33 }
 0x101   : > { %446 = vadd.xlane.f32.xlu0 %v445_v35 }
 0x18a   : > { %v438_v36 = vpop.xlane.xlu0 %437 }
 0x18e   : > { %v447_v37 = vpop.xlane.xlu0 %446 }
 0x18f   : > { %v449_v38 = vsel %vm448_vm1, %v438_v36, %v447_v37 }
 0x190   : > { %451 = vst.msk [vmem:[%s245_s4] sm:$0xff] %vm450_vm2, %v449_v38 }
 0x191 PF: > { %s14_s14 = sadd.s32 1, %s696_s14   ;;  %s768_s12 = smov %s692_s13 }
 0x192   : > { %p11_p5 = scmp.ge.s32.totalorder %s14_s14, 6   ;;  %s769_s13 = smov %s771_s15 }
 0x194   :  { %13 = sbr.rel (!%p11_p5) target bundleno = 2 (0x2), region = 73 }

// kernel: _lambda_.18
= control target key start
LH: loop header
LB: loop body
LE: loop exit
PB: predicated region body
PF: predicated region fallthrough
CT: control target
= control target key end

     0   :  { %s439_s12 = smov 0   ;;  %s441_s13 = smov 0   ;;  %s478_s0 = inlined_call_operand.vmem [shape: f32[4,8,512], index: 0, kind: input, shape index: {}]   ;;  %s479_s1 = inlined_call_operand.vmem [shape: f32[8,1], index: 1, kind: input, shape index: {}]   ;;  %s480_s2 = inlined_call_operand.vmem [shape: f32[8,1], index: 2, kind: input, shape index: {}]   ;;  %s481_s3 = inlined_call_operand.vmem [shape: bf16[4,8,512], index: 3, kind: output, shape index: {}]  }
   0x1   :  { %s443_s14 = smov 0  }
   0x2 LB: > { %s25_s15 = sadd.s32 1, %s412_s13  ;;  %p355_p0 = scmp.ge.s32.totalorder %s416_s14, 1  ;;  %s416_s14 = sphi %s443_s14, %s13_s14   ;;  %s412_s13 = sphi %s441_s13, %s483_s13   ;;  %s408_s12 = sphi %s439_s12, %s482_s12  }
   0x3   : > { %p27_p1 = scmp.ge.s32.totalorder %s25_s15, 4  ;;  %p158_p2 = scmp.lt.s32.totalorder %s416_s14, 5 }
   0x5   : > { %s485_s15 = smov (%p27_p1, %s25_s15), 0  ;;  %p159_p3 = pnand %p355_p0, %p158_p2 }
   0x6   : > { %v214_v0 = vld [vmem:[%s479_s1] sm:$0xff] (!%p159_p3)  ;;  %v418_v1 = vmov (!%p159_p3), 0   ;;  %p191_p4 = scmp.lt.s32.totalorder (!%p159_p3), %s408_s12, 3 }
   0x7   : > { %162 = sbr.rel (%p159_p3) target bundleno = 150 (0x96), region = 32  ;;  %393 = vset.pattern.permute.xlu0 (!%p159_p3), %v418_v1  ;;  %v224_v2 = vld [vmem:[%s480_s2] sm:$0xff] (!%p159_p3) }
   0x8   : > { %217 = vperm.xlu0 (!%p159_p3), %393, %v214_v0  }
   0xc   : > { %227 = vperm.xlu0 (!%p159_p3), %393, %v224_v2  }
   0xe   : > { %s487_s12 = smov (!%p191_p4, %s408_s12), 3 }
   0xf   : > { %s364_s20 = sshll.u32 %s487_s12, 5  ;;  %s365_s24 = sshll.u32 %s487_s12, 4 }
  0x10   : > { %s198_s23 = scalar_lea.vmem %s478_s0, %s364_s20  ;;  %s208_s27 = scalar_lea.vmem %s481_s3, %s365_s24 }
  0x11   : > { %v210_v3 = vld [vmem:[%s198_s23] sm:$0xff]  ;;  %v211_v5 = vld [vmem:[%s198_s23 + $0x8] sm:$0xff]  ;;  %v212_v6 = vld [vmem:[%s198_s23 + $0x10] sm:$0xff] }
  0x12   : > { %v213_v7 = vld [vmem:[%s198_s23 + $0x18] sm:$0xff] }
  0x87   : > { %v218_v4 = vpop.permute.xlu0 %217 }
  0x88   : > { %v220_v8 = vmul.f32 %v218_v4, %v210_v3  ;;  %v221_v9 = vmul.f32 %v218_v4, %v211_v5  ;;  %v222_v10 = vmul.f32 %v218_v4, %v212_v6  ;;  %v223_v11 = vmul.f32 %v218_v4, %v213_v7 }
  0x8b   : > { %v228_v12 = vpop.permute.xlu0 %227 }
  0x8c   : > { %v230_v13 = vadd.f32 %v228_v12, %v220_v8  ;;  %v231_v14 = vadd.f32 %v228_v12, %v221_v9  ;;  %v232_v15 = vadd.f32 %v228_v12, %v222_v10  ;;  %v233_v16 = vadd.f32 %v228_v12, %v223_v11 }
  0x8e   : > { %vm234_vm0 = vcmp.ge.f32.partialorder %v230_v13, 0.0  ;;  %vm235_vm1 = vcmp.ge.f32.partialorder %v231_v14, 0.0  ;;  %vm236_vm2 = vcmp.ge.f32.partialorder %v232_v15, 0.0  ;;  %vm237_vm3 = vcmp.ge.f32.partialorder %v233_v16, 0.0 }
  0x8f   : > { %v238_v17 = vmul.f32 0.2, %v230_v13  ;;  %v239_v18 = vmul.f32 0.2, %v231_v14  ;;  %v240_v19 = vmul.f32 0.2, %v232_v15 }
  0x90   : > { %v241_v20 = vmul.f32 0.2, %v233_v16 }
  0x91   : > { %v242_v21 = vsel %vm234_vm0, %v230_v13, %v238_v17  ;;  %v243_v22 = vsel %vm235_vm1, %v231_v14, %v239_v18  ;;  %v244_v23 = vsel %vm236_vm2, %v232_v15, %v240_v19 }
  0x92   : > { %v245_v24 = vsel %vm237_vm3, %v233_v16, %v241_v20  ;;  %v366_v25 = vpack.c.bf16 %v243_v22, %v242_v21 }
  0x93   : > { %v367_v26 = vpack.c.bf16 %v245_v24, %v244_v23 }
  0x94   : > { %262 = vst [vmem:[%s208_s27] sm:$0xff] %v366_v25 }
  0x95   : > { %263 = vst [vmem:[%s208_s27 + $0x8] sm:$0xff] %v367_v26 }
  0x96 PF: > { %s13_s14 = sadd.s32 1, %s416_s14   ;;  %s482_s12 = smov %s412_s13 }
  0x97   : > { %p10_p5 = scmp.ge.s32.totalorder %s13_s14, 6   ;;  %s483_s13 = smov %s485_s15 }
  0x99   :  { %12 = sbr.rel (!%p10_p5) target bundleno = 2 (0x2), region = 62 }

// kernel: _lambda_.19
= control target key start
LH: loop header
LB: loop body
LE: loop exit
PB: predicated region body
PF: predicated region fallthrough
CT: control target
= control target key end

     0   :  { %s1164_s12 = smov 0   ;;  %s1166_s13 = smov 0   ;;  %s1311_s0 = inlined_call_operand.vmem [shape: bf16[4,4,32], index: 0, kind: input, shape index: {}]   ;;  %s1312_s1 = inlined_call_operand.vmem [shape: bf16[4,32,2048], index: 1, kind: input, shape index: {}]   ;;  %s1313_s2 = inlined_call_operand.vmem [shape: f32[4,4,2048], index: 2, kind: output, shape index: {0}]   ;;  %s1314_s3 = inlined_call_operand.vmem [shape: f32[4,1,4,2], index: 3, kind: output, shape index: {1}]  }
   0x1   :  { %s1168_s14 = smov 0  }
   0x2 LB: > { %s26_s15 = sadd.s32 1, %s1137_s13  ;;  %p1043_p0 = scmp.ge.s32.totalorder %s1141_s14, 1  ;;  %s1141_s14 = sphi %s1168_s14, %s14_s14   ;;  %s1137_s13 = sphi %s1166_s13, %s1316_s13   ;;  %s1133_s12 = sphi %s1164_s12, %s1315_s12  }
   0x3   : > { %p28_p1 = scmp.ge.s32.totalorder %s26_s15, 4  ;;  %p172_p2 = scmp.lt.s32.totalorder %s1141_s14, 5 }
   0x5   : > { %s1318_s15 = smov (%p28_p1, %s26_s15), 0  ;;  %p173_p3 = pnand %p1043_p0, %p172_p2 }
   0x6   : > { %p215_p4 = scmp.lt.s32.totalorder (!%p173_p3), %s1133_s12, 3  ;;  %v1143_v0 = vmov (!%p173_p3), 0   ;;  %vm440_vm0 = vcmask (!%p173_p3), 261120   ;;  %vm812_vm1 = vcmask (!%p173_p3), 1043456   ;;  %vm895_vm2 = vcmask (!%p173_p3), 7168  }
   0x7   : > { %176 = sbr.rel (%p173_p3) target bundleno = 422 (0x1a6), region = 28  ;;  %476 = vmatprep.mubr.bf16.mxu0 (!%p173_p3), %v1143_v0  ;;  %517 = vmatprep.mubr.bf16.mxu1 (!%p173_p3), %v1143_v0  ;;  %vm897_vm3 = vcmask (!%p173_p3), 11264  }
   0xe   : > { %s1320_s12 = smov (!%p215_p4, %s1133_s12), 3 }
   0xf   : > { %s1092_s16 = sshll.u32 %s1320_s12, 8  ;;  %s1044_s20 = sshll.u32 %s1320_s12, 1 }
  0x10   : > { %s1190_s19 = scalar_lea.vmem %s1312_s1, %s1092_s16  ;;  %s218_s23 = scalar_lea.vmem %s1311_s0, %s1044_s20 }
  0x11   : > { %v248_v1 = vld [vmem:[%s1190_s19] sm:$0xff]  ;;  %v249_v3 = vld [vmem:[%s1190_s19 + $0x8] sm:$0xff]  ;;  %v250_v15 = vld [vmem:[%s1190_s19 + $0x10] sm:$0xff]  ;;  %s1093_s24 = sshll.u32 %s1320_s12, 6  ;;  %s1049_s28 = sshll.u32 %s1320_s12, 2 }
  0x12   : > { %v256_v2 = vld [vmem:[%s1190_s19 + $0x40] sm:$0xff]  ;;  %v257_v6 = vld [vmem:[%s1190_s19 + $0x48] sm:$0xff]  ;;  %v258_v16 = vld [vmem:[%s1190_s19 + $0x50] sm:$0xff]  ;;  %s1257_s27 = scalar_lea.vmem %s1313_s2, %s1093_s24  ;;  %s245_s4 = scalar_lea.vmem %s1314_s3, %s1049_s28 }
  0x13   : > { %v1051_v4 = vcombine.high %v248_v1, %v256_v2  ;;  %v1050_v5 = vcombine.low %v248_v1, %v256_v2  ;;  %v264_v7 = vld [vmem:[%s1190_s19 + $0x80] sm:$0xff]  ;;  %v1053_v9 = vcombine.high %v249_v3, %v257_v6  ;;  %v1052_v10 = vcombine.low %v249_v3, %v257_v6  ;;  %v265_v12 = vld [vmem:[%s1190_s19 + $0x88] sm:$0xff]  ;;  %v251_v17 = vld [vmem:[%s1190_s19 + $0x18] sm:$0xff] }
  0x14   : > { %v272_v8 = vld [vmem:[%s1190_s19 + $0xc0] sm:$0xff]  ;;  %v273_v13 = vld [vmem:[%s1190_s19 + $0xc8] sm:$0xff]  ;;  %v259_v19 = vld [vmem:[%s1190_s19 + $0x58] sm:$0xff]  ;;  %v1055_v21 = vcombine.high %v250_v15, %v258_v16  ;;  %v1054_v28 = vcombine.low %v250_v15, %v258_v16 }
  0x15   : > { %v1067_v11 = vcombine.high %v264_v7, %v272_v8  ;;  %444 = vmatprep.subr.bf16.mxu0 %v1051_v4  ;;  %v1069_v14 = vcombine.high %v265_v12, %v273_v13  ;;  %485 = vmatprep.subr.bf16.mxu1 %v1053_v9  ;;  %v1066_v18 = vcombine.low %v264_v7, %v272_v8  ;;  %v266_v23 = vld [vmem:[%s1190_s19 + $0x90] sm:$0xff]  ;;  %v267_v25 = vld [vmem:[%s1190_s19 + $0x98] sm:$0xff]  ;;  %v1212_v27 = vld [vmem:[%s218_s23] sm:$0x3] }
  0x16   : > { %445 = vmatpush1.bf16.msra.mxu0 %v1050_v5  ;;  %486 = vmatpush1.bf16.msra.mxu1 %v1052_v10  ;;  %v1068_v20 = vcombine.low %v265_v12, %v273_v13  ;;  %v1057_v22 = vcombine.high %v251_v17, %v259_v19  ;;  %v274_v24 = vld [vmem:[%s1190_s19 + $0xd0] sm:$0xff]  ;;  %v275_v26 = vld [vmem:[%s1190_s19 + $0xd8] sm:$0xff]  ;;  %v1056_v29 = vcombine.low %v251_v17, %v259_v19  ;;  %v252_v32 = vld [vmem:[%s1190_s19 + $0x20] sm:$0xff] }
  0x17   : > { %446 = vmatprep.subr.bf16.mxu0 %v1067_v11  ;;  %487 = vmatprep.subr.bf16.mxu1 %v1069_v14  ;;  %v1071_v30 = vcombine.high %v266_v23, %v274_v24  ;;  %v1073_v31 = vcombine.high %v267_v25, %v275_v26  ;;  %v260_v33 = vld [vmem:[%s1190_s19 + $0x60] sm:$0xff]  ;;  %v253_v34 = vld [vmem:[%s1190_s19 + $0x28] sm:$0xff]  ;;  %v1070_v36 = vcombine.low %v266_v23, %v274_v24  ;;  %v254_v48 = vld [vmem:[%s1190_s19 + $0x30] sm:$0xff] }
  0x18   : > { %v261_v35 = vld [vmem:[%s1190_s19 + $0x68] sm:$0xff]  ;;  %v1072_v37 = vcombine.low %v267_v25, %v275_v26  ;;  %v1059_v38 = vcombine.high %v252_v32, %v260_v33  ;;  %v268_v40 = vld [vmem:[%s1190_s19 + $0xa0] sm:$0xff]  ;;  %v1058_v44 = vcombine.low %v252_v32, %v260_v33  ;;  %v262_v49 = vld [vmem:[%s1190_s19 + $0x70] sm:$0xff] }
  0x19   : > { %v1061_v39 = vcombine.high %v253_v34, %v261_v35  ;;  %v276_v41 = vld [vmem:[%s1190_s19 + $0xe0] sm:$0xff]  ;;  %v269_v42 = vld [vmem:[%s1190_s19 + $0xa8] sm:$0xff]  ;;  %v1060_v45 = vcombine.low %v253_v34, %v261_v35  ;;  %v255_v50 = vld [vmem:[%s1190_s19 + $0x38] sm:$0xff]  ;;  %v1063_v54 = vcombine.high %v254_v48, %v262_v49  ;;  %v1062_v60 = vcombine.low %v254_v48, %v262_v49 }
  0x1a   : > { %447 = vmatpush1.bf16.msra.mxu0 %v1066_v18  ;;  %488 = vmatpush1.bf16.msra.mxu1 %v1068_v20  ;;  %v277_v43 = vld [vmem:[%s1190_s19 + $0xe8] sm:$0xff]  ;;  %v1075_v46 = vcombine.high %v268_v40, %v276_v41  ;;  %v263_v51 = vld [vmem:[%s1190_s19 + $0x78] sm:$0xff]  ;;  %v1074_v52 = vcombine.low %v268_v40, %v276_v41  ;;  %v270_v56 = vld [vmem:[%s1190_s19 + $0xb0] sm:$0xff] }
  0x1b   : > { %526 = vmatprep.subr.bf16.mxu0 %v1055_v21  ;;  %567 = vmatprep.subr.bf16.mxu1 %v1057_v22  ;;  %v1077_v47 = vcombine.high %v269_v42, %v277_v43  ;;  %v1076_v53 = vcombine.low %v269_v42, %v277_v43  ;;  %v1065_v55 = vcombine.high %v255_v50, %v263_v51  ;;  %v278_v57 = vld [vmem:[%s1190_s19 + $0xf0] sm:$0xff]  ;;  %v271_v58 = vld [vmem:[%s1190_s19 + $0xb8] sm:$0xff] }
  0x1c   : > { %v279_v59 = vld [vmem:[%s1190_s19 + $0xf8] sm:$0xff]  ;;  %v1064_v61 = vcombine.low %v255_v50, %v263_v51  ;;  %v1079_v62 = vcombine.high %v270_v56, %v278_v57  ;;  %v1078_v1 = vcombine.low %v270_v56, %v278_v57 }
  0x1d   : > { %1082 = vmatmul.mubr.msk.bf16.vlgmr.msra.gmra.mrb[0].mxu0 %vm440_vm0, %v1212_v27  ;;  %1083 = vmatmul.mubr.msk.bf16.vlgmr.msra.gmra.mrb[0].mxu1 %vm440_vm0, %v1212_v27  ;;  %v1081_v63 = vcombine.high %v271_v58, %v279_v59  ;;  %v1080_v2 = vcombine.low %v271_v58, %v279_v59 }
  0x1e   : > { %527 = vmatpush1.bf16.msra.mxu0 %v1054_v28  ;;  %568 = vmatpush1.bf16.msra.mxu1 %v1056_v29 }
  0x1f   : > { %528 = vmatprep.subr.bf16.mxu0 %v1071_v30  ;;  %569 = vmatprep.subr.bf16.mxu1 %v1073_v31 }
  0x20   : > { %558 = vmatprep.mubr.bf16.mxu0 %v1143_v0  ;;  %599 = vmatprep.mubr.bf16.mxu1 %v1143_v0 }
  0x22   : > { %529 = vmatpush1.bf16.msra.mxu0 %v1070_v36  ;;  %570 = vmatpush1.bf16.msra.mxu1 %v1072_v37 }
  0x23   : > { %608 = vmatprep.subr.bf16.mxu0 %v1059_v38  ;;  %649 = vmatprep.subr.bf16.mxu1 %v1061_v39 }
  0x25   : > { %1084 = vmatmul.mubr.msk.bf16.vlgmr.msra.gmra.mrb[4].mxu0 %vm440_vm0, %v1212_v27  ;;  %1085 = vmatmul.mubr.msk.bf16.vlgmr.msra.gmra.mrb[4].mxu1 %vm440_vm0, %v1212_v27 }
  0x26   : > { %609 = vmatpush1.bf16.msra.mxu0 %v1058_v44  ;;  %650 = vmatpush1.bf16.msra.mxu1 %v1060_v45 }
  0x27   : > { %610 = vmatprep.subr.bf16.mxu0 %v1075_v46  ;;  %651 = vmatprep.subr.bf16.mxu1 %v1077_v47 }
  0x28   : > { %640 = vmatprep.mubr.bf16.mxu0 %v1143_v0  ;;  %681 = vmatprep.mubr.bf16.mxu1 %v1143_v0 }
  0x2a   : > { %611 = vmatpush1.bf16.msra.mxu0 %v1074_v52  ;;  %652 = vmatpush1.bf16.msra.mxu1 %v1076_v53 }
  0x2b   : > { %690 = vmatprep.subr.bf16.mxu0 %v1063_v54  ;;  %731 = vmatprep.subr.bf16.mxu1 %v1065_v55 }
  0x2d   : > { %1086 = vmatmul.mubr.msk.bf16.vlgmr.msra.gmra.mrb[8].mxu0 %vm440_vm0, %v1212_v27  ;;  %1087 = vmatmul.mubr.msk.bf16.vlgmr.msra.gmra.mrb[8].mxu1 %vm440_vm0, %v1212_v27 }
  0x2e   : > { %691 = vmatpush1.bf16.msra.mxu0 %v1062_v60  ;;  %732 = vmatpush1.bf16.msra.mxu1 %v1064_v61 }
  0x2f   : > { %692 = vmatprep.subr.bf16.mxu0 %v1079_v62  ;;  %733 = vmatprep.subr.bf16.mxu1 %v1081_v63 }
  0x30   : > { %722 = vmatprep.mubr.bf16.mxu0 %v1143_v0  ;;  %763 = vmatprep.mubr.bf16.mxu1 %v1143_v0 }
  0x32   : > { %693 = vmatpush1.bf16.msra.mxu0 %v1078_v1  ;;  %734 = vmatpush1.bf16.msra.mxu1 %v1080_v2 }
  0x35   : > { %1088 = vmatmul.mubr.msk.bf16.vlgmr.msra.gmra.mrb[12].mxu0 %vm440_vm0, %v1212_v27  ;;  %1089 = vmatmul.mubr.msk.bf16.vlgmr.msra.gmra.mrb[12].mxu1 %vm440_vm0, %v1212_v27 }
  0xf0   : > { %v478_v3 = vpop.f32.mrb[0].mxu0  ;;  %v519_v6 = vpop.f32.mrb[0].mxu1 }
  0xf1   : > { %v813_v4 = vsel %vm812_vm1, %v478_v3, 0.0  ;;  %v846_v5 = vmul.f32 %v478_v3, %v478_v3  ;;  %v480_v0 = vpop.f32.mrb[1].mxu0  ;;  %v816_v11 = vsel %vm812_vm1, %v519_v6, 0.0  ;;  %v521_v12 = vpop.f32.mrb[1].mxu1  ;;  %v848_v15 = vmul.f32 %v519_v6, %v519_v6 }
  0xf2   : > { %v788_v7 = vcombine.low %v478_v3, %v480_v0  ;;  %v814_v8 = vsel %vm812_vm1, %v480_v0, 0.0  ;;  %v847_v9 = vmul.f32 %v480_v0, %v480_v0  ;;  %v482_v10 = vpop.f32.mrb[2].mxu0  ;;  %v789_v17 = vcombine.low %v519_v6, %v521_v12  ;;  %v523_v18 = vpop.f32.mrb[2].mxu1 }
  0xf3   : > { %v862_v13 = vsel %vm812_vm1, %v846_v5, 0.0  ;;  %v815_v14 = vadd.f32 %v814_v8, %v813_v4  ;;  %v483_v16 = vpop.f32.mrb[3].mxu0  ;;  %v818_v20 = vsel %vm812_vm1, %v521_v12, 0.0  ;;  %v849_v21 = vmul.f32 %v521_v12, %v521_v12  ;;  %v524_v22 = vpop.f32.mrb[3].mxu1 }
  0xf4   : > { %804 = vst [vmem:[%s1257_s27] sm:$0xff] %v788_v7  ;;  %v863_v19 = vsel %vm812_vm1, %v847_v9, 0.0  ;;  %v865_v25 = vsel %vm812_vm1, %v848_v15, 0.0  ;;  %805 = vst [vmem:[%s1257_s27 + $0x8] sm:$0xff] %v789_v17 }
  0xf5   : > { %v864_v23 = vadd.f32 %v863_v19, %v862_v13  ;;  %v817_v24 = vadd.f32 %v816_v11, %v815_v14  ;;  %v867_v26 = vsel %vm812_vm1, %v849_v21, 0.0 }
  0xf7   : > { %v866_v27 = vadd.f32 %v865_v25, %v864_v23  ;;  %v819_v28 = vadd.f32 %v818_v20, %v817_v24 }
  0xf8   : > { %v560_v29 = vpop.f32.mrb[4].mxu0  ;;  %v601_v34 = vpop.f32.mrb[4].mxu1 }
  0xf9   : > { %v868_v30 = vadd.f32 %v867_v26, %v866_v27  ;;  %v820_v31 = vsel %vm812_vm1, %v560_v29, 0.0  ;;  %v850_v32 = vmul.f32 %v560_v29, %v560_v29  ;;  %v562_v33 = vpop.f32.mrb[5].mxu0  ;;  %v603_v40 = vpop.f32.mrb[5].mxu1  ;;  %v824_v42 = vsel %vm812_vm1, %v601_v34, 0.0 }
  0xfa   : > { %v821_v35 = vadd.f32 %v820_v31, %v819_v28  ;;  %v790_v36 = vcombine.low %v560_v29, %v562_v33  ;;  %v822_v37 = vsel %vm812_vm1, %v562_v33, 0.0  ;;  %v851_v38 = vmul.f32 %v562_v33, %v562_v33  ;;  %v564_v39 = vpop.f32.mrb[6].mxu0  ;;  %v605_v46 = vpop.f32.mrb[6].mxu1 }
  0xfb   : > { %v869_v41 = vsel %vm812_vm1, %v850_v32, 0.0  ;;  %v852_v43 = vmul.f32 %v601_v34, %v601_v34  ;;  %v565_v44 = vpop.f32.mrb[7].mxu0  ;;  %v791_v45 = vcombine.low %v601_v34, %v603_v40  ;;  %v606_v50 = vpop.f32.mrb[7].mxu1  ;;  %v853_v52 = vmul.f32 %v603_v40, %v603_v40 }
  0xfc   : > { %v870_v47 = vadd.f32 %v869_v41, %v868_v30  ;;  %806 = vst [vmem:[%s1257_s27 + $0x10] sm:$0xff] %v790_v36  ;;  %v823_v48 = vadd.f32 %v822_v37, %v821_v35  ;;  %v871_v49 = vsel %vm812_vm1, %v851_v38, 0.0  ;;  %v826_v55 = vsel %vm812_vm1, %v603_v40, 0.0 }
  0xfd   : > { %v873_v51 = vsel %vm812_vm1, %v852_v43, 0.0  ;;  %807 = vst [vmem:[%s1257_s27 + $0x18] sm:$0xff] %v791_v45  ;;  %v875_v59 = vsel %vm812_vm1, %v853_v52, 0.0 }
  0xfe   : > { %v872_v53 = vadd.f32 %v871_v49, %v870_v47  ;;  %v825_v54 = vadd.f32 %v824_v42, %v823_v48 }
 0x100   : > { %v874_v56 = vadd.f32 %v873_v51, %v872_v53  ;;  %v827_v57 = vadd.f32 %v826_v55, %v825_v54  ;;  %v642_v58 = vpop.f32.mrb[8].mxu0  ;;  %v683_v63 = vpop.f32.mrb[8].mxu1 }
 0x101   : > { %v828_v60 = vsel %vm812_vm1, %v642_v58, 0.0  ;;  %v854_v61 = vmul.f32 %v642_v58, %v642_v58  ;;  %v644_v62 = vpop.f32.mrb[9].mxu0  ;;  %v685_v0 = vpop.f32.mrb[9].mxu1  ;;  %v832_v8 = vsel %vm812_vm1, %v683_v63, 0.0  ;;  %v856_v9 = vmul.f32 %v683_v63, %v683_v63 }
 0x102   : > { %v876_v1 = vadd.f32 %v875_v59, %v874_v56  ;;  %v829_v2 = vadd.f32 %v828_v60, %v827_v57  ;;  %v792_v3 = vcombine.low %v642_v58, %v644_v62  ;;  %v830_v4 = vsel %vm812_vm1, %v644_v62, 0.0  ;;  %v646_v5 = vpop.f32.mrb[10].mxu0  ;;  %v687_v11 = vpop.f32.mrb[10].mxu1 }
 0x103   : > { %v877_v6 = vsel %vm812_vm1, %v854_v61, 0.0  ;;  %v855_v7 = vmul.f32 %v644_v62, %v644_v62  ;;  %v647_v10 = vpop.f32.mrb[11].mxu0  ;;  %v793_v14 = vcombine.low %v683_v63, %v685_v0  ;;  %v688_v15 = vpop.f32.mrb[11].mxu1  ;;  %v881_v17 = vsel %vm812_vm1, %v856_v9, 0.0 }
 0x104   : > { %v878_v12 = vadd.f32 %v877_v6, %v876_v1  ;;  %808 = vst [vmem:[%s1257_s27 + $0x20] sm:$0xff] %v792_v3  ;;  %v831_v13 = vadd.f32 %v830_v4, %v829_v2  ;;  %v857_v18 = vmul.f32 %v685_v0, %v685_v0  ;;  %v834_v21 = vsel %vm812_vm1, %v685_v0, 0.0 }
 0x105   : > { %v879_v16 = vsel %vm812_vm1, %v855_v7, 0.0  ;;  %809 = vst [vmem:[%s1257_s27 + $0x28] sm:$0xff] %v793_v14 }
 0x106   : > { %v880_v19 = vadd.f32 %v879_v16, %v878_v12  ;;  %v833_v20 = vadd.f32 %v832_v8, %v831_v13  ;;  %v883_v25 = vsel %vm812_vm1, %v857_v18, 0.0 }
 0x108   : > { %v882_v22 = vadd.f32 %v881_v17, %v880_v19  ;;  %v835_v23 = vadd.f32 %v834_v21, %v833_v20  ;;  %v724_v24 = vpop.f32.mrb[12].mxu0  ;;  %v765_v29 = vpop.f32.mrb[12].mxu1 }
 0x109   : > { %v836_v26 = vsel %vm812_vm1, %v724_v24, 0.0  ;;  %v858_v27 = vmul.f32 %v724_v24, %v724_v24  ;;  %v726_v28 = vpop.f32.mrb[13].mxu0  ;;  %v767_v35 = vpop.f32.mrb[13].mxu1  ;;  %v860_v38 = vmul.f32 %v765_v29, %v765_v29  ;;  %v840_v45 = vsel %vm812_vm1, %v765_v29, 0.0 }
 0x10a   : > { %v884_v30 = vadd.f32 %v883_v25, %v882_v22  ;;  %v837_v31 = vadd.f32 %v836_v26, %v835_v23  ;;  %v794_v32 = vcombine.low %v724_v24, %v726_v28  ;;  %v838_v33 = vsel %vm812_vm1, %v726_v28, 0.0  ;;  %v728_v34 = vpop.f32.mrb[14].mxu0  ;;  %v769_v41 = vpop.f32.mrb[14].mxu1 }
 0x10b   : > { %v885_v36 = vsel %vm812_vm1, %v858_v27, 0.0  ;;  %v859_v37 = vmul.f32 %v726_v28, %v726_v28  ;;  %v729_v39 = vpop.f32.mrb[15].mxu0  ;;  %v795_v40 = vcombine.low %v765_v29, %v767_v35  ;;  %v770_v43 = vpop.f32.mrb[15].mxu1  ;;  %v861_v47 = vmul.f32 %v767_v35, %v767_v35 }
 0x10c   : > { %v886_v42 = vadd.f32 %v885_v36, %v884_v30  ;;  %810 = vst [vmem:[%s1257_s27 + $0x30] sm:$0xff] %v794_v32  ;;  %v839_v44 = vadd.f32 %v838_v33, %v837_v31  ;;  %v889_v48 = vsel %vm812_vm1, %v860_v38, 0.0  ;;  %v842_v51 = vsel %vm812_vm1, %v767_v35, 0.0 }
 0x10d   : > { %v887_v46 = vsel %vm812_vm1, %v859_v37, 0.0  ;;  %811 = vst [vmem:[%s1257_s27 + $0x38] sm:$0xff] %v795_v40  ;;  %v891_v54 = vsel %vm812_vm1, %v861_v47, 0.0 }
 0x10e   : > { %v841_v49 = vadd.f32 %v840_v45, %v839_v44  ;;  %v888_v50 = vadd.f32 %v887_v46, %v886_v42 }
 0x110   : > { %v843_v52 = vadd.f32 %v842_v51, %v841_v49  ;;  %v890_v53 = vadd.f32 %v889_v48, %v888_v50 }
 0x112   : > { %844 = vadd.xlane.f32.xlu0 %v843_v52  ;;  %v892_v55 = vadd.f32 %v891_v54, %v890_v53 }
 0x116   : > { %893 = vadd.xlane.f32.xlu0 %v892_v55 }
 0x19f   : > { %v845_v56 = vpop.xlane.xlu0 %844 }
 0x1a3   : > { %v894_v57 = vpop.xlane.xlu0 %893 }
 0x1a4   : > { %v896_v58 = vsel %vm895_vm2, %v845_v56, %v894_v57 }
 0x1a5   : > { %898 = vst.msk [vmem:[%s245_s4] sm:$0xf] %vm897_vm3, %v896_v58 }
 0x1a6 PF: > { %s14_s14 = sadd.s32 1, %s1141_s14   ;;  %s1315_s12 = smov %s1137_s13 }
 0x1a7   : > { %p11_p5 = scmp.ge.s32.totalorder %s14_s14, 6   ;;  %s1316_s13 = smov %s1318_s15 }
 0x1a9   :  { %13 = sbr.rel (!%p11_p5) target bundleno = 2 (0x2), region = 73 }

// kernel: _lambda_.20
= control target key start
LH: loop header
LB: loop body
LE: loop exit
PB: predicated region body
PF: predicated region fallthrough
CT: control target
= control target key end

     0   :  { %s599_s12 = smov 0   ;;  %s601_s13 = smov 0   ;;  %s650_s0 = inlined_call_operand.vmem [shape: f32[4,4,2048], index: 0, kind: input, shape index: {}]   ;;  %s651_s1 = inlined_call_operand.vmem [shape: f32[4,1], index: 1, kind: input, shape index: {}]   ;;  %s652_s2 = inlined_call_operand.vmem [shape: f32[4,1], index: 2, kind: input, shape index: {}]   ;;  %s653_s3 = inlined_call_operand.vmem [shape: bf16[4,4,2048], index: 3, kind: output, shape index: {}]  }
   0x1   :  { %s603_s14 = smov 0  }
   0x2 LB: > { %s25_s15 = sadd.s32 1, %s570_s13  ;;  %p507_p0 = scmp.ge.s32.totalorder %s574_s14, 1  ;;  %s574_s14 = sphi %s603_s14, %s13_s14   ;;  %s570_s13 = sphi %s601_s13, %s655_s13   ;;  %s566_s12 = sphi %s599_s12, %s654_s12  }
   0x3   : > { %p27_p1 = scmp.ge.s32.totalorder %s25_s15, 4  ;;  %p158_p2 = scmp.lt.s32.totalorder %s574_s14, 5 }
   0x5   : > { %s657_s15 = smov (%p27_p1, %s25_s15), 0  ;;  %p159_p3 = pnand %p507_p0, %p158_p2 }
   0x6   : > { %v218_v0 = vld [vmem:[%s651_s1] sm:$0xf] (!%p159_p3)  ;;  %v576_v1 = vmov (!%p159_p3), 0   ;;  %p191_p4 = scmp.lt.s32.totalorder (!%p159_p3), %s566_s12, 3  ;;  %v577_v3 = vmov (!%p159_p3), 839922192   ;;  %v226_v5 = vlaneseq (!%p159_p3) }
   0x7   : > { %162 = sbr.rel (%p159_p3) target bundleno = 161 (0xa1), region = 32  ;;  %551 = vset.pattern.permute.xlu0 (!%p159_p3), %v576_v1  ;;  %v239_v2 = vld [vmem:[%s652_s2] sm:$0xf] (!%p159_p3)  ;;  %v224_v4 = vunpack.c.l.s4 (!%p159_p3), %v577_v3  ;;  %v578_v9 = vmov (!%p159_p3), 1983009808  }
   0x8   : > { %221 = vperm.xlu0 (!%p159_p3), %551, %v218_v0   ;;  %v227_v7 = vshrl.u32 (!%p159_p3), %v226_v5, 7  ;;  %v343_v10 = vunpack.c.l.s4 (!%p159_p3), %v578_v9 }
   0x9   : > { %v225_v6 = vunpack.c.0.s8 (!%p159_p3), %v224_v4 }
   0xa   : > { %v344_v21 = vunpack.c.0.s8 (!%p159_p3), %v343_v10 }
   0xb   : > { %v228_v8 = vsub.s32 (!%p159_p3), %v225_v6, %v227_v7 }
   0xc   : > { %242 = vperm.xlu0 (!%p159_p3), %551, %v239_v2   ;;  %v347_v43 = vsub.s32 (!%p159_p3), %v344_v21, %v227_v7 }
   0xe   : > { %s659_s12 = smov (!%p191_p4, %s566_s12), 3 }
   0xf   : > { %s522_s20 = sshll.u32 %s659_s12, 6  ;;  %s523_s24 = sshll.u32 %s659_s12, 5 }
  0x10   : > { %s198_s23 = scalar_lea.vmem %s650_s0, %s522_s20  ;;  %s208_s27 = scalar_lea.vmem %s653_s3, %s523_s24 }
  0x11   : > { %v210_v12 = vld [vmem:[%s198_s23] sm:$0xff]  ;;  %v211_v13 = vld [vmem:[%s198_s23 + $0x8] sm:$0xff]  ;;  %v212_v15 = vld [vmem:[%s198_s23 + $0x10] sm:$0xff] }
  0x12   : > { %v213_v16 = vld [vmem:[%s198_s23 + $0x18] sm:$0xff]  ;;  %v214_v17 = vld [vmem:[%s198_s23 + $0x20] sm:$0xff]  ;;  %v215_v18 = vld [vmem:[%s198_s23 + $0x28] sm:$0xff] }
  0x13   : > { %v216_v19 = vld [vmem:[%s198_s23 + $0x30] sm:$0xff]  ;;  %v217_v20 = vld [vmem:[%s198_s23 + $0x38] sm:$0xff] }
  0x87   : > { %v222_v11 = vpop.permute.xlu0 %221 }
  0x88   : > { %v229_v14 = vrot.slane %v222_v11, %v228_v8 }
  0x8a   : > { %v231_v22 = vmul.f32 %v229_v14, %v210_v12  ;;  %v232_v24 = vmul.f32 %v229_v14, %v211_v13  ;;  %v233_v25 = vmul.f32 %v229_v14, %v212_v15  ;;  %v234_v26 = vmul.f32 %v229_v14, %v213_v16 }
  0x8b   : > { %v243_v23 = vpop.permute.xlu0 %242  ;;  %v235_v28 = vmul.f32 %v229_v14, %v214_v17  ;;  %v236_v29 = vmul.f32 %v229_v14, %v215_v18  ;;  %v237_v30 = vmul.f32 %v229_v14, %v216_v19  ;;  %v238_v31 = vmul.f32 %v229_v14, %v217_v20 }
  0x8c   : > { %v250_v27 = vrot.slane %v243_v23, %v228_v8 }
  0x8e   : > { %v252_v32 = vadd.f32 %v250_v27, %v231_v22  ;;  %v253_v33 = vadd.f32 %v250_v27, %v232_v24  ;;  %v254_v34 = vadd.f32 %v250_v27, %v233_v25  ;;  %v255_v35 = vadd.f32 %v250_v27, %v234_v26 }
  0x8f   : > { %v256_v36 = vadd.f32 %v250_v27, %v235_v28  ;;  %v257_v37 = vadd.f32 %v250_v27, %v236_v29  ;;  %v258_v38 = vadd.f32 %v250_v27, %v237_v30  ;;  %v259_v39 = vadd.f32 %v250_v27, %v238_v31 }
  0x90   : > { %vm260_vm0 = vcmp.ge.f32.partialorder %v252_v32, 0.0  ;;  %vm261_vm1 = vcmp.ge.f32.partialorder %v253_v33, 0.0  ;;  %vm262_vm2 = vcmp.ge.f32.partialorder %v254_v34, 0.0  ;;  %vm263_vm3 = vcmp.ge.f32.partialorder %v255_v35, 0.0 }
  0x91   : > { %vm264_vm4 = vcmp.ge.f32.partialorder %v256_v36, 0.0  ;;  %vm265_vm5 = vcmp.ge.f32.partialorder %v257_v37, 0.0  ;;  %vm266_vm6 = vcmp.ge.f32.partialorder %v258_v38, 0.0  ;;  %vm267_vm7 = vcmp.ge.f32.partialorder %v259_v39, 0.0 }
  0x92   : > { %v268_v40 = vmul.f32 0.2, %v252_v32  ;;  %v269_v41 = vmul.f32 0.2, %v253_v33  ;;  %v270_v42 = vmul.f32 0.2, %v254_v34 }
  0x93   : > { %v271_v44 = vmul.f32 0.2, %v255_v35  ;;  %v272_v45 = vmul.f32 0.2, %v256_v36  ;;  %v273_v46 = vmul.f32 0.2, %v257_v37 }
  0x94   : > { %v274_v47 = vmul.f32 0.2, %v258_v38  ;;  %v275_v48 = vmul.f32 0.2, %v259_v39  ;;  %v276_v49 = vsel %vm260_vm0, %v252_v32, %v268_v40  ;;  %v277_v50 = vsel %vm261_vm1, %v253_v33, %v269_v41 }
  0x95   : > { %v278_v51 = vsel %vm262_vm2, %v254_v34, %v270_v42  ;;  %v279_v52 = vsel %vm263_vm3, %v255_v35, %v271_v44  ;;  %v280_v53 = vsel %vm264_vm4, %v256_v36, %v272_v45  ;;  %v281_v54 = vsel %vm265_vm5, %v257_v37, %v273_v46 }
  0x96   : > { %v282_v55 = vsel %vm266_vm6, %v258_v38, %v274_v47  ;;  %v283_v56 = vsel %vm267_vm7, %v259_v39, %v275_v48  ;;  %v292_v57 = vcombine.high %v276_v49, %v276_v49  ;;  %v293_v58 = vcombine.high %v277_v50, %v277_v50 }
  0x97   : > { %v294_v59 = vcombine.high %v278_v51, %v278_v51  ;;  %v295_v60 = vcombine.high %v279_v52, %v279_v52  ;;  %v296_v61 = vcombine.high %v280_v53, %v280_v53  ;;  %v297_v62 = vcombine.high %v281_v54, %v281_v54 }
  0x98   : > { %v298_v63 = vcombine.high %v282_v55, %v282_v55  ;;  %v299_v0 = vcombine.high %v283_v56, %v283_v56  ;;  %v512_v1 = vpack.c.bf16 %v292_v57, %v276_v49  ;;  %v513_v2 = vpack.c.bf16 %v293_v58, %v277_v50 }
  0x99   : > { %v514_v3 = vpack.c.bf16 %v294_v59, %v278_v51  ;;  %v515_v4 = vpack.c.bf16 %v295_v60, %v279_v52  ;;  %v516_v5 = vpack.c.bf16 %v296_v61, %v280_v53  ;;  %v517_v6 = vpack.c.bf16 %v297_v62, %v281_v54 }
  0x9a   : > { %v348_v7 = vrot.slane %v512_v1, %v347_v43  ;;  %v355_v8 = vrot.slane %v513_v2, %v347_v43  ;;  %v518_v9 = vpack.c.bf16 %v298_v63, %v282_v55  ;;  %v519_v10 = vpack.c.bf16 %v299_v0, %v283_v56 }
  0x9b   : > { %v365_v11 = vrot.slane %v514_v3, %v347_v43  ;;  %v372_v12 = vrot.slane %v515_v4, %v347_v43  ;;  %v382_v13 = vrot.slane %v516_v5, %v347_v43  ;;  %v389_v14 = vrot.slane %v517_v6, %v347_v43 }
  0x9c   : > { %v356_v15 = vcombine.low %v348_v7, %v355_v8  ;;  %v399_v16 = vrot.slane %v518_v9, %v347_v43  ;;  %v406_v17 = vrot.slane %v519_v10, %v347_v43 }
  0x9d   : > { %v373_v18 = vcombine.low %v365_v11, %v372_v12  ;;  %v390_v19 = vcombine.low %v382_v13, %v389_v14 }
  0x9e   : > { %v407_v20 = vcombine.low %v399_v16, %v406_v17  ;;  %412 = vst [vmem:[%s208_s27] sm:$0xff] %v356_v15 }
  0x9f   : > { %413 = vst [vmem:[%s208_s27 + $0x8] sm:$0xff] %v373_v18  ;;  %414 = vst [vmem:[%s208_s27 + $0x10] sm:$0xff] %v390_v19 }
  0xa0   : > { %415 = vst [vmem:[%s208_s27 + $0x18] sm:$0xff] %v407_v20 }
  0xa1 PF: > { %s13_s14 = sadd.s32 1, %s574_s14   ;;  %s654_s12 = smov %s570_s13 }
  0xa2   : > { %p10_p5 = scmp.ge.s32.totalorder %s13_s14, 6   ;;  %s655_s13 = smov %s657_s15 }
  0xa4   :  { %12 = sbr.rel (!%p10_p5) target bundleno = 2 (0x2), region = 62 }

// kernel: _lambda_.21
= control target key start
LH: loop header
LB: loop body
LE: loop exit
PB: predicated region body
PF: predicated region fallthrough
CT: control target
= control target key end

     0   :  { %s2528_s9 = smov 0   ;;  %s2530_s10 = smov 0   ;;  %s2767_s0 = inlined_call_operand.vmem [shape: bf16[4,3,16], index: 0, kind: input, shape index: {}]   ;;  %s2768_s1 = inlined_call_operand.vmem [shape: bf16[4,16,8192], index: 1, kind: input, shape index: {}]   ;;  %s2769_s2 = inlined_call_operand.vmem [shape: f32[4,3,8192], index: 2, kind: output, shape index: {}]  }
   0x1   :  { %s2532_s11 = smov 0  }
   0x2 LB: > { %s24_s12 = sadd.s32 1, %s2506_s10  ;;  %p2229_p0 = scmp.ge.s32.totalorder %s2510_s11, 1  ;;  %s2510_s11 = sphi %s2532_s11, %s12_s11   ;;  %s2506_s10 = sphi %s2530_s10, %s2771_s10   ;;  %s2502_s9 = sphi %s2528_s9, %s2770_s9  }
   0x3   : > { %p26_p1 = scmp.ge.s32.totalorder %s24_s12, 4  ;;  %p142_p2 = scmp.lt.s32.totalorder %s2510_s11, 5 }
   0x5   : > { %s2773_s12 = smov (%p26_p1, %s24_s12), 0  ;;  %p143_p3 = pnand %p2229_p0, %p142_p2 }
   0x6   : > { %p176_p4 = scmp.lt.s32.totalorder (!%p143_p3), %s2502_s9, 3  ;;  %v2512_v0 = vmov (!%p143_p3), 0   ;;  %vm586_vm0 = vcmask (!%p143_p3), 130048  }
   0x7   : > { %146 = sbr.rel (%p143_p3) target bundleno = 374 (0x176), region = 28  ;;  %622 = vmatprep.mubr.bf16.mxu0 (!%p143_p3), %v2512_v0  ;;  %663 = vmatprep.mubr.bf16.mxu1 (!%p143_p3), %v2512_v0 }
   0xe   : > { %s2775_s9 = smov (!%p176_p4, %s2502_s9), 3 }
   0xf   : > { %s2333_s13 = sshll.u32 %s2775_s9, 9  ;;  %s2230_s14 = sshll.u32 %s2775_s9, 1 }
  0x10   : > { %s2555_s17 = scalar_lea.vmem %s2768_s1, %s2333_s13  ;;  %s179_s20 = scalar_lea.vmem %s2767_s0, %s2230_s14 }
  0x11   : > { %v202_v1 = vld [vmem:[%s2555_s17] sm:$0xff]  ;;  %v203_v3 = vld [vmem:[%s2555_s17 + $0x8] sm:$0xff]  ;;  %v204_v7 = vld [vmem:[%s2555_s17 + $0x10] sm:$0xff]  ;;  %s2334_s21 = sshll.u32 %s2775_s9, 8 }
  0x12   : > { %v234_v2 = vld [vmem:[%s2555_s17 + $0x100] sm:$0xff]  ;;  %v235_v5 = vld [vmem:[%s2555_s17 + $0x108] sm:$0xff]  ;;  %v236_v10 = vld [vmem:[%s2555_s17 + $0x110] sm:$0xff]  ;;  %s2724_s24 = scalar_lea.vmem %s2769_s2, %s2334_s21 }
  0x13   : > { %v2236_v4 = vcombine.high %v202_v1, %v234_v2  ;;  %v2235_v6 = vcombine.low %v202_v1, %v234_v2  ;;  %v2238_v8 = vcombine.high %v203_v3, %v235_v5  ;;  %v2237_v9 = vcombine.low %v203_v3, %v235_v5  ;;  %v205_v11 = vld [vmem:[%s2555_s17 + $0x18] sm:$0xff]  ;;  %v206_v15 = vld [vmem:[%s2555_s17 + $0x20] sm:$0xff]  ;;  %v207_v19 = vld [vmem:[%s2555_s17 + $0x28] sm:$0xff] }
  0x14   : > { %v237_v12 = vld [vmem:[%s2555_s17 + $0x118] sm:$0xff]  ;;  %v2240_v13 = vcombine.high %v204_v7, %v236_v10  ;;  %v238_v16 = vld [vmem:[%s2555_s17 + $0x120] sm:$0xff]  ;;  %v2239_v18 = vcombine.low %v204_v7, %v236_v10  ;;  %v239_v20 = vld [vmem:[%s2555_s17 + $0x128] sm:$0xff] }
  0x15   : > { %590 = vmatprep.subr.bf16.mxu0 %v2236_v4  ;;  %v2242_v14 = vcombine.high %v205_v11, %v237_v12  ;;  %631 = vmatprep.subr.bf16.mxu1 %v2238_v8  ;;  %v2570_v17 = vld [vmem:[%s179_s20] sm:$0x3]  ;;  %v2241_v21 = vcombine.low %v205_v11, %v237_v12  ;;  %v2244_v22 = vcombine.high %v206_v15, %v238_v16  ;;  %v208_v24 = vld [vmem:[%s2555_s17 + $0x30] sm:$0xff]  ;;  %v209_v27 = vld [vmem:[%s2555_s17 + $0x38] sm:$0xff] }
  0x16   : > { %591 = vmatpush1.bf16.msra.mxu0 %v2235_v6  ;;  %632 = vmatpush1.bf16.msra.mxu1 %v2237_v9  ;;  %v2246_v23 = vcombine.high %v207_v19, %v239_v20  ;;  %v240_v25 = vld [vmem:[%s2555_s17 + $0x130] sm:$0xff]  ;;  %v2243_v26 = vcombine.low %v206_v15, %v238_v16  ;;  %v241_v28 = vld [vmem:[%s2555_s17 + $0x138] sm:$0xff]  ;;  %v2245_v29 = vcombine.low %v207_v19, %v239_v20  ;;  %v210_v32 = vld [vmem:[%s2555_s17 + $0x40] sm:$0xff] }
  0x17   : > { %672 = vmatprep.subr.bf16.mxu0 %v2240_v13  ;;  %713 = vmatprep.subr.bf16.mxu1 %v2242_v14  ;;  %v2248_v30 = vcombine.high %v208_v24, %v240_v25  ;;  %v2250_v31 = vcombine.high %v209_v27, %v241_v28  ;;  %v242_v33 = vld [vmem:[%s2555_s17 + $0x140] sm:$0xff]  ;;  %v2247_v34 = vcombine.low %v208_v24, %v240_v25  ;;  %v211_v35 = vld [vmem:[%s2555_s17 + $0x48] sm:$0xff]  ;;  %v212_v40 = vld [vmem:[%s2555_s17 + $0x50] sm:$0xff] }
  0x18   : > { %v243_v36 = vld [vmem:[%s2555_s17 + $0x148] sm:$0xff]  ;;  %v2249_v37 = vcombine.low %v209_v27, %v241_v28  ;;  %v2252_v38 = vcombine.high %v210_v32, %v242_v33  ;;  %v244_v41 = vld [vmem:[%s2555_s17 + $0x150] sm:$0xff]  ;;  %v2251_v42 = vcombine.low %v210_v32, %v242_v33  ;;  %v213_v43 = vld [vmem:[%s2555_s17 + $0x58] sm:$0xff] }
  0x19   : > { %2299 = vmatmul.mubr.msk.bf16.vlgmr.msra.gmra.mrb[0].mxu0 %vm586_vm0, %v2570_v17  ;;  %2300 = vmatmul.mubr.msk.bf16.vlgmr.msra.gmra.mrb[0].mxu1 %vm586_vm0, %v2570_v17  ;;  %v2254_v39 = vcombine.high %v211_v35, %v243_v36  ;;  %v245_v44 = vld [vmem:[%s2555_s17 + $0x158] sm:$0xff]  ;;  %v2253_v45 = vcombine.low %v211_v35, %v243_v36  ;;  %v2256_v46 = vcombine.high %v212_v40, %v244_v41  ;;  %v214_v48 = vld [vmem:[%s2555_s17 + $0x60] sm:$0xff]  ;;  %v215_v51 = vld [vmem:[%s2555_s17 + $0x68] sm:$0xff] }
  0x1a   : > { %673 = vmatpush1.bf16.msra.mxu0 %v2239_v18  ;;  %714 = vmatpush1.bf16.msra.mxu1 %v2241_v21  ;;  %v2258_v47 = vcombine.high %v213_v43, %v245_v44  ;;  %v246_v49 = vld [vmem:[%s2555_s17 + $0x160] sm:$0xff]  ;;  %v2255_v50 = vcombine.low %v212_v40, %v244_v41  ;;  %v247_v52 = vld [vmem:[%s2555_s17 + $0x168] sm:$0xff]  ;;  %v2257_v53 = vcombine.low %v213_v43, %v245_v44  ;;  %v216_v56 = vld [vmem:[%s2555_s17 + $0x70] sm:$0xff] }
  0x1b   : > { %704 = vmatprep.mubr.bf16.mxu0 %v2512_v0  ;;  %745 = vmatprep.mubr.bf16.mxu1 %v2512_v0  ;;  %v2260_v54 = vcombine.high %v214_v48, %v246_v49  ;;  %v2262_v55 = vcombine.high %v215_v51, %v247_v52  ;;  %v248_v57 = vld [vmem:[%s2555_s17 + $0x170] sm:$0xff]  ;;  %v2259_v58 = vcombine.low %v214_v48, %v246_v49  ;;  %v217_v59 = vld [vmem:[%s2555_s17 + $0x78] sm:$0xff]  ;;  %v218_v1 = vld [vmem:[%s2555_s17 + $0x80] sm:$0xff] }
  0x1c   : > { %754 = vmatprep.subr.bf16.mxu0 %v2244_v22  ;;  %795 = vmatprep.subr.bf16.mxu1 %v2246_v23  ;;  %v249_v60 = vld [vmem:[%s2555_s17 + $0x178] sm:$0xff]  ;;  %v2261_v61 = vcombine.low %v215_v51, %v247_v52  ;;  %v2264_v62 = vcombine.high %v216_v56, %v248_v57  ;;  %v250_v2 = vld [vmem:[%s2555_s17 + $0x180] sm:$0xff]  ;;  %v2263_v3 = vcombine.low %v216_v56, %v248_v57  ;;  %v219_v4 = vld [vmem:[%s2555_s17 + $0x88] sm:$0xff] }
  0x1d   : > { %v2266_v63 = vcombine.high %v217_v59, %v249_v60  ;;  %v251_v5 = vld [vmem:[%s2555_s17 + $0x188] sm:$0xff]  ;;  %v2265_v6 = vcombine.low %v217_v59, %v249_v60  ;;  %v2268_v7 = vcombine.high %v218_v1, %v250_v2  ;;  %v220_v9 = vld [vmem:[%s2555_s17 + $0x90] sm:$0xff]  ;;  %v2267_v11 = vcombine.low %v218_v1, %v250_v2  ;;  %v221_v12 = vld [vmem:[%s2555_s17 + $0x98] sm:$0xff] }
  0x1e   : > { %v2270_v8 = vcombine.high %v219_v4, %v251_v5  ;;  %v252_v10 = vld [vmem:[%s2555_s17 + $0x190] sm:$0xff]  ;;  %v253_v13 = vld [vmem:[%s2555_s17 + $0x198] sm:$0xff]  ;;  %v2269_v14 = vcombine.low %v219_v4, %v251_v5  ;;  %v222_v18 = vld [vmem:[%s2555_s17 + $0xa0] sm:$0xff] }
  0x1f   : > { %v2272_v15 = vcombine.high %v220_v9, %v252_v10  ;;  %v2274_v16 = vcombine.high %v221_v12, %v253_v13  ;;  %v254_v19 = vld [vmem:[%s2555_s17 + $0x1a0] sm:$0xff]  ;;  %v2271_v20 = vcombine.low %v220_v9, %v252_v10  ;;  %v223_v21 = vld [vmem:[%s2555_s17 + $0xa8] sm:$0xff]  ;;  %v2273_v23 = vcombine.low %v221_v12, %v253_v13  ;;  %v256_v27 = vld [vmem:[%s2555_s17 + $0x1b0] sm:$0xff] }
  0x20   : > { %v255_v22 = vld [vmem:[%s2555_s17 + $0x1a8] sm:$0xff]  ;;  %v2276_v24 = vcombine.high %v222_v18, %v254_v19  ;;  %v2275_v28 = vcombine.low %v222_v18, %v254_v19  ;;  %v258_v35 = vld [vmem:[%s2555_s17 + $0x1c0] sm:$0xff]  ;;  %v260_v43 = vld [vmem:[%s2555_s17 + $0x1d0] sm:$0xff] }
  0x21   : > { %2301 = vmatmul.mubr.msk.bf16.vlgmr.msra.gmra.mrb[4].mxu0 %vm586_vm0, %v2570_v17  ;;  %2302 = vmatmul.mubr.msk.bf16.vlgmr.msra.gmra.mrb[4].mxu1 %vm586_vm0, %v2570_v17  ;;  %v2278_v25 = vcombine.high %v223_v21, %v255_v22  ;;  %v262_v51 = vld [vmem:[%s2555_s17 + $0x1e0] sm:$0xff]  ;;  %v264_v59 = vld [vmem:[%s2555_s17 + $0x1f0] sm:$0xff] }
  0x22   : > { %755 = vmatpush1.bf16.msra.mxu0 %v2243_v26  ;;  %796 = vmatpush1.bf16.msra.mxu1 %v2245_v29  ;;  %v224_v26 = vld [vmem:[%s2555_s17 + $0xb0] sm:$0xff]  ;;  %v225_v29 = vld [vmem:[%s2555_s17 + $0xb8] sm:$0xff] }
  0x23   : > { %786 = vmatprep.mubr.bf16.mxu0 %v2512_v0  ;;  %827 = vmatprep.mubr.bf16.mxu1 %v2512_v0  ;;  %v2280_v32 = vcombine.high %v224_v26, %v256_v27  ;;  %v2279_v36 = vcombine.low %v224_v26, %v256_v27 }
  0x24   : > { %836 = vmatprep.subr.bf16.mxu0 %v2248_v30  ;;  %877 = vmatprep.subr.bf16.mxu1 %v2250_v31  ;;  %v257_v30 = vld [vmem:[%s2555_s17 + $0x1b8] sm:$0xff]  ;;  %v2277_v31 = vcombine.low %v223_v21, %v255_v22 }
  0x25   : > { %v2282_v33 = vcombine.high %v225_v29, %v257_v30 }
  0x29   : > { %2303 = vmatmul.mubr.msk.bf16.vlgmr.msra.gmra.mrb[8].mxu0 %vm586_vm0, %v2570_v17  ;;  %2304 = vmatmul.mubr.msk.bf16.vlgmr.msra.gmra.mrb[8].mxu1 %vm586_vm0, %v2570_v17 }
  0x2a   : > { %837 = vmatpush1.bf16.msra.mxu0 %v2247_v34  ;;  %878 = vmatpush1.bf16.msra.mxu1 %v2249_v37  ;;  %v226_v34 = vld [vmem:[%s2555_s17 + $0xc0] sm:$0xff]  ;;  %v227_v37 = vld [vmem:[%s2555_s17 + $0xc8] sm:$0xff] }
  0x2b   : > { %868 = vmatprep.mubr.bf16.mxu0 %v2512_v0  ;;  %909 = vmatprep.mubr.bf16.mxu1 %v2512_v0  ;;  %v2284_v40 = vcombine.high %v226_v34, %v258_v35  ;;  %v2283_v44 = vcombine.low %v226_v34, %v258_v35 }
  0x2c   : > { %918 = vmatprep.subr.bf16.mxu0 %v2252_v38  ;;  %959 = vmatprep.subr.bf16.mxu1 %v2254_v39  ;;  %v259_v38 = vld [vmem:[%s2555_s17 + $0x1c8] sm:$0xff]  ;;  %v2281_v39 = vcombine.low %v225_v29, %v257_v30 }
  0x2d   : > { %v2286_v41 = vcombine.high %v227_v37, %v259_v38 }
  0x31   : > { %2305 = vmatmul.mubr.msk.bf16.vlgmr.msra.gmra.mrb[12].mxu0 %vm586_vm0, %v2570_v17  ;;  %2306 = vmatmul.mubr.msk.bf16.vlgmr.msra.gmra.mrb[12].mxu1 %vm586_vm0, %v2570_v17 }
  0x32   : > { %919 = vmatpush1.bf16.msra.mxu0 %v2251_v42  ;;  %960 = vmatpush1.bf16.msra.mxu1 %v2253_v45  ;;  %v228_v42 = vld [vmem:[%s2555_s17 + $0xd0] sm:$0xff]  ;;  %v229_v45 = vld [vmem:[%s2555_s17 + $0xd8] sm:$0xff] }
  0x33   : > { %950 = vmatprep.mubr.bf16.mxu0 %v2512_v0  ;;  %991 = vmatprep.mubr.bf16.mxu1 %v2512_v0  ;;  %v2288_v48 = vcombine.high %v228_v42, %v260_v43  ;;  %v2287_v52 = vcombine.low %v228_v42, %v260_v43 }
  0x34   : > { %1000 = vmatprep.subr.bf16.mxu0 %v2256_v46  ;;  %1041 = vmatprep.subr.bf16.mxu1 %v2258_v47  ;;  %v261_v46 = vld [vmem:[%s2555_s17 + $0x1d8] sm:$0xff]  ;;  %v2285_v47 = vcombine.low %v227_v37, %v259_v38 }
  0x35   : > { %v2290_v49 = vcombine.high %v229_v45, %v261_v46 }
  0x39   : > { %2307 = vmatmul.mubr.msk.bf16.vlgmr.msra.gmra.mrb[16].mxu0 %vm586_vm0, %v2570_v17  ;;  %2308 = vmatmul.mubr.msk.bf16.vlgmr.msra.gmra.mrb[16].mxu1 %vm586_vm0, %v2570_v17 }
  0x3a   : > { %1001 = vmatpush1.bf16.msra.mxu0 %v2255_v50  ;;  %1042 = vmatpush1.bf16.msra.mxu1 %v2257_v53  ;;  %v230_v50 = vld [vmem:[%s2555_s17 + $0xe0] sm:$0xff]  ;;  %v231_v53 = vld [vmem:[%s2555_s17 + $0xe8] sm:$0xff] }
  0x3b   : > { %1032 = vmatprep.mubr.bf16.mxu0 %v2512_v0  ;;  %1073 = vmatprep.mubr.bf16.mxu1 %v2512_v0  ;;  %v2292_v56 = vcombine.high %v230_v50, %v262_v51  ;;  %v2291_v60 = vcombine.low %v230_v50, %v262_v51 }
  0x3c   : > { %1082 = vmatprep.subr.bf16.mxu0 %v2260_v54  ;;  %1123 = vmatprep.subr.bf16.mxu1 %v2262_v55  ;;  %v263_v54 = vld [vmem:[%s2555_s17 + $0x1e8] sm:$0xff]  ;;  %v2289_v55 = vcombine.low %v229_v45, %v261_v46 }
  0x3d   : > { %v2294_v57 = vcombine.high %v231_v53, %v263_v54 }
  0x41   : > { %2309 = vmatmul.mubr.msk.bf16.vlgmr.msra.gmra.mrb[20].mxu0 %vm586_vm0, %v2570_v17  ;;  %2310 = vmatmul.mubr.msk.bf16.vlgmr.msra.gmra.mrb[20].mxu1 %vm586_vm0, %v2570_v17 }
  0x42   : > { %1083 = vmatpush1.bf16.msra.mxu0 %v2259_v58  ;;  %1124 = vmatpush1.bf16.msra.mxu1 %v2261_v61  ;;  %v232_v58 = vld [vmem:[%s2555_s17 + $0xf0] sm:$0xff]  ;;  %v233_v61 = vld [vmem:[%s2555_s17 + $0xf8] sm:$0xff] }
  0x43   : > { %1114 = vmatprep.mubr.bf16.mxu0 %v2512_v0  ;;  %1155 = vmatprep.mubr.bf16.mxu1 %v2512_v0  ;;  %v2296_v1 = vcombine.high %v232_v58, %v264_v59 }
  0x44   : > { %1164 = vmatprep.subr.bf16.mxu0 %v2264_v62  ;;  %1205 = vmatprep.subr.bf16.mxu1 %v2266_v63  ;;  %v265_v62 = vld [vmem:[%s2555_s17 + $0x1f8] sm:$0xff]  ;;  %v2293_v63 = vcombine.low %v231_v53, %v263_v54 }
  0x45   : > { %v2298_v2 = vcombine.high %v233_v61, %v265_v62  ;;  %v2297_v4 = vcombine.low %v233_v61, %v265_v62 }
  0x49   : > { %2311 = vmatmul.mubr.msk.bf16.vlgmr.msra.gmra.mrb[24].mxu0 %vm586_vm0, %v2570_v17  ;;  %2312 = vmatmul.mubr.msk.bf16.vlgmr.msra.gmra.mrb[24].mxu1 %vm586_vm0, %v2570_v17 }
  0x4a   : > { %1165 = vmatpush1.bf16.msra.mxu0 %v2263_v3  ;;  %1206 = vmatpush1.bf16.msra.mxu1 %v2265_v6  ;;  %v2295_v3 = vcombine.low %v232_v58, %v264_v59 }
  0x4b   : > { %1196 = vmatprep.mubr.bf16.mxu0 %v2512_v0  ;;  %1237 = vmatprep.mubr.bf16.mxu1 %v2512_v0 }
  0x4c   : > { %1246 = vmatprep.subr.bf16.mxu0 %v2268_v7  ;;  %1287 = vmatprep.subr.bf16.mxu1 %v2270_v8 }
  0x51   : > { %2313 = vmatmul.mubr.msk.bf16.vlgmr.msra.gmra.mrb[28].mxu0 %vm586_vm0, %v2570_v17  ;;  %2314 = vmatmul.mubr.msk.bf16.vlgmr.msra.gmra.mrb[28].mxu1 %vm586_vm0, %v2570_v17 }
  0x52   : > { %1247 = vmatpush1.bf16.msra.mxu0 %v2267_v11  ;;  %1288 = vmatpush1.bf16.msra.mxu1 %v2269_v14 }
  0x53   : > { %1278 = vmatprep.mubr.bf16.mxu0 %v2512_v0  ;;  %1319 = vmatprep.mubr.bf16.mxu1 %v2512_v0 }
  0x54   : > { %1328 = vmatprep.subr.bf16.mxu0 %v2272_v15  ;;  %1369 = vmatprep.subr.bf16.mxu1 %v2274_v16 }
  0x59   : > { %2315 = vmatmul.mubr.msk.bf16.vlgmr.msra.gmra.mrb[32].mxu0 %vm586_vm0, %v2570_v17  ;;  %2316 = vmatmul.mubr.msk.bf16.vlgmr.msra.gmra.mrb[32].mxu1 %vm586_vm0, %v2570_v17 }
  0x5a   : > { %1329 = vmatpush1.bf16.msra.mxu0 %v2271_v20  ;;  %1370 = vmatpush1.bf16.msra.mxu1 %v2273_v23 }
  0x5b   : > { %1360 = vmatprep.mubr.bf16.mxu0 %v2512_v0  ;;  %1401 = vmatprep.mubr.bf16.mxu1 %v2512_v0 }
  0x5c   : > { %1410 = vmatprep.subr.bf16.mxu0 %v2276_v24  ;;  %1451 = vmatprep.subr.bf16.mxu1 %v2278_v25 }
  0x61   : > { %2317 = vmatmul.mubr.msk.bf16.vlgmr.msra.gmra.mrb[36].mxu0 %vm586_vm0, %v2570_v17  ;;  %2318 = vmatmul.mubr.msk.bf16.vlgmr.msra.gmra.mrb[36].mxu1 %vm586_vm0, %v2570_v17 }
  0x62   : > { %1411 = vmatpush1.bf16.msra.mxu0 %v2275_v28  ;;  %1452 = vmatpush1.bf16.msra.mxu1 %v2277_v31 }
  0x63   : > { %1442 = vmatprep.mubr.bf16.mxu0 %v2512_v0  ;;  %1483 = vmatprep.mubr.bf16.mxu1 %v2512_v0 }
  0x64   : > { %1492 = vmatprep.subr.bf16.mxu0 %v2280_v32  ;;  %1533 = vmatprep.subr.bf16.mxu1 %v2282_v33 }
  0x69   : > { %2319 = vmatmul.mubr.msk.bf16.vlgmr.msra.gmra.mrb[40].mxu0 %vm586_vm0, %v2570_v17  ;;  %2320 = vmatmul.mubr.msk.bf16.vlgmr.msra.gmra.mrb[40].mxu1 %vm586_vm0, %v2570_v17 }
  0x6a   : > { %1493 = vmatpush1.bf16.msra.mxu0 %v2279_v36  ;;  %1534 = vmatpush1.bf16.msra.mxu1 %v2281_v39 }
  0x6b   : > { %1524 = vmatprep.mubr.bf16.mxu0 %v2512_v0  ;;  %1565 = vmatprep.mubr.bf16.mxu1 %v2512_v0 }
  0x6c   : > { %1574 = vmatprep.subr.bf16.mxu0 %v2284_v40  ;;  %1615 = vmatprep.subr.bf16.mxu1 %v2286_v41 }
  0x71   : > { %2321 = vmatmul.mubr.msk.bf16.vlgmr.msra.gmra.mrb[44].mxu0 %vm586_vm0, %v2570_v17  ;;  %2322 = vmatmul.mubr.msk.bf16.vlgmr.msra.gmra.mrb[44].mxu1 %vm586_vm0, %v2570_v17 }
  0x72   : > { %1575 = vmatpush1.bf16.msra.mxu0 %v2283_v44  ;;  %1616 = vmatpush1.bf16.msra.mxu1 %v2285_v47 }
  0x73   : > { %1606 = vmatprep.mubr.bf16.mxu0 %v2512_v0  ;;  %1647 = vmatprep.mubr.bf16.mxu1 %v2512_v0 }
  0x74   : > { %1656 = vmatprep.subr.bf16.mxu0 %v2288_v48  ;;  %1697 = vmatprep.subr.bf16.mxu1 %v2290_v49 }
  0x79   : > { %2323 = vmatmul.mubr.msk.bf16.vlgmr.msra.gmra.mrb[48].mxu0 %vm586_vm0, %v2570_v17  ;;  %2324 = vmatmul.mubr.msk.bf16.vlgmr.msra.gmra.mrb[48].mxu1 %vm586_vm0, %v2570_v17 }
  0x7a   : > { %1657 = vmatpush1.bf16.msra.mxu0 %v2287_v52  ;;  %1698 = vmatpush1.bf16.msra.mxu1 %v2289_v55 }
  0x7b   : > { %1688 = vmatprep.mubr.bf16.mxu0 %v2512_v0  ;;  %1729 = vmatprep.mubr.bf16.mxu1 %v2512_v0 }
  0x7c   : > { %1738 = vmatprep.subr.bf16.mxu0 %v2292_v56  ;;  %1779 = vmatprep.subr.bf16.mxu1 %v2294_v57 }
  0x81   : > { %2325 = vmatmul.mubr.msk.bf16.vlgmr.msra.gmra.mrb[52].mxu0 %vm586_vm0, %v2570_v17  ;;  %2326 = vmatmul.mubr.msk.bf16.vlgmr.msra.gmra.mrb[52].mxu1 %vm586_vm0, %v2570_v17 }
  0x82   : > { %1739 = vmatpush1.bf16.msra.mxu0 %v2291_v60  ;;  %1780 = vmatpush1.bf16.msra.mxu1 %v2293_v63 }
  0x83   : > { %1770 = vmatprep.mubr.bf16.mxu0 %v2512_v0  ;;  %1811 = vmatprep.mubr.bf16.mxu1 %v2512_v0 }
  0x84   : > { %1820 = vmatprep.subr.bf16.mxu0 %v2296_v1  ;;  %1861 = vmatprep.subr.bf16.mxu1 %v2298_v2 }
  0x89   : > { %2327 = vmatmul.mubr.msk.bf16.vlgmr.msra.gmra.mrb[56].mxu0 %vm586_vm0, %v2570_v17  ;;  %2328 = vmatmul.mubr.msk.bf16.vlgmr.msra.gmra.mrb[56].mxu1 %vm586_vm0, %v2570_v17 }
  0x8a   : > { %1821 = vmatpush1.bf16.msra.mxu0 %v2295_v3  ;;  %1862 = vmatpush1.bf16.msra.mxu1 %v2297_v4 }
  0x8b   : > { %1852 = vmatprep.mubr.bf16.mxu0 %v2512_v0  ;;  %1893 = vmatprep.mubr.bf16.mxu1 %v2512_v0 }
  0x91   : > { %2329 = vmatmul.mubr.msk.bf16.vlgmr.msra.gmra.mrb[60].mxu0 %vm586_vm0, %v2570_v17  ;;  %2330 = vmatmul.mubr.msk.bf16.vlgmr.msra.gmra.mrb[60].mxu1 %vm586_vm0, %v2570_v17 }
  0xec   : > { %v624_v5 = vpop.f32.mrb[0].mxu0  ;;  %v665_v6 = vpop.f32.mrb[0].mxu1 }
  0xed   : > { %2360 = vtanh.f32 %v624_v5  ;;  %v626_v7 = vpop.f32.mrb[1].mxu0  ;;  %v667_v8 = vpop.f32.mrb[1].mxu1 }
  0xee   : > { %2362 = vtanh.f32 %v665_v6  ;;  %v628_v9 = vpop.f32.mrb[2].mxu0  ;;  %v669_v10 = vpop.f32.mrb[2].mxu1 }
  0xef   : > { %2364 = vtanh.f32 %v626_v7  ;;  %v629_v11 = vpop.f32.mrb[3].mxu0  ;;  %v670_v12 = vpop.f32.mrb[3].mxu1 }
  0xf0   : > { %2366 = vtanh.f32 %v667_v8 }
  0xf4   : > { %v706_v0 = vpop.f32.mrb[4].mxu0  ;;  %v747_v13 = vpop.f32.mrb[4].mxu1 }
  0xf5   : > { %2368 = vtanh.f32 %v706_v0  ;;  %v708_v14 = vpop.f32.mrb[5].mxu0  ;;  %v749_v17 = vpop.f32.mrb[5].mxu1 }
  0xf6   : > { %2370 = vtanh.f32 %v747_v13  ;;  %v710_v15 = vpop.f32.mrb[6].mxu0  ;;  %v751_v18 = vpop.f32.mrb[6].mxu1 }
  0xf7   : > { %v2361_v16 = vpop.eup %2360  ;;  %2372 = vtanh.f32 %v708_v14  ;;  %v711_v19 = vpop.f32.mrb[7].mxu0 }
  0xf8   : > { %v2363_v20 = vpop.eup %2362  ;;  %2374 = vtanh.f32 %v749_v17  ;;  %v752_v21 = vpop.f32.mrb[7].mxu1 }
  0xf9   : > { %v2365_v22 = vpop.eup %2364 }
  0xfa   : > { %v2367_v23 = vpop.eup %2366  ;;  %v2030_v24 = vcombine.low %v2361_v16, %v2365_v22 }
  0xfb   : > { %v2031_v25 = vcombine.low %v2363_v20, %v2367_v23 }
  0xfc   : > { %2094 = vst [vmem:[%s2724_s24] sm:$0x77] %v2030_v24  ;;  %v788_v26 = vpop.f32.mrb[8].mxu0  ;;  %v829_v27 = vpop.f32.mrb[8].mxu1 }
  0xfd   : > { %2095 = vst [vmem:[%s2724_s24 + $0x8] sm:$0x77] %v2031_v25  ;;  %2376 = vtanh.f32 %v788_v26  ;;  %v790_v28 = vpop.f32.mrb[9].mxu0  ;;  %v831_v29 = vpop.f32.mrb[9].mxu1 }
  0xfe   : > { %2378 = vtanh.f32 %v829_v27  ;;  %v792_v30 = vpop.f32.mrb[10].mxu0  ;;  %v833_v32 = vpop.f32.mrb[10].mxu1 }
  0xff   : > { %v2369_v31 = vpop.eup %2368  ;;  %2380 = vtanh.f32 %v790_v28  ;;  %v793_v33 = vpop.f32.mrb[11].mxu0 }
 0x100   : > { %v2371_v34 = vpop.eup %2370  ;;  %2382 = vtanh.f32 %v831_v29  ;;  %v834_v35 = vpop.f32.mrb[11].mxu1 }
 0x101   : > { %v2373_v36 = vpop.eup %2372 }
 0x102   : > { %v2375_v37 = vpop.eup %2374  ;;  %v2032_v38 = vcombine.low %v2369_v31, %v2373_v36 }
 0x103   : > { %v2033_v39 = vcombine.low %v2371_v34, %v2375_v37 }
 0x104   : > { %2096 = vst [vmem:[%s2724_s24 + $0x10] sm:$0x77] %v2032_v38  ;;  %v870_v40 = vpop.f32.mrb[12].mxu0  ;;  %v911_v41 = vpop.f32.mrb[12].mxu1 }
 0x105   : > { %2097 = vst [vmem:[%s2724_s24 + $0x18] sm:$0x77] %v2033_v39  ;;  %2384 = vtanh.f32 %v870_v40  ;;  %v872_v42 = vpop.f32.mrb[13].mxu0  ;;  %v913_v43 = vpop.f32.mrb[13].mxu1 }
 0x106   : > { %2386 = vtanh.f32 %v911_v41  ;;  %v874_v44 = vpop.f32.mrb[14].mxu0  ;;  %v915_v46 = vpop.f32.mrb[14].mxu1 }
 0x107   : > { %v2377_v45 = vpop.eup %2376  ;;  %2388 = vtanh.f32 %v872_v42  ;;  %v875_v47 = vpop.f32.mrb[15].mxu0 }
 0x108   : > { %v2379_v48 = vpop.eup %2378  ;;  %2390 = vtanh.f32 %v913_v43  ;;  %v916_v49 = vpop.f32.mrb[15].mxu1 }
 0x109   : > { %v2381_v50 = vpop.eup %2380 }
 0x10a   : > { %v2383_v51 = vpop.eup %2382  ;;  %v2034_v52 = vcombine.low %v2377_v45, %v2381_v50 }
 0x10b   : > { %v2035_v53 = vcombine.low %v2379_v48, %v2383_v51 }
 0x10c   : > { %2098 = vst [vmem:[%s2724_s24 + $0x20] sm:$0x77] %v2034_v52  ;;  %v952_v54 = vpop.f32.mrb[16].mxu0  ;;  %v993_v55 = vpop.f32.mrb[16].mxu1 }
 0x10d   : > { %2099 = vst [vmem:[%s2724_s24 + $0x28] sm:$0x77] %v2035_v53  ;;  %2392 = vtanh.f32 %v952_v54  ;;  %v954_v56 = vpop.f32.mrb[17].mxu0  ;;  %v995_v57 = vpop.f32.mrb[17].mxu1 }
 0x10e   : > { %2394 = vtanh.f32 %v993_v55  ;;  %v956_v58 = vpop.f32.mrb[18].mxu0  ;;  %v997_v60 = vpop.f32.mrb[18].mxu1 }
 0x10f   : > { %v2385_v59 = vpop.eup %2384  ;;  %2396 = vtanh.f32 %v954_v56  ;;  %v957_v61 = vpop.f32.mrb[19].mxu0 }
 0x110   : > { %v2387_v62 = vpop.eup %2386  ;;  %2398 = vtanh.f32 %v995_v57  ;;  %v998_v63 = vpop.f32.mrb[19].mxu1 }
 0x111   : > { %v2389_v1 = vpop.eup %2388 }
 0x112   : > { %v2391_v2 = vpop.eup %2390  ;;  %v2036_v3 = vcombine.low %v2385_v59, %v2389_v1 }
 0x113   : > { %v2037_v4 = vcombine.low %v2387_v62, %v2391_v2 }
 0x114   : > { %2100 = vst [vmem:[%s2724_s24 + $0x30] sm:$0x77] %v2036_v3  ;;  %v1034_v5 = vpop.f32.mrb[20].mxu0  ;;  %v1075_v6 = vpop.f32.mrb[20].mxu1 }
 0x115   : > { %2101 = vst [vmem:[%s2724_s24 + $0x38] sm:$0x77] %v2037_v4  ;;  %2400 = vtanh.f32 %v1034_v5  ;;  %v1036_v7 = vpop.f32.mrb[21].mxu0  ;;  %v1077_v8 = vpop.f32.mrb[21].mxu1 }
 0x116   : > { %2402 = vtanh.f32 %v1075_v6  ;;  %v1038_v9 = vpop.f32.mrb[22].mxu0  ;;  %v1079_v11 = vpop.f32.mrb[22].mxu1 }
 0x117   : > { %v2393_v10 = vpop.eup %2392  ;;  %2404 = vtanh.f32 %v1036_v7  ;;  %v1039_v12 = vpop.f32.mrb[23].mxu0 }
 0x118   : > { %v2395_v0 = vpop.eup %2394  ;;  %2406 = vtanh.f32 %v1077_v8  ;;  %v1080_v13 = vpop.f32.mrb[23].mxu1 }
 0x119   : > { %v2397_v14 = vpop.eup %2396 }
 0x11a   : > { %v2399_v17 = vpop.eup %2398  ;;  %v2038_v15 = vcombine.low %v2393_v10, %v2397_v14 }
 0x11b   : > { %v2039_v16 = vcombine.low %v2395_v0, %v2399_v17 }
 0x11c   : > { %2102 = vst [vmem:[%s2724_s24 + $0x40] sm:$0x77] %v2038_v15  ;;  %v1116_v18 = vpop.f32.mrb[24].mxu0  ;;  %v1157_v19 = vpop.f32.mrb[24].mxu1 }
 0x11d   : > { %2103 = vst [vmem:[%s2724_s24 + $0x48] sm:$0x77] %v2039_v16  ;;  %2408 = vtanh.f32 %v1116_v18  ;;  %v1118_v20 = vpop.f32.mrb[25].mxu0  ;;  %v1159_v21 = vpop.f32.mrb[25].mxu1 }
 0x11e   : > { %2410 = vtanh.f32 %v1157_v19  ;;  %v1120_v22 = vpop.f32.mrb[26].mxu0  ;;  %v1161_v24 = vpop.f32.mrb[26].mxu1 }
 0x11f   : > { %v2401_v23 = vpop.eup %2400  ;;  %2412 = vtanh.f32 %v1118_v20  ;;  %v1121_v25 = vpop.f32.mrb[27].mxu0 }
 0x120   : > { %v2403_v26 = vpop.eup %2402  ;;  %2414 = vtanh.f32 %v1159_v21  ;;  %v1162_v27 = vpop.f32.mrb[27].mxu1 }
 0x121   : > { %v2405_v28 = vpop.eup %2404 }
 0x122   : > { %v2407_v29 = vpop.eup %2406  ;;  %v2040_v30 = vcombine.low %v2401_v23, %v2405_v28 }
 0x123   : > { %v2041_v31 = vcombine.low %v2403_v26, %v2407_v29 }
 0x124   : > { %2104 = vst [vmem:[%s2724_s24 + $0x50] sm:$0x77] %v2040_v30  ;;  %v1198_v32 = vpop.f32.mrb[28].mxu0  ;;  %v1239_v33 = vpop.f32.mrb[28].mxu1 }
 0x125   : > { %2105 = vst [vmem:[%s2724_s24 + $0x58] sm:$0x77] %v2041_v31  ;;  %2416 = vtanh.f32 %v1198_v32  ;;  %v1200_v34 = vpop.f32.mrb[29].mxu0  ;;  %v1241_v35 = vpop.f32.mrb[29].mxu1 }
 0x126   : > { %2418 = vtanh.f32 %v1239_v33  ;;  %v1202_v36 = vpop.f32.mrb[30].mxu0  ;;  %v1243_v38 = vpop.f32.mrb[30].mxu1 }
 0x127   : > { %v2409_v37 = vpop.eup %2408  ;;  %2420 = vtanh.f32 %v1200_v34  ;;  %v1203_v39 = vpop.f32.mrb[31].mxu0 }
 0x128   : > { %v2411_v40 = vpop.eup %2410  ;;  %2422 = vtanh.f32 %v1241_v35  ;;  %v1244_v41 = vpop.f32.mrb[31].mxu1 }
 0x129   : > { %v2413_v42 = vpop.eup %2412 }
 0x12a   : > { %v2415_v43 = vpop.eup %2414  ;;  %v2042_v44 = vcombine.low %v2409_v37, %v2413_v42 }
 0x12b   : > { %v2043_v45 = vcombine.low %v2411_v40, %v2415_v43 }
 0x12c   : > { %2106 = vst [vmem:[%s2724_s24 + $0x60] sm:$0x77] %v2042_v44  ;;  %v1280_v46 = vpop.f32.mrb[32].mxu0  ;;  %v1321_v47 = vpop.f32.mrb[32].mxu1 }
 0x12d   : > { %2107 = vst [vmem:[%s2724_s24 + $0x68] sm:$0x77] %v2043_v45  ;;  %2424 = vtanh.f32 %v1280_v46  ;;  %v1282_v48 = vpop.f32.mrb[33].mxu0  ;;  %v1323_v49 = vpop.f32.mrb[33].mxu1 }
 0x12e   : > { %2426 = vtanh.f32 %v1321_v47  ;;  %v1284_v50 = vpop.f32.mrb[34].mxu0  ;;  %v1325_v52 = vpop.f32.mrb[34].mxu1 }
 0x12f   : > { %v2417_v51 = vpop.eup %2416  ;;  %2428 = vtanh.f32 %v1282_v48  ;;  %v1285_v53 = vpop.f32.mrb[35].mxu0 }
 0x130   : > { %v2419_v54 = vpop.eup %2418  ;;  %2430 = vtanh.f32 %v1323_v49  ;;  %v1326_v55 = vpop.f32.mrb[35].mxu1 }
 0x131   : > { %v2421_v56 = vpop.eup %2420 }
 0x132   : > { %v2423_v57 = vpop.eup %2422  ;;  %v2044_v58 = vcombine.low %v2417_v51, %v2421_v56 }
 0x133   : > { %v2045_v59 = vcombine.low %v2419_v54, %v2423_v57 }
 0x134   : > { %2108 = vst [vmem:[%s2724_s24 + $0x70] sm:$0x77] %v2044_v58  ;;  %v1362_v60 = vpop.f32.mrb[36].mxu0  ;;  %v1403_v61 = vpop.f32.mrb[36].mxu1 }
 0x135   : > { %2109 = vst [vmem:[%s2724_s24 + $0x78] sm:$0x77] %v2045_v59  ;;  %2432 = vtanh.f32 %v1362_v60  ;;  %v1364_v62 = vpop.f32.mrb[37].mxu0  ;;  %v1405_v63 = vpop.f32.mrb[37].mxu1 }
 0x136   : > { %2434 = vtanh.f32 %v1403_v61  ;;  %v1366_v1 = vpop.f32.mrb[38].mxu0  ;;  %v1407_v3 = vpop.f32.mrb[38].mxu1 }
 0x137   : > { %v2425_v2 = vpop.eup %2424  ;;  %2436 = vtanh.f32 %v1364_v62  ;;  %v1367_v4 = vpop.f32.mrb[39].mxu0 }
 0x138   : > { %v2427_v5 = vpop.eup %2426  ;;  %2438 = vtanh.f32 %v1405_v63  ;;  %v1408_v6 = vpop.f32.mrb[39].mxu1 }
 0x139   : > { %v2429_v7 = vpop.eup %2428 }
 0x13a   : > { %v2431_v8 = vpop.eup %2430  ;;  %v2046_v9 = vcombine.low %v2425_v2, %v2429_v7 }
 0x13b   : > { %v2047_v10 = vcombine.low %v2427_v5, %v2431_v8 }
 0x13c   : > { %2110 = vst [vmem:[%s2724_s24 + $0x80] sm:$0x77] %v2046_v9  ;;  %v1444_v11 = vpop.f32.mrb[40].mxu0  ;;  %v1485_v12 = vpop.f32.mrb[40].mxu1 }
 0x13d   : > { %2111 = vst [vmem:[%s2724_s24 + $0x88] sm:$0x77] %v2047_v10  ;;  %2440 = vtanh.f32 %v1444_v11  ;;  %v1446_v0 = vpop.f32.mrb[41].mxu0  ;;  %v1487_v13 = vpop.f32.mrb[41].mxu1 }
 0x13e   : > { %2442 = vtanh.f32 %v1485_v12  ;;  %v1448_v14 = vpop.f32.mrb[42].mxu0  ;;  %v1489_v15 = vpop.f32.mrb[42].mxu1 }
 0x13f   : > { %v2433_v17 = vpop.eup %2432  ;;  %2444 = vtanh.f32 %v1446_v0  ;;  %v1449_v16 = vpop.f32.mrb[43].mxu0 }
 0x140   : > { %v2435_v18 = vpop.eup %2434  ;;  %2446 = vtanh.f32 %v1487_v13  ;;  %v1490_v19 = vpop.f32.mrb[43].mxu1 }
 0x141   : > { %v2437_v20 = vpop.eup %2436 }
 0x142   : > { %v2439_v21 = vpop.eup %2438  ;;  %v2048_v22 = vcombine.low %v2433_v17, %v2437_v20 }
 0x143   : > { %v2049_v23 = vcombine.low %v2435_v18, %v2439_v21 }
 0x144   : > { %2112 = vst [vmem:[%s2724_s24 + $0x90] sm:$0x77] %v2048_v22  ;;  %v1526_v24 = vpop.f32.mrb[44].mxu0  ;;  %v1567_v25 = vpop.f32.mrb[44].mxu1 }
 0x145   : > { %2113 = vst [vmem:[%s2724_s24 + $0x98] sm:$0x77] %v2049_v23  ;;  %2448 = vtanh.f32 %v1526_v24  ;;  %v1528_v26 = vpop.f32.mrb[45].mxu0  ;;  %v1569_v27 = vpop.f32.mrb[45].mxu1 }
 0x146   : > { %2450 = vtanh.f32 %v1567_v25  ;;  %v1530_v28 = vpop.f32.mrb[46].mxu0  ;;  %v1571_v30 = vpop.f32.mrb[46].mxu1 }
 0x147   : > { %v2441_v29 = vpop.eup %2440  ;;  %2452 = vtanh.f32 %v1528_v26  ;;  %v1531_v31 = vpop.f32.mrb[47].mxu0 }
 0x148   : > { %v2443_v32 = vpop.eup %2442  ;;  %2454 = vtanh.f32 %v1569_v27  ;;  %v1572_v33 = vpop.f32.mrb[47].mxu1 }
 0x149   : > { %v2445_v34 = vpop.eup %2444 }
 0x14a   : > { %v2447_v35 = vpop.eup %2446  ;;  %v2050_v36 = vcombine.low %v2441_v29, %v2445_v34 }
 0x14b   : > { %v2051_v37 = vcombine.low %v2443_v32, %v2447_v35 }
 0x14c   : > { %2114 = vst [vmem:[%s2724_s24 + $0xa0] sm:$0x77] %v2050_v36  ;;  %v1608_v38 = vpop.f32.mrb[48].mxu0  ;;  %v1649_v39 = vpop.f32.mrb[48].mxu1 }
 0x14d   : > { %2115 = vst [vmem:[%s2724_s24 + $0xa8] sm:$0x77] %v2051_v37  ;;  %2456 = vtanh.f32 %v1608_v38  ;;  %v1610_v40 = vpop.f32.mrb[49].mxu0  ;;  %v1651_v41 = vpop.f32.mrb[49].mxu1 }
 0x14e   : > { %2458 = vtanh.f32 %v1649_v39  ;;  %v1612_v42 = vpop.f32.mrb[50].mxu0  ;;  %v1653_v44 = vpop.f32.mrb[50].mxu1 }
 0x14f   : > { %v2449_v43 = vpop.eup %2448  ;;  %2460 = vtanh.f32 %v1610_v40  ;;  %v1613_v45 = vpop.f32.mrb[51].mxu0 }
 0x150   : > { %v2451_v46 = vpop.eup %2450  ;;  %2462 = vtanh.f32 %v1651_v41  ;;  %v1654_v47 = vpop.f32.mrb[51].mxu1 }
 0x151   : > { %v2453_v48 = vpop.eup %2452 }
 0x152   : > { %v2455_v49 = vpop.eup %2454  ;;  %v2052_v50 = vcombine.low %v2449_v43, %v2453_v48 }
 0x153   : > { %v2053_v51 = vcombine.low %v2451_v46, %v2455_v49 }
 0x154   : > { %2116 = vst [vmem:[%s2724_s24 + $0xb0] sm:$0x77] %v2052_v50  ;;  %v1690_v52 = vpop.f32.mrb[52].mxu0  ;;  %v1731_v53 = vpop.f32.mrb[52].mxu1 }
 0x155   : > { %2117 = vst [vmem:[%s2724_s24 + $0xb8] sm:$0x77] %v2053_v51  ;;  %2464 = vtanh.f32 %v1690_v52  ;;  %v1692_v54 = vpop.f32.mrb[53].mxu0  ;;  %v1733_v55 = vpop.f32.mrb[53].mxu1 }
 0x156   : > { %2466 = vtanh.f32 %v1731_v53  ;;  %v1694_v56 = vpop.f32.mrb[54].mxu0  ;;  %v1735_v58 = vpop.f32.mrb[54].mxu1 }
 0x157   : > { %v2457_v57 = vpop.eup %2456  ;;  %2468 = vtanh.f32 %v1692_v54  ;;  %v1695_v59 = vpop.f32.mrb[55].mxu0 }
 0x158   : > { %v2459_v60 = vpop.eup %2458  ;;  %2470 = vtanh.f32 %v1733_v55  ;;  %v1736_v61 = vpop.f32.mrb[55].mxu1 }
 0x159   : > { %v2461_v62 = vpop.eup %2460 }
 0x15a   : > { %v2463_v63 = vpop.eup %2462  ;;  %v2054_v1 = vcombine.low %v2457_v57, %v2461_v62 }
 0x15b   : > { %v2055_v2 = vcombine.low %v2459_v60, %v2463_v63 }
 0x15c   : > { %2118 = vst [vmem:[%s2724_s24 + $0xc0] sm:$0x77] %v2054_v1  ;;  %v1772_v3 = vpop.f32.mrb[56].mxu0  ;;  %v1813_v4 = vpop.f32.mrb[56].mxu1 }
 0x15d   : > { %2119 = vst [vmem:[%s2724_s24 + $0xc8] sm:$0x77] %v2055_v2  ;;  %2472 = vtanh.f32 %v1772_v3  ;;  %v1774_v5 = vpop.f32.mrb[57].mxu0  ;;  %v1815_v6 = vpop.f32.mrb[57].mxu1 }
 0x15e   : > { %2474 = vtanh.f32 %v1813_v4  ;;  %v1776_v7 = vpop.f32.mrb[58].mxu0  ;;  %v1817_v9 = vpop.f32.mrb[58].mxu1 }
 0x15f   : > { %v2465_v8 = vpop.eup %2464  ;;  %2476 = vtanh.f32 %v1774_v5  ;;  %v1777_v10 = vpop.f32.mrb[59].mxu0 }
 0x160   : > { %v2467_v11 = vpop.eup %2466  ;;  %2478 = vtanh.f32 %v1815_v6  ;;  %v1818_v12 = vpop.f32.mrb[59].mxu1 }
 0x161   : > { %v2469_v0 = vpop.eup %2468 }
 0x162   : > { %v2471_v13 = vpop.eup %2470  ;;  %v2056_v14 = vcombine.low %v2465_v8, %v2469_v0 }
 0x163   : > { %v2057_v17 = vcombine.low %v2467_v11, %v2471_v13 }
 0x164   : > { %2120 = vst [vmem:[%s2724_s24 + $0xd0] sm:$0x77] %v2056_v14  ;;  %v1854_v15 = vpop.f32.mrb[60].mxu0  ;;  %v1895_v16 = vpop.f32.mrb[60].mxu1 }
 0x165   : > { %2121 = vst [vmem:[%s2724_s24 + $0xd8] sm:$0x77] %v2057_v17  ;;  %2480 = vtanh.f32 %v1854_v15  ;;  %v1856_v18 = vpop.f32.mrb[61].mxu0  ;;  %v1897_v19 = vpop.f32.mrb[61].mxu1 }
 0x166   : > { %2482 = vtanh.f32 %v1895_v16  ;;  %v1858_v20 = vpop.f32.mrb[62].mxu0  ;;  %v1899_v22 = vpop.f32.mrb[62].mxu1 }
 0x167   : > { %v2473_v21 = vpop.eup %2472  ;;  %2484 = vtanh.f32 %v1856_v18  ;;  %v1859_v23 = vpop.f32.mrb[63].mxu0 }
 0x168   : > { %v2475_v24 = vpop.eup %2474  ;;  %2486 = vtanh.f32 %v1897_v19  ;;  %v1900_v25 = vpop.f32.mrb[63].mxu1 }
 0x169   : > { %v2477_v26 = vpop.eup %2476 }
 0x16a   : > { %v2479_v27 = vpop.eup %2478  ;;  %v2058_v28 = vcombine.low %v2473_v21, %v2477_v26 }
 0x16b   : > { %v2059_v29 = vcombine.low %v2475_v24, %v2479_v27 }
 0x16c   : > { %2122 = vst [vmem:[%s2724_s24 + $0xe0] sm:$0x77] %v2058_v28 }
 0x16d   : > { %2123 = vst [vmem:[%s2724_s24 + $0xe8] sm:$0x77] %v2059_v29 }
 0x16f   : > { %v2481_v30 = vpop.eup %2480 }
 0x170   : > { %v2483_v31 = vpop.eup %2482 }
 0x171   : > { %v2485_v32 = vpop.eup %2484 }
 0x172   : > { %v2487_v33 = vpop.eup %2486  ;;  %v2060_v34 = vcombine.low %v2481_v30, %v2485_v32 }
 0x173   : > { %v2061_v35 = vcombine.low %v2483_v31, %v2487_v33 }
 0x174   : > { %2124 = vst [vmem:[%s2724_s24 + $0xf0] sm:$0x77] %v2060_v34 }
 0x175   : > { %2125 = vst [vmem:[%s2724_s24 + $0xf8] sm:$0x77] %v2061_v35 }
 0x176 PF: > { %s12_s11 = sadd.s32 1, %s2510_s11   ;;  %s2770_s9 = smov %s2506_s10 }
 0x177   : > { %p9_p5 = scmp.ge.s32.totalorder %s12_s11, 6   ;;  %s2771_s10 = smov %s2773_s12 }
 0x179   :  { %11 = sbr.rel (!%p9_p5) target bundleno = 2 (0x2), region = 61 }

</bundles_post_ra>
